<compile_context>
chip_gen: v7x
topology: tpu7x:2x2x1
jax: 0.10.0
libtpu: 0.0.40
codegen_flags: <defaults>
</compile_context>

<pallas_src>
import functools

import jax
import jax.numpy as jnp
from jax.experimental import pallas as pl
from jax.experimental.pallas import tpu as pltpu


# ---------------------------------------------------------------------------
# Fused Res2Net kernel (one grid step == one block of Bblk samples)
# ---------------------------------------------------------------------------

def _res2net_kernel(x_ref, w1t_ref, b1_ref, w3_ref, b3_ref, wfc1_ref, wfc2_ref,
                    o_ref, row_buf, *, Bblk, H, W, d, scale, pad):
    f32 = jnp.float32
    HW = H * W
    M = Bblk * HW
    C = scale * d

    x3 = x_ref[...]                                   # (Bblk, HW, C) channels-last
    x = x3.reshape(M, C)                              # free: HW is a sublane multiple

    # ---- conv1 (1x1): one MXU matmul over the folded batch block ----------
    c1 = jnp.dot(x, w1t_ref[...], preferred_element_type=f32) + b1_ref[...]

    # ---- per-row coordinates for 3x3 border / cross-sample wrap masks -----
    row = jax.lax.broadcasted_iota(jnp.int32, (M, d), 0)
    if (HW & (HW - 1)) == 0 and (W & (W - 1)) == 0:   # pow2 path: cheap bit ops
        hw = row & (HW - 1)                           # row index inside its sample
        w_in = hw & (W - 1)                           # column index inside its row
    else:                                             # TODO(synk): vector int mod path
        hw = row % HW
        w_in = hw % W
    h_ok = {-1: hw >= W, 0: None, 1: hw < HW - W}      # 0 <= h+dh < H
    w_ok = {-1: w_in >= 1, 0: None, 1: w_in <= W - 2}  # 0 <= w+dw < W

    def tap_mask(dh, dw):
        a, b = h_ok[dh], w_ok[dw]
        if a is None:
            return b
        if b is None:
            return a
        return jnp.logical_and(a, b)

    # Halo rows of the flat row buffer: every out-of-image tap is masked
    # anyway, zeroing them once per grid step just keeps the scratch
    # deterministic.
    zpad = jnp.zeros((pad, d), f32)
    row_buf[0:pad, :] = zpad
    row_buf[pad + M:pad + M + pad, :] = zpad

    def conv3x3(inp, ci):
        # 3x3 / padding=1 conv as nine shifted accumulating (M,d)x(d,d)
        # matmuls: one aligned store of the branch tile, nine offset loads,
        # masks on the VPU, accumulation in f32 (MRB-friendly on v7x).
        row_buf[pad:pad + M, :] = inp                 # single aligned store
        acc = jnp.zeros((M, d), f32)
        for kh in range(3):
            for kw in range(3):
                dh, dw = kh - 1, kw - 1
                s = dh * W + dw
                v = inp if s == 0 else row_buf[pad + s:pad + s + M, :]
                m = tap_mask(dh, dw)
                if m is not None:
                    v = jnp.where(m, v, 0.0)
                acc = acc + jnp.dot(v, w3_ref[ci * 9 + kh * 3 + kw],
                                    preferred_element_type=f32)
        return acc + b3_ref[ci]

    # ---- Res2Net split / hierarchical 3x3 convs ---------------------------
    branches = [c1[:, 0:d]]                           # y1
    fea = conv3x3(c1[:, d:2 * d], 0)                  # self.conv2
    branches.append(fea)
    for i in range(scale - 2):                        # self.convs[i]
        pos = (i + 1) * d   # i=0 reuses c1[:, d:2d] -- mirrors the PyTorch code exactly
        fea = conv3x3(fea + c1[:, pos:pos + d], i + 1)
        branches.append(fea)

    # ---- second conv1 (1x1): accumulating matmuls over w1^T row blocks ----
    # (replaces concat-into-VMEM + a K=C matmul; no masked cat-store passes)
    c1b = jnp.dot(branches[0], w1t_ref[0:d, :],
                  preferred_element_type=f32) + b1_ref[...]
    for j in range(1, scale):
        c1b = c1b + jnp.dot(branches[j], w1t_ref[j * d:(j + 1) * d, :],
                            preferred_element_type=f32)

    # ---- SE block (strictly per sample) + residual -------------------------
    c1b3 = c1b.reshape(Bblk, HW, C)
    pooled = jnp.sum(c1b3, axis=1) * (1.0 / HW)       # AdaptiveAvgPool2d(1), (Bblk, C)
    hid = jnp.maximum(
        jnp.dot(pooled, wfc1_ref[...], preferred_element_type=f32), 0.0)
    gate = jax.nn.sigmoid(
        jnp.dot(hid, wfc2_ref[...], preferred_element_type=f32))  # (Bblk, C)
    o_ref[...] = x3 + c1b3 * gate[:, None, :]         # features_in + se_out


# ---------------------------------------------------------------------------
# One-time parameter preparation (hoisted weight re-layouts)
# ---------------------------------------------------------------------------

def prepare_params(p, scale=4):
    C = p['w_conv1'].shape[0]
    d = C // scale

    w1t = jnp.transpose(p['w_conv1'][:, :, 0, 0], (1, 0))            # (Cin, Cout)
    b1 = p['b_conv1'].reshape(1, C)

    def taps(w):   # (out, in, 3, 3) -> 9 x (in, out), tap index = kh*3 + kw
        return [jnp.transpose(w[:, :, kh, kw], (1, 0))
                for kh in range(3) for kw in range(3)]

    w3 = jnp.stack(taps(p['w_conv2'])
                   + [t for wi in p['w_convs'] for t in taps(wi)])    # (9*(scale-1), d, d)
    b3 = jnp.stack([p['b_conv2'].reshape(1, d)]
                   + [b.reshape(1, d) for b in p['b_convs']])         # (scale-1, 1, d)
    # TODO(synk): for production on v6e/v7x also emit bf16 copies of all
    # matmul weights here and cast activations at the dot sites (~1e-2 parity).
    return {'w1t': w1t, 'b1': b1, 'w3': w3, 'b3': b3,
            'wfc1': jnp.transpose(p['w_fc1']),                        # (C, C//r)
            'wfc2': jnp.transpose(p['w_fc2'])}                        # (C//r, C)


# ---------------------------------------------------------------------------
# Res2Net forward (single fused pallas_call, grid over batch blocks)
# ---------------------------------------------------------------------------

def _pick_block_batch(B, HW, target_m=256, min_m=128):
    """Samples folded per grid step so M = Bblk*HW keeps the MXU busy.

    Prefers an even grid length (v7x megacore sharding across two TCs) as long
    as that still leaves M >= min_m.  The per-step working set at C=64 is
    < 1 MiB, comfortably inside both 128 MiB (v5e/v6e) and 64 MiB (v7x) VMEM.
    """
    divisors = [bb for bb in range(1, B + 1) if B % bb == 0]
    cands = [bb for bb in divisors if bb * HW <= target_m] or [1]
    even = [bb for bb in cands if (B // bb) % 2 == 0 and bb * HW >= min_m]
    return max(even) if even else max(cands)


def res2net_pallas(x_nhwc, pp, scale=4, block_batch=None):
    """Fused Res2Net forward.  Channels-last (NHWC) in and out (no transposes)."""
    B, H, W, C = x_nhwc.shape
    d = C // scale
    n3 = scale - 1
    HW = H * W
    Cr = pp['wfc1'].shape[1]

    Bblk = _pick_block_batch(B, HW) if block_batch is None else block_batch
    assert B % Bblk == 0
    grid = (B // Bblk,)
    M = Bblk * HW
    pad = -(-(W + 1) // 8) * 8          # halo rows, kept sublane-aligned

    x_seq = x_nhwc.reshape(B, HW, C)    # free reshape (layout-preserving)

    kernel = functools.partial(_res2net_kernel, Bblk=Bblk, H=H, W=W, d=d,
                               scale=scale, pad=pad)

    flops = B * (2 * 2 * HW * C * C                   # two 1x1 convs
                 + n3 * 9 * 2 * HW * d * d            # 3x3 convs (9 taps each)
                 + 2 * (C * Cr + Cr * C))             # SE MLP
    bytes_acc = (2 * B * HW * C * 4                   # activations in + out
                 + (C * C + C) * 4                    # conv1 weights
                 + n3 * (9 * d * d + d) * 4           # 3x3 weights
                 + 2 * C * Cr * 4)                    # SE weights

    out_seq = pl.pallas_call(
        kernel,
        out_shape=jax.ShapeDtypeStruct((B, HW, C), jnp.float32),
        grid_spec=pltpu.PrefetchScalarGridSpec(
            num_scalar_prefetch=0,
            grid=grid,
            in_specs=[
                pl.BlockSpec((Bblk, HW, C), lambda b: (b, 0, 0)),     # x
                pl.BlockSpec((C, C), lambda b: (0, 0)),               # w1^T
                pl.BlockSpec((1, C), lambda b: (0, 0)),               # b1
                pl.BlockSpec((9 * n3, d, d), lambda b: (0, 0, 0)),    # 3x3 tap blocks
                pl.BlockSpec((n3, 1, d), lambda b: (0, 0, 0)),        # 3x3 biases
                pl.BlockSpec((C, Cr), lambda b: (0, 0)),              # SE fc1^T
                pl.BlockSpec((Cr, C), lambda b: (0, 0)),              # SE fc2^T
            ],
            out_specs=pl.BlockSpec((Bblk, HW, C), lambda b: (b, 0, 0)),
            scratch_shapes=[pltpu.VMEM((M + 2 * pad, d), jnp.float32)],  # flat halo rows
        ),
        compiler_params=pltpu.CompilerParams(
            dimension_semantics=("parallel",)),                       # v7x: 2 TCs
        cost_estimate=pl.CostEstimate(
            flops=flops, transcendentals=B * C, bytes_accessed=bytes_acc),
    )(x_seq, pp['w1t'], pp['b1'], pp['w3'], pp['b3'], pp['wfc1'], pp['wfc2'])

    return out_seq.reshape(B, H, W, C)


# ---------------------------------------------------------------------------
# Parameters (deterministic synthetic init, PyTorch shapes)
# ---------------------------------------------------------------------------

def init_params(key, C, scale=4, reduction=1):
    d = C // scale
    ks = jax.random.split(key, 8)
    return {
        'w_conv1': jax.random.normal(ks[0], (C, C, 1, 1), jnp.float32) * 0.1,
        'b_conv1': jax.random.normal(ks[1], (C,), jnp.float32) * 0.1,
        'w_conv2': jax.random.normal(ks[2], (d, d, 3, 3), jnp.float32) * 0.1,
        'b_conv2': jax.random.normal(ks[3], (d,), jnp.float32) * 0.1,
        'w_convs': [jax.random.normal(jax.random.fold_in(ks[4], i), (d, d, 3, 3),
                                      jnp.float32) * 0.1 for i in range(scale - 2)],
        'b_convs': [jax.random.normal(jax.random.fold_in(ks[5], i), (d,),
                                      jnp.float32) * 0.1 for i in range(scale - 2)],
        'w_fc1': jax.random.normal(ks[6], (C // reduction, C), jnp.float32) * 0.1,
        'w_fc2': jax.random.normal(ks[7], (C, C // reduction), jnp.float32) * 0.1,
    }


# ---------------------------------------------------------------------------
# Pure-JAX reference (lax conv, channels-last) for correctness check
# ---------------------------------------------------------------------------

def res2net_ref(x, p, scale=4):
    """NHWC reference mirroring the PyTorch Res2Net.forward exactly."""
    B, H, W, C = x.shape
    d = C // scale

    def conv(xi, w, b, padding):
        o = jax.lax.conv_general_dilated(
            xi, w, window_strides=(1, 1),
            padding=((padding, padding), (padding, padding)),
            dimension_numbers=('NHWC', 'OIHW', 'NHWC'))
        return o + b[None, None, None, :]

    c1 = conv(x, p['w_conv1'], p['b_conv1'], 0)
    y1 = c1[..., 0:d]
    fea = conv(c1[..., d:2 * d], p['w_conv2'], p['b_conv2'], 1)
    feats = [fea]
    for i in range(scale - 2):
        pos = (i + 1) * d
        fea = conv(fea + c1[..., pos:pos + d], p['w_convs'][i], p['b_convs'][i], 1)
        feats.append(fea)
    out = jnp.concatenate([y1] + feats, axis=-1)
    c1b = conv(out, p['w_conv1'], p['b_conv1'], 0)
    pooled = jnp.mean(c1b, axis=(1, 2))
    hid = jnp.maximum(pooled @ p['w_fc1'].T, 0.0)
    gate = jax.nn.sigmoid(hid @ p['w_fc2'].T)
    return x + c1b * gate[:, None, None, :]


# ---------------------------------------------------------------------------

if __name__ == "__main__":
    key = jax.random.PRNGKey(0)
    k_x, k_p = jax.random.split(key)

    # Matches the module's encoder stage: Res2Net(64, 1, 4, 1, 1, 1).
    # Activations kept channels-last (NHWC) end-to-end -> no transposes around
    # the pallas_call.
    B, C, H, W = 2, 64, 8, 8
    scale, reduction = 4, 1

    x = jax.random.normal(k_x, (B, H, W, C), jnp.float32)
    params = init_params(k_p, C, scale=scale, reduction=reduction)
    pp = prepare_params(params, scale=scale)          # one-time weight re-layout

    fwd = jax.jit(functools.partial(res2net_pallas, scale=scale))
    out = jax.block_until_ready(fwd(x, pp))

    ref = jax.block_until_ready(res2net_ref(x, params, scale=scale))
    assert out.shape == (B, H, W, C)
    max_err = float(jnp.max(jnp.abs(out - ref)))
    assert jnp.allclose(out, ref, rtol=1e-3, atol=1e-3), max_err

    print("KERNEL_OK")
</pallas_src>

<mosaic_0001>
module attributes {stable_mosaic.version = 11 : i64} {
  func.func @_res2net_kernel(%arg0: i32, %arg1: memref<2x64x64xf32, #tpu.memory_space<vmem>>, %arg2: memref<64x64xf32, #tpu.memory_space<vmem>>, %arg3: memref<1x64xf32, #tpu.memory_space<vmem>>, %arg4: memref<27x16x16xf32, #tpu.memory_space<vmem>>, %arg5: memref<3x1x16xf32, #tpu.memory_space<vmem>>, %arg6: memref<64x64xf32, #tpu.memory_space<vmem>>, %arg7: memref<64x64xf32, #tpu.memory_space<vmem>>, %arg8: memref<2x64x64xf32, #tpu.memory_space<vmem>>, %arg9: memref<160x16xf32, #tpu.memory_space<vmem>>) attributes {dimension_semantics = [#tpu.dimension_semantics<parallel>], iteration_bounds = array<i64: 1>, scalar_prefetch = 0 : i64, scratch_operands = 1 : i64, tpu.core_type = #tpu.core_type<tc>, window_params = [{transform_indices = @transform_0, window_bounds = array<i64: 2, 64, 64>}, {pipeline_mode = #tpu.pipeline_mode<synchronous>, transform_indices = @transform_1, window_bounds = array<i64: 64, 64>}, {pipeline_mode = #tpu.pipeline_mode<synchronous>, transform_indices = @transform_2, window_bounds = array<i64: 1, 64>}, {pipeline_mode = #tpu.pipeline_mode<synchronous>, transform_indices = @transform_3, window_bounds = array<i64: 27, 16, 16>}, {pipeline_mode = #tpu.pipeline_mode<synchronous>, transform_indices = @transform_4, window_bounds = array<i64: 3, 1, 16>}, {pipeline_mode = #tpu.pipeline_mode<synchronous>, transform_indices = @transform_5, window_bounds = array<i64: 64, 64>}, {pipeline_mode = #tpu.pipeline_mode<synchronous>, transform_indices = @transform_6, window_bounds = array<i64: 64, 64>}, {transform_indices = @transform_7, window_bounds = array<i64: 2, 64, 64>}]} {
    %c0 = arith.constant 0 : index
    %c0_0 = arith.constant 0 : index
    %c0_1 = arith.constant 0 : index
    %0 = vector.load %arg1[%c0, %c0_0, %c0_1] : memref<2x64x64xf32, #tpu.memory_space<vmem>>, vector<2x64x64xf32>
    %1 = vector.shape_cast %0 : vector<2x64x64xf32> to vector<128x64xf32>
    %c0_2 = arith.constant 0 : index
    %c0_3 = arith.constant 0 : index
    %2 = vector.load %arg2[%c0_2, %c0_3] : memref<64x64xf32, #tpu.memory_space<vmem>>, vector<64x64xf32>
    %cst = arith.constant dense<0.000000e+00> : vector<128x64xf32>
    %3 = tpu.matmul %1, %2, %cst {dimension_numbers = #tpu.dot_dimension_numbers<[1], [0], [0], [1], [0, 0, 1, 1], [], []>} : vector<128x64xf32>, vector<64x64xf32>, vector<128x64xf32> -> vector<128x64xf32>
    %c0_4 = arith.constant 0 : index
    %c0_5 = arith.constant 0 : index
    %4 = vector.load %arg3[%c0_4, %c0_5] : memref<1x64xf32, #tpu.memory_space<vmem>>, vector<1x64xf32>
    %5 = vector.broadcast %4 : vector<1x64xf32> to vector<128x64xf32>
    %6 = arith.addf %3, %5 : vector<128x64xf32>
    %7 = tpu.iota {dimensions = array<i32: 0>} : vector<128x16xi32>
    %c63_i32 = arith.constant 63 : i32
    %8 = vector.broadcast %c63_i32 : i32 to vector<128x16xi32>
    %9 = arith.andi %7, %8 : vector<128x16xi32>
    %c7_i32 = arith.constant 7 : i32
    %10 = vector.broadcast %c7_i32 : i32 to vector<128x16xi32>
    %11 = arith.andi %9, %10 : vector<128x16xi32>
    %c8_i32 = arith.constant 8 : i32
    %12 = vector.broadcast %c8_i32 : i32 to vector<128x16xi32>
    %13 = arith.cmpi sge, %9, %12 : vector<128x16xi32>
    %c56_i32 = arith.constant 56 : i32
    %14 = vector.broadcast %c56_i32 : i32 to vector<128x16xi32>
    %15 = arith.cmpi slt, %9, %14 : vector<128x16xi32>
    %c1_i32 = arith.constant 1 : i32
    %16 = vector.broadcast %c1_i32 : i32 to vector<128x16xi32>
    %17 = arith.cmpi sge, %11, %16 : vector<128x16xi32>
    %c6_i32 = arith.constant 6 : i32
    %18 = vector.broadcast %c6_i32 : i32 to vector<128x16xi32>
    %19 = arith.cmpi sle, %11, %18 : vector<128x16xi32>
    %cst_6 = arith.constant 0.000000e+00 : f32
    %20 = vector.broadcast %cst_6 : f32 to vector<16x16xf32>
    %c0_7 = arith.constant 0 : index
    %c0_8 = arith.constant 0 : index
    %21 = vector.load %arg9[%c0_7, %c0_8] : memref<160x16xf32, #tpu.memory_space<vmem>>, vector<16x16xf32>
    tpu.vector_store %arg9[%c0_7, %c0_8], %20 {strides = array<i32>} : memref<160x16xf32, #tpu.memory_space<vmem>>, vector<16x16xf32>,
    %c144 = arith.constant 144 : index
    %c0_9 = arith.constant 0 : index
    %22 = vector.load %arg9[%c144, %c0_9] : memref<160x16xf32, #tpu.memory_space<vmem>>, vector<16x16xf32>
    tpu.vector_store %arg9[%c144, %c0_9], %20 {strides = array<i32>} : memref<160x16xf32, #tpu.memory_space<vmem>>, vector<16x16xf32>,
    %23 = vector.extract_strided_slice %6 {offsets = [0, 0], sizes = [128, 16], strides = [1, 1]} : vector<128x64xf32> to vector<128x16xf32>
    %24 = vector.extract_strided_slice %6 {offsets = [0, 16], sizes = [128, 16], strides = [1, 1]} : vector<128x64xf32> to vector<128x16xf32>
    %c16 = arith.constant 16 : index
    %c0_10 = arith.constant 0 : index
    %25 = vector.load %arg9[%c16, %c0_10] : memref<160x16xf32, #tpu.memory_space<vmem>>, vector<128x16xf32>
    tpu.vector_store %arg9[%c16, %c0_10], %24 {strides = array<i32>} : memref<160x16xf32, #tpu.memory_space<vmem>>, vector<128x16xf32>,
    %cst_11 = arith.constant 0.000000e+00 : f32
    %26 = vector.broadcast %cst_11 : f32 to vector<128x16xf32>
    %c7 = arith.constant 7 : index
    %c0_12 = arith.constant 0 : index
    %27 = vector.load %arg9[%c7, %c0_12] : memref<160x16xf32, #tpu.memory_space<vmem>>, vector<128x16xf32>
    %28 = arith.andi %13, %17 : vector<128x16xi1>
    %cst_13 = arith.constant 0.000000e+00 : f32
    %29 = vector.broadcast %cst_13 : f32 to vector<128x16xf32>
    %30 = arith.select %28, %27, %29 : vector<128x16xi1>, vector<128x16xf32>
    %c0_14 = arith.constant 0 : index
    %c0_15 = arith.constant 0 : index
    %c0_16 = arith.constant 0 : index
    %31 = vector.load %arg4[%c0_14, %c0_15, %c0_16] : memref<27x16x16xf32, #tpu.memory_space<vmem>>, vector<1x16x16xf32>
    %32 = vector.shape_cast %31 : vector<1x16x16xf32> to vector<16x16xf32>
    %cst_17 = arith.constant dense<0.000000e+00> : vector<128x16xf32>
    %33 = tpu.matmul %30, %32, %cst_17 {dimension_numbers = #tpu.dot_dimension_numbers<[1], [0], [0], [1], [0, 0, 1, 1], [], []>} : vector<128x16xf32>, vector<16x16xf32>, vector<128x16xf32> -> vector<128x16xf32>
    %34 = arith.addf %26, %33 : vector<128x16xf32>
    %c8 = arith.constant 8 : index
    %c0_18 = arith.constant 0 : index
    %35 = vector.load %arg9[%c8, %c0_18] : memref<160x16xf32, #tpu.memory_space<vmem>>, vector<128x16xf32>
    %cst_19 = arith.constant 0.000000e+00 : f32
    %36 = vector.broadcast %cst_19 : f32 to vector<128x16xf32>
    %37 = arith.select %13, %35, %36 : vector<128x16xi1>, vector<128x16xf32>
    %c1 = arith.constant 1 : index
    %c0_20 = arith.constant 0 : index
    %c0_21 = arith.constant 0 : index
    %38 = vector.load %arg4[%c1, %c0_20, %c0_21] : memref<27x16x16xf32, #tpu.memory_space<vmem>>, vector<1x16x16xf32>
    %39 = vector.shape_cast %38 : vector<1x16x16xf32> to vector<16x16xf32>
    %cst_22 = arith.constant dense<0.000000e+00> : vector<128x16xf32>
    %40 = tpu.matmul %37, %39, %cst_22 {dimension_numbers = #tpu.dot_dimension_numbers<[1], [0], [0], [1], [0, 0, 1, 1], [], []>} : vector<128x16xf32>, vector<16x16xf32>, vector<128x16xf32> -> vector<128x16xf32>
    %41 = arith.addf %34, %40 : vector<128x16xf32>
    %c9 = arith.constant 9 : index
    %c0_23 = arith.constant 0 : index
    %42 = vector.load %arg9[%c9, %c0_23] : memref<160x16xf32, #tpu.memory_space<vmem>>, vector<128x16xf32>
    %43 = arith.andi %13, %19 : vector<128x16xi1>
    %cst_24 = arith.constant 0.000000e+00 : f32
    %44 = vector.broadcast %cst_24 : f32 to vector<128x16xf32>
    %45 = arith.select %43, %42, %44 : vector<128x16xi1>, vector<128x16xf32>
    %c2 = arith.constant 2 : index
    %c0_25 = arith.constant 0 : index
    %c0_26 = arith.constant 0 : index
    %46 = vector.load %arg4[%c2, %c0_25, %c0_26] : memref<27x16x16xf32, #tpu.memory_space<vmem>>, vector<1x16x16xf32>
    %47 = vector.shape_cast %46 : vector<1x16x16xf32> to vector<16x16xf32>
    %cst_27 = arith.constant dense<0.000000e+00> : vector<128x16xf32>
    %48 = tpu.matmul %45, %47, %cst_27 {dimension_numbers = #tpu.dot_dimension_numbers<[1], [0], [0], [1], [0, 0, 1, 1], [], []>} : vector<128x16xf32>, vector<16x16xf32>, vector<128x16xf32> -> vector<128x16xf32>
    %49 = arith.addf %41, %48 : vector<128x16xf32>
    %c15 = arith.constant 15 : index
    %c0_28 = arith.constant 0 : index
    %50 = vector.load %arg9[%c15, %c0_28] : memref<160x16xf32, #tpu.memory_space<vmem>>, vector<128x16xf32>
    %cst_29 = arith.constant 0.000000e+00 : f32
    %51 = vector.broadcast %cst_29 : f32 to vector<128x16xf32>
    %52 = arith.select %17, %50, %51 : vector<128x16xi1>, vector<128x16xf32>
    %c3 = arith.constant 3 : index
    %c0_30 = arith.constant 0 : index
    %c0_31 = arith.constant 0 : index
    %53 = vector.load %arg4[%c3, %c0_30, %c0_31] : memref<27x16x16xf32, #tpu.memory_space<vmem>>, vector<1x16x16xf32>
    %54 = vector.shape_cast %53 : vector<1x16x16xf32> to vector<16x16xf32>
    %cst_32 = arith.constant dense<0.000000e+00> : vector<128x16xf32>
    %55 = tpu.matmul %52, %54, %cst_32 {dimension_numbers = #tpu.dot_dimension_numbers<[1], [0], [0], [1], [0, 0, 1, 1], [], []>} : vector<128x16xf32>, vector<16x16xf32>, vector<128x16xf32> -> vector<128x16xf32>
    %56 = arith.addf %49, %55 : vector<128x16xf32>
    %c4 = arith.constant 4 : index
    %c0_33 = arith.constant 0 : index
    %c0_34 = arith.constant 0 : index
    %57 = vector.load %arg4[%c4, %c0_33, %c0_34] : memref<27x16x16xf32, #tpu.memory_space<vmem>>, vector<1x16x16xf32>
    %58 = vector.shape_cast %57 : vector<1x16x16xf32> to vector<16x16xf32>
    %cst_35 = arith.constant dense<0.000000e+00> : vector<128x16xf32>
    %59 = tpu.matmul %24, %58, %cst_35 {dimension_numbers = #tpu.dot_dimension_numbers<[1], [0], [0], [1], [0, 0, 1, 1], [], []>} : vector<128x16xf32>, vector<16x16xf32>, vector<128x16xf32> -> vector<128x16xf32>
    %60 = arith.addf %56, %59 : vector<128x16xf32>
    %c17 = arith.constant 17 : index
    %c0_36 = arith.constant 0 : index
    %61 = vector.load %arg9[%c17, %c0_36] : memref<160x16xf32, #tpu.memory_space<vmem>>, vector<128x16xf32>
    %cst_37 = arith.constant 0.000000e+00 : f32
    %62 = vector.broadcast %cst_37 : f32 to vector<128x16xf32>
    %63 = arith.select %19, %61, %62 : vector<128x16xi1>, vector<128x16xf32>
    %c5 = arith.constant 5 : index
    %c0_38 = arith.constant 0 : index
    %c0_39 = arith.constant 0 : index
    %64 = vector.load %arg4[%c5, %c0_38, %c0_39] : memref<27x16x16xf32, #tpu.memory_space<vmem>>, vector<1x16x16xf32>
    %65 = vector.shape_cast %64 : vector<1x16x16xf32> to vector<16x16xf32>
    %cst_40 = arith.constant dense<0.000000e+00> : vector<128x16xf32>
    %66 = tpu.matmul %63, %65, %cst_40 {dimension_numbers = #tpu.dot_dimension_numbers<[1], [0], [0], [1], [0, 0, 1, 1], [], []>} : vector<128x16xf32>, vector<16x16xf32>, vector<128x16xf32> -> vector<128x16xf32>
    %67 = arith.addf %60, %66 : vector<128x16xf32>
    %c23 = arith.constant 23 : index
    %c0_41 = arith.constant 0 : index
    %68 = vector.load %arg9[%c23, %c0_41] : memref<160x16xf32, #tpu.memory_space<vmem>>, vector<128x16xf32>
    %69 = arith.andi %15, %17 : vector<128x16xi1>
    %cst_42 = arith.constant 0.000000e+00 : f32
    %70 = vector.broadcast %cst_42 : f32 to vector<128x16xf32>
    %71 = arith.select %69, %68, %70 : vector<128x16xi1>, vector<128x16xf32>
    %c6 = arith.constant 6 : index
    %c0_43 = arith.constant 0 : index
    %c0_44 = arith.constant 0 : index
    %72 = vector.load %arg4[%c6, %c0_43, %c0_44] : memref<27x16x16xf32, #tpu.memory_space<vmem>>, vector<1x16x16xf32>
    %73 = vector.shape_cast %72 : vector<1x16x16xf32> to vector<16x16xf32>
    %cst_45 = arith.constant dense<0.000000e+00> : vector<128x16xf32>
    %74 = tpu.matmul %71, %73, %cst_45 {dimension_numbers = #tpu.dot_dimension_numbers<[1], [0], [0], [1], [0, 0, 1, 1], [], []>} : vector<128x16xf32>, vector<16x16xf32>, vector<128x16xf32> -> vector<128x16xf32>
    %75 = arith.addf %67, %74 : vector<128x16xf32>
    %c24 = arith.constant 24 : index
    %c0_46 = arith.constant 0 : index
    %76 = vector.load %arg9[%c24, %c0_46] : memref<160x16xf32, #tpu.memory_space<vmem>>, vector<128x16xf32>
    %cst_47 = arith.constant 0.000000e+00 : f32
    %77 = vector.broadcast %cst_47 : f32 to vector<128x16xf32>
    %78 = arith.select %15, %76, %77 : vector<128x16xi1>, vector<128x16xf32>
    %c7_48 = arith.constant 7 : index
    %c0_49 = arith.constant 0 : index
    %c0_50 = arith.constant 0 : index
    %79 = vector.load %arg4[%c7_48, %c0_49, %c0_50] : memref<27x16x16xf32, #tpu.memory_space<vmem>>, vector<1x16x16xf32>
    %80 = vector.shape_cast %79 : vector<1x16x16xf32> to vector<16x16xf32>
    %cst_51 = arith.constant dense<0.000000e+00> : vector<128x16xf32>
    %81 = tpu.matmul %78, %80, %cst_51 {dimension_numbers = #tpu.dot_dimension_numbers<[1], [0], [0], [1], [0, 0, 1, 1], [], []>} : vector<128x16xf32>, vector<16x16xf32>, vector<128x16xf32> -> vector<128x16xf32>
    %82 = arith.addf %75, %81 : vector<128x16xf32>
    %c25 = arith.constant 25 : index
    %c0_52 = arith.constant 0 : index
    %83 = vector.load %arg9[%c25, %c0_52] : memref<160x16xf32, #tpu.memory_space<vmem>>, vector<128x16xf32>
    %84 = arith.andi %15, %19 : vector<128x16xi1>
    %cst_53 = arith.constant 0.000000e+00 : f32
    %85 = vector.broadcast %cst_53 : f32 to vector<128x16xf32>
    %86 = arith.select %84, %83, %85 : vector<128x16xi1>, vector<128x16xf32>
    %c8_54 = arith.constant 8 : index
    %c0_55 = arith.constant 0 : index
    %c0_56 = arith.constant 0 : index
    %87 = vector.load %arg4[%c8_54, %c0_55, %c0_56] : memref<27x16x16xf32, #tpu.memory_space<vmem>>, vector<1x16x16xf32>
    %88 = vector.shape_cast %87 : vector<1x16x16xf32> to vector<16x16xf32>
    %cst_57 = arith.constant dense<0.000000e+00> : vector<128x16xf32>
    %89 = tpu.matmul %86, %88, %cst_57 {dimension_numbers = #tpu.dot_dimension_numbers<[1], [0], [0], [1], [0, 0, 1, 1], [], []>} : vector<128x16xf32>, vector<16x16xf32>, vector<128x16xf32> -> vector<128x16xf32>
    %90 = arith.addf %82, %89 : vector<128x16xf32>
    %c0_58 = arith.constant 0 : index
    %c0_59 = arith.constant 0 : index
    %c0_60 = arith.constant 0 : index
    %91 = vector.load %arg5[%c0_58, %c0_59, %c0_60] : memref<3x1x16xf32, #tpu.memory_space<vmem>>, vector<1x1x16xf32>
    %92 = vector.shape_cast %91 : vector<1x1x16xf32> to vector<1x16xf32>
    %93 = vector.broadcast %92 : vector<1x16xf32> to vector<128x16xf32>
    %94 = arith.addf %90, %93 : vector<128x16xf32>
    %95 = vector.extract_strided_slice %6 {offsets = [0, 16], sizes = [128, 16], strides = [1, 1]} : vector<128x64xf32> to vector<128x16xf32>
    %96 = arith.addf %94, %95 : vector<128x16xf32>
    %c16_61 = arith.constant 16 : index
    %c0_62 = arith.constant 0 : index
    %97 = vector.load %arg9[%c16_61, %c0_62] : memref<160x16xf32, #tpu.memory_space<vmem>>, vector<128x16xf32>
    tpu.vector_store %arg9[%c16_61, %c0_62], %96 {strides = array<i32>} : memref<160x16xf32, #tpu.memory_space<vmem>>, vector<128x16xf32>,
    %cst_63 = arith.constant 0.000000e+00 : f32
    %98 = vector.broadcast %cst_63 : f32 to vector<128x16xf32>
    %c7_64 = arith.constant 7 : index
    %c0_65 = arith.constant 0 : index
    %99 = vector.load %arg9[%c7_64, %c0_65] : memref<160x16xf32, #tpu.memory_space<vmem>>, vector<128x16xf32>
    %100 = arith.andi %13, %17 : vector<128x16xi1>
    %cst_66 = arith.constant 0.000000e+00 : f32
    %101 = vector.broadcast %cst_66 : f32 to vector<128x16xf32>
    %102 = arith.select %100, %99, %101 : vector<128x16xi1>, vector<128x16xf32>
    %c9_67 = arith.constant 9 : index
    %c0_68 = arith.constant 0 : index
    %c0_69 = arith.constant 0 : index
    %103 = vector.load %arg4[%c9_67, %c0_68, %c0_69] : memref<27x16x16xf32, #tpu.memory_space<vmem>>, vector<1x16x16xf32>
    %104 = vector.shape_cast %103 : vector<1x16x16xf32> to vector<16x16xf32>
    %cst_70 = arith.constant dense<0.000000e+00> : vector<128x16xf32>
    %105 = tpu.matmul %102, %104, %cst_70 {dimension_numbers = #tpu.dot_dimension_numbers<[1], [0], [0], [1], [0, 0, 1, 1], [], []>} : vector<128x16xf32>, vector<16x16xf32>, vector<128x16xf32> -> vector<128x16xf32>
    %106 = arith.addf %98, %105 : vector<128x16xf32>
    %c8_71 = arith.constant 8 : index
    %c0_72 = arith.constant 0 : index
    %107 = vector.load %arg9[%c8_71, %c0_72] : memref<160x16xf32, #tpu.memory_space<vmem>>, vector<128x16xf32>
    %cst_73 = arith.constant 0.000000e+00 : f32
    %108 = vector.broadcast %cst_73 : f32 to vector<128x16xf32>
    %109 = arith.select %13, %107, %108 : vector<128x16xi1>, vector<128x16xf32>
    %c10 = arith.constant 10 : index
    %c0_74 = arith.constant 0 : index
    %c0_75 = arith.constant 0 : index
    %110 = vector.load %arg4[%c10, %c0_74, %c0_75] : memref<27x16x16xf32, #tpu.memory_space<vmem>>, vector<1x16x16xf32>
    %111 = vector.shape_cast %110 : vector<1x16x16xf32> to vector<16x16xf32>
    %cst_76 = arith.constant dense<0.000000e+00> : vector<128x16xf32>
    %112 = tpu.matmul %109, %111, %cst_76 {dimension_numbers = #tpu.dot_dimension_numbers<[1], [0], [0], [1], [0, 0, 1, 1], [], []>} : vector<128x16xf32>, vector<16x16xf32>, vector<128x16xf32> -> vector<128x16xf32>
    %113 = arith.addf %106, %112 : vector<128x16xf32>
    %c9_77 = arith.constant 9 : index
    %c0_78 = arith.constant 0 : index
    %114 = vector.load %arg9[%c9_77, %c0_78] : memref<160x16xf32, #tpu.memory_space<vmem>>, vector<128x16xf32>
    %115 = arith.andi %13, %19 : vector<128x16xi1>
    %cst_79 = arith.constant 0.000000e+00 : f32
    %116 = vector.broadcast %cst_79 : f32 to vector<128x16xf32>
    %117 = arith.select %115, %114, %116 : vector<128x16xi1>, vector<128x16xf32>
    %c11 = arith.constant 11 : index
    %c0_80 = arith.constant 0 : index
    %c0_81 = arith.constant 0 : index
    %118 = vector.load %arg4[%c11, %c0_80, %c0_81] : memref<27x16x16xf32, #tpu.memory_space<vmem>>, vector<1x16x16xf32>
    %119 = vector.shape_cast %118 : vector<1x16x16xf32> to vector<16x16xf32>
    %cst_82 = arith.constant dense<0.000000e+00> : vector<128x16xf32>
    %120 = tpu.matmul %117, %119, %cst_82 {dimension_numbers = #tpu.dot_dimension_numbers<[1], [0], [0], [1], [0, 0, 1, 1], [], []>} : vector<128x16xf32>, vector<16x16xf32>, vector<128x16xf32> -> vector<128x16xf32>
    %121 = arith.addf %113, %120 : vector<128x16xf32>
    %c15_83 = arith.constant 15 : index
    %c0_84 = arith.constant 0 : index
    %122 = vector.load %arg9[%c15_83, %c0_84] : memref<160x16xf32, #tpu.memory_space<vmem>>, vector<128x16xf32>
    %cst_85 = arith.constant 0.000000e+00 : f32
    %123 = vector.broadcast %cst_85 : f32 to vector<128x16xf32>
    %124 = arith.select %17, %122, %123 : vector<128x16xi1>, vector<128x16xf32>
    %c12 = arith.constant 12 : index
    %c0_86 = arith.constant 0 : index
    %c0_87 = arith.constant 0 : index
    %125 = vector.load %arg4[%c12, %c0_86, %c0_87] : memref<27x16x16xf32, #tpu.memory_space<vmem>>, vector<1x16x16xf32>
    %126 = vector.shape_cast %125 : vector<1x16x16xf32> to vector<16x16xf32>
    %cst_88 = arith.constant dense<0.000000e+00> : vector<128x16xf32>
    %127 = tpu.matmul %124, %126, %cst_88 {dimension_numbers = #tpu.dot_dimension_numbers<[1], [0], [0], [1], [0, 0, 1, 1], [], []>} : vector<128x16xf32>, vector<16x16xf32>, vector<128x16xf32> -> vector<128x16xf32>
    %128 = arith.addf %121, %127 : vector<128x16xf32>
    %c13 = arith.constant 13 : index
    %c0_89 = arith.constant 0 : index
    %c0_90 = arith.constant 0 : index
    %129 = vector.load %arg4[%c13, %c0_89, %c0_90] : memref<27x16x16xf32, #tpu.memory_space<vmem>>, vector<1x16x16xf32>
    %130 = vector.shape_cast %129 : vector<1x16x16xf32> to vector<16x16xf32>
    %cst_91 = arith.constant dense<0.000000e+00> : vector<128x16xf32>
    %131 = tpu.matmul %96, %130, %cst_91 {dimension_numbers = #tpu.dot_dimension_numbers<[1], [0], [0], [1], [0, 0, 1, 1], [], []>} : vector<128x16xf32>, vector<16x16xf32>, vector<128x16xf32> -> vector<128x16xf32>
    %132 = arith.addf %128, %131 : vector<128x16xf32>
    %c17_92 = arith.constant 17 : index
    %c0_93 = arith.constant 0 : index
    %133 = vector.load %arg9[%c17_92, %c0_93] : memref<160x16xf32, #tpu.memory_space<vmem>>, vector<128x16xf32>
    %cst_94 = arith.constant 0.000000e+00 : f32
    %134 = vector.broadcast %cst_94 : f32 to vector<128x16xf32>
    %135 = arith.select %19, %133, %134 : vector<128x16xi1>, vector<128x16xf32>
    %c14 = arith.constant 14 : index
    %c0_95 = arith.constant 0 : index
    %c0_96 = arith.constant 0 : index
    %136 = vector.load %arg4[%c14, %c0_95, %c0_96] : memref<27x16x16xf32, #tpu.memory_space<vmem>>, vector<1x16x16xf32>
    %137 = vector.shape_cast %136 : vector<1x16x16xf32> to vector<16x16xf32>
    %cst_97 = arith.constant dense<0.000000e+00> : vector<128x16xf32>
    %138 = tpu.matmul %135, %137, %cst_97 {dimension_numbers = #tpu.dot_dimension_numbers<[1], [0], [0], [1], [0, 0, 1, 1], [], []>} : vector<128x16xf32>, vector<16x16xf32>, vector<128x16xf32> -> vector<128x16xf32>
    %139 = arith.addf %132, %138 : vector<128x16xf32>
    %c23_98 = arith.constant 23 : index
    %c0_99 = arith.constant 0 : index
    %140 = vector.load %arg9[%c23_98, %c0_99] : memref<160x16xf32, #tpu.memory_space<vmem>>, vector<128x16xf32>
    %141 = arith.andi %15, %17 : vector<128x16xi1>
    %cst_100 = arith.constant 0.000000e+00 : f32
    %142 = vector.broadcast %cst_100 : f32 to vector<128x16xf32>
    %143 = arith.select %141, %140, %142 : vector<128x16xi1>, vector<128x16xf32>
    %c15_101 = arith.constant 15 : index
    %c0_102 = arith.constant 0 : index
    %c0_103 = arith.constant 0 : index
    %144 = vector.load %arg4[%c15_101, %c0_102, %c0_103] : memref<27x16x16xf32, #tpu.memory_space<vmem>>, vector<1x16x16xf32>
    %145 = vector.shape_cast %144 : vector<1x16x16xf32> to vector<16x16xf32>
    %cst_104 = arith.constant dense<0.000000e+00> : vector<128x16xf32>
    %146 = tpu.matmul %143, %145, %cst_104 {dimension_numbers = #tpu.dot_dimension_numbers<[1], [0], [0], [1], [0, 0, 1, 1], [], []>} : vector<128x16xf32>, vector<16x16xf32>, vector<128x16xf32> -> vector<128x16xf32>
    %147 = arith.addf %139, %146 : vector<128x16xf32>
    %c24_105 = arith.constant 24 : index
    %c0_106 = arith.constant 0 : index
    %148 = vector.load %arg9[%c24_105, %c0_106] : memref<160x16xf32, #tpu.memory_space<vmem>>, vector<128x16xf32>
    %cst_107 = arith.constant 0.000000e+00 : f32
    %149 = vector.broadcast %cst_107 : f32 to vector<128x16xf32>
    %150 = arith.select %15, %148, %149 : vector<128x16xi1>, vector<128x16xf32>
    %c16_108 = arith.constant 16 : index
    %c0_109 = arith.constant 0 : index
    %c0_110 = arith.constant 0 : index
    %151 = vector.load %arg4[%c16_108, %c0_109, %c0_110] : memref<27x16x16xf32, #tpu.memory_space<vmem>>, vector<1x16x16xf32>
    %152 = vector.shape_cast %151 : vector<1x16x16xf32> to vector<16x16xf32>
    %cst_111 = arith.constant dense<0.000000e+00> : vector<128x16xf32>
    %153 = tpu.matmul %150, %152, %cst_111 {dimension_numbers = #tpu.dot_dimension_numbers<[1], [0], [0], [1], [0, 0, 1, 1], [], []>} : vector<128x16xf32>, vector<16x16xf32>, vector<128x16xf32> -> vector<128x16xf32>
    %154 = arith.addf %147, %153 : vector<128x16xf32>
    %c25_112 = arith.constant 25 : index
    %c0_113 = arith.constant 0 : index
    %155 = vector.load %arg9[%c25_112, %c0_113] : memref<160x16xf32, #tpu.memory_space<vmem>>, vector<128x16xf32>
    %156 = arith.andi %15, %19 : vector<128x16xi1>
    %cst_114 = arith.constant 0.000000e+00 : f32
    %157 = vector.broadcast %cst_114 : f32 to vector<128x16xf32>
    %158 = arith.select %156, %155, %157 : vector<128x16xi1>, vector<128x16xf32>
    %c17_115 = arith.constant 17 : index
    %c0_116 = arith.constant 0 : index
    %c0_117 = arith.constant 0 : index
    %159 = vector.load %arg4[%c17_115, %c0_116, %c0_117] : memref<27x16x16xf32, #tpu.memory_space<vmem>>, vector<1x16x16xf32>
    %160 = vector.shape_cast %159 : vector<1x16x16xf32> to vector<16x16xf32>
    %cst_118 = arith.constant dense<0.000000e+00> : vector<128x16xf32>
    %161 = tpu.matmul %158, %160, %cst_118 {dimension_numbers = #tpu.dot_dimension_numbers<[1], [0], [0], [1], [0, 0, 1, 1], [], []>} : vector<128x16xf32>, vector<16x16xf32>, vector<128x16xf32> -> vector<128x16xf32>
    %162 = arith.addf %154, %161 : vector<128x16xf32>
    %c1_119 = arith.constant 1 : index
    %c0_120 = arith.constant 0 : index
    %c0_121 = arith.constant 0 : index
    %163 = vector.load %arg5[%c1_119, %c0_120, %c0_121] : memref<3x1x16xf32, #tpu.memory_space<vmem>>, vector<1x1x16xf32>
    %164 = vector.shape_cast %163 : vector<1x1x16xf32> to vector<1x16xf32>
    %165 = vector.broadcast %164 : vector<1x16xf32> to vector<128x16xf32>
    %166 = arith.addf %162, %165 : vector<128x16xf32>
    %167 = vector.extract_strided_slice %6 {offsets = [0, 32], sizes = [128, 16], strides = [1, 1]} : vector<128x64xf32> to vector<128x16xf32>
    %168 = arith.addf %166, %167 : vector<128x16xf32>
    %c16_122 = arith.constant 16 : index
    %c0_123 = arith.constant 0 : index
    %169 = vector.load %arg9[%c16_122, %c0_123] : memref<160x16xf32, #tpu.memory_space<vmem>>, vector<128x16xf32>
    tpu.vector_store %arg9[%c16_122, %c0_123], %168 {strides = array<i32>} : memref<160x16xf32, #tpu.memory_space<vmem>>, vector<128x16xf32>,
    %cst_124 = arith.constant 0.000000e+00 : f32
    %170 = vector.broadcast %cst_124 : f32 to vector<128x16xf32>
    %c7_125 = arith.constant 7 : index
    %c0_126 = arith.constant 0 : index
    %171 = vector.load %arg9[%c7_125, %c0_126] : memref<160x16xf32, #tpu.memory_space<vmem>>, vector<128x16xf32>
    %172 = arith.andi %13, %17 : vector<128x16xi1>
    %cst_127 = arith.constant 0.000000e+00 : f32
    %173 = vector.broadcast %cst_127 : f32 to vector<128x16xf32>
    %174 = arith.select %172, %171, %173 : vector<128x16xi1>, vector<128x16xf32>
    %c18 = arith.constant 18 : index
    %c0_128 = arith.constant 0 : index
    %c0_129 = arith.constant 0 : index
    %175 = vector.load %arg4[%c18, %c0_128, %c0_129] : memref<27x16x16xf32, #tpu.memory_space<vmem>>, vector<1x16x16xf32>
    %176 = vector.shape_cast %175 : vector<1x16x16xf32> to vector<16x16xf32>
    %cst_130 = arith.constant dense<0.000000e+00> : vector<128x16xf32>
    %177 = tpu.matmul %174, %176, %cst_130 {dimension_numbers = #tpu.dot_dimension_numbers<[1], [0], [0], [1], [0, 0, 1, 1], [], []>} : vector<128x16xf32>, vector<16x16xf32>, vector<128x16xf32> -> vector<128x16xf32>
    %178 = arith.addf %170, %177 : vector<128x16xf32>
    %c8_131 = arith.constant 8 : index
    %c0_132 = arith.constant 0 : index
    %179 = vector.load %arg9[%c8_131, %c0_132] : memref<160x16xf32, #tpu.memory_space<vmem>>, vector<128x16xf32>
    %cst_133 = arith.constant 0.000000e+00 : f32
    %180 = vector.broadcast %cst_133 : f32 to vector<128x16xf32>
    %181 = arith.select %13, %179, %180 : vector<128x16xi1>, vector<128x16xf32>
    %c19 = arith.constant 19 : index
    %c0_134 = arith.constant 0 : index
    %c0_135 = arith.constant 0 : index
    %182 = vector.load %arg4[%c19, %c0_134, %c0_135] : memref<27x16x16xf32, #tpu.memory_space<vmem>>, vector<1x16x16xf32>
    %183 = vector.shape_cast %182 : vector<1x16x16xf32> to vector<16x16xf32>
    %cst_136 = arith.constant dense<0.000000e+00> : vector<128x16xf32>
    %184 = tpu.matmul %181, %183, %cst_136 {dimension_numbers = #tpu.dot_dimension_numbers<[1], [0], [0], [1], [0, 0, 1, 1], [], []>} : vector<128x16xf32>, vector<16x16xf32>, vector<128x16xf32> -> vector<128x16xf32>
    %185 = arith.addf %178, %184 : vector<128x16xf32>
    %c9_137 = arith.constant 9 : index
    %c0_138 = arith.constant 0 : index
    %186 = vector.load %arg9[%c9_137, %c0_138] : memref<160x16xf32, #tpu.memory_space<vmem>>, vector<128x16xf32>
    %187 = arith.andi %13, %19 : vector<128x16xi1>
    %cst_139 = arith.constant 0.000000e+00 : f32
    %188 = vector.broadcast %cst_139 : f32 to vector<128x16xf32>
    %189 = arith.select %187, %186, %188 : vector<128x16xi1>, vector<128x16xf32>
    %c20 = arith.constant 20 : index
    %c0_140 = arith.constant 0 : index
    %c0_141 = arith.constant 0 : index
    %190 = vector.load %arg4[%c20, %c0_140, %c0_141] : memref<27x16x16xf32, #tpu.memory_space<vmem>>, vector<1x16x16xf32>
    %191 = vector.shape_cast %190 : vector<1x16x16xf32> to vector<16x16xf32>
    %cst_142 = arith.constant dense<0.000000e+00> : vector<128x16xf32>
    %192 = tpu.matmul %189, %191, %cst_142 {dimension_numbers = #tpu.dot_dimension_numbers<[1], [0], [0], [1], [0, 0, 1, 1], [], []>} : vector<128x16xf32>, vector<16x16xf32>, vector<128x16xf32> -> vector<128x16xf32>
    %193 = arith.addf %185, %192 : vector<128x16xf32>
    %c15_143 = arith.constant 15 : index
    %c0_144 = arith.constant 0 : index
    %194 = vector.load %arg9[%c15_143, %c0_144] : memref<160x16xf32, #tpu.memory_space<vmem>>, vector<128x16xf32>
    %cst_145 = arith.constant 0.000000e+00 : f32
    %195 = vector.broadcast %cst_145 : f32 to vector<128x16xf32>
    %196 = arith.select %17, %194, %195 : vector<128x16xi1>, vector<128x16xf32>
    %c21 = arith.constant 21 : index
    %c0_146 = arith.constant 0 : index
    %c0_147 = arith.constant 0 : index
    %197 = vector.load %arg4[%c21, %c0_146, %c0_147] : memref<27x16x16xf32, #tpu.memory_space<vmem>>, vector<1x16x16xf32>
    %198 = vector.shape_cast %197 : vector<1x16x16xf32> to vector<16x16xf32>
    %cst_148 = arith.constant dense<0.000000e+00> : vector<128x16xf32>
    %199 = tpu.matmul %196, %198, %cst_148 {dimension_numbers = #tpu.dot_dimension_numbers<[1], [0], [0], [1], [0, 0, 1, 1], [], []>} : vector<128x16xf32>, vector<16x16xf32>, vector<128x16xf32> -> vector<128x16xf32>
    %200 = arith.addf %193, %199 : vector<128x16xf32>
    %c22 = arith.constant 22 : index
    %c0_149 = arith.constant 0 : index
    %c0_150 = arith.constant 0 : index
    %201 = vector.load %arg4[%c22, %c0_149, %c0_150] : memref<27x16x16xf32, #tpu.memory_space<vmem>>, vector<1x16x16xf32>
    %202 = vector.shape_cast %201 : vector<1x16x16xf32> to vector<16x16xf32>
    %cst_151 = arith.constant dense<0.000000e+00> : vector<128x16xf32>
    %203 = tpu.matmul %168, %202, %cst_151 {dimension_numbers = #tpu.dot_dimension_numbers<[1], [0], [0], [1], [0, 0, 1, 1], [], []>} : vector<128x16xf32>, vector<16x16xf32>, vector<128x16xf32> -> vector<128x16xf32>
    %204 = arith.addf %200, %203 : vector<128x16xf32>
    %c17_152 = arith.constant 17 : index
    %c0_153 = arith.constant 0 : index
    %205 = vector.load %arg9[%c17_152, %c0_153] : memref<160x16xf32, #tpu.memory_space<vmem>>, vector<128x16xf32>
    %cst_154 = arith.constant 0.000000e+00 : f32
    %206 = vector.broadcast %cst_154 : f32 to vector<128x16xf32>
    %207 = arith.select %19, %205, %206 : vector<128x16xi1>, vector<128x16xf32>
    %c23_155 = arith.constant 23 : index
    %c0_156 = arith.constant 0 : index
    %c0_157 = arith.constant 0 : index
    %208 = vector.load %arg4[%c23_155, %c0_156, %c0_157] : memref<27x16x16xf32, #tpu.memory_space<vmem>>, vector<1x16x16xf32>
    %209 = vector.shape_cast %208 : vector<1x16x16xf32> to vector<16x16xf32>
    %cst_158 = arith.constant dense<0.000000e+00> : vector<128x16xf32>
    %210 = tpu.matmul %207, %209, %cst_158 {dimension_numbers = #tpu.dot_dimension_numbers<[1], [0], [0], [1], [0, 0, 1, 1], [], []>} : vector<128x16xf32>, vector<16x16xf32>, vector<128x16xf32> -> vector<128x16xf32>
    %211 = arith.addf %204, %210 : vector<128x16xf32>
    %c23_159 = arith.constant 23 : index
    %c0_160 = arith.constant 0 : index
    %212 = vector.load %arg9[%c23_159, %c0_160] : memref<160x16xf32, #tpu.memory_space<vmem>>, vector<128x16xf32>
    %213 = arith.andi %15, %17 : vector<128x16xi1>
    %cst_161 = arith.constant 0.000000e+00 : f32
    %214 = vector.broadcast %cst_161 : f32 to vector<128x16xf32>
    %215 = arith.select %213, %212, %214 : vector<128x16xi1>, vector<128x16xf32>
    %c24_162 = arith.constant 24 : index
    %c0_163 = arith.constant 0 : index
    %c0_164 = arith.constant 0 : index
    %216 = vector.load %arg4[%c24_162, %c0_163, %c0_164] : memref<27x16x16xf32, #tpu.memory_space<vmem>>, vector<1x16x16xf32>
    %217 = vector.shape_cast %216 : vector<1x16x16xf32> to vector<16x16xf32>
    %cst_165 = arith.constant dense<0.000000e+00> : vector<128x16xf32>
    %218 = tpu.matmul %215, %217, %cst_165 {dimension_numbers = #tpu.dot_dimension_numbers<[1], [0], [0], [1], [0, 0, 1, 1], [], []>} : vector<128x16xf32>, vector<16x16xf32>, vector<128x16xf32> -> vector<128x16xf32>
    %219 = arith.addf %211, %218 : vector<128x16xf32>
    %c24_166 = arith.constant 24 : index
    %c0_167 = arith.constant 0 : index
    %220 = vector.load %arg9[%c24_166, %c0_167] : memref<160x16xf32, #tpu.memory_space<vmem>>, vector<128x16xf32>
    %cst_168 = arith.constant 0.000000e+00 : f32
    %221 = vector.broadcast %cst_168 : f32 to vector<128x16xf32>
    %222 = arith.select %15, %220, %221 : vector<128x16xi1>, vector<128x16xf32>
    %c25_169 = arith.constant 25 : index
    %c0_170 = arith.constant 0 : index
    %c0_171 = arith.constant 0 : index
    %223 = vector.load %arg4[%c25_169, %c0_170, %c0_171] : memref<27x16x16xf32, #tpu.memory_space<vmem>>, vector<1x16x16xf32>
    %224 = vector.shape_cast %223 : vector<1x16x16xf32> to vector<16x16xf32>
    %cst_172 = arith.constant dense<0.000000e+00> : vector<128x16xf32>
    %225 = tpu.matmul %222, %224, %cst_172 {dimension_numbers = #tpu.dot_dimension_numbers<[1], [0], [0], [1], [0, 0, 1, 1], [], []>} : vector<128x16xf32>, vector<16x16xf32>, vector<128x16xf32> -> vector<128x16xf32>
    %226 = arith.addf %219, %225 : vector<128x16xf32>
    %c25_173 = arith.constant 25 : index
    %c0_174 = arith.constant 0 : index
    %227 = vector.load %arg9[%c25_173, %c0_174] : memref<160x16xf32, #tpu.memory_space<vmem>>, vector<128x16xf32>
    %228 = arith.andi %15, %19 : vector<128x16xi1>
    %cst_175 = arith.constant 0.000000e+00 : f32
    %229 = vector.broadcast %cst_175 : f32 to vector<128x16xf32>
    %230 = arith.select %228, %227, %229 : vector<128x16xi1>, vector<128x16xf32>
    %c26 = arith.constant 26 : index
    %c0_176 = arith.constant 0 : index
    %c0_177 = arith.constant 0 : index
    %231 = vector.load %arg4[%c26, %c0_176, %c0_177] : memref<27x16x16xf32, #tpu.memory_space<vmem>>, vector<1x16x16xf32>
    %232 = vector.shape_cast %231 : vector<1x16x16xf32> to vector<16x16xf32>
    %cst_178 = arith.constant dense<0.000000e+00> : vector<128x16xf32>
    %233 = tpu.matmul %230, %232, %cst_178 {dimension_numbers = #tpu.dot_dimension_numbers<[1], [0], [0], [1], [0, 0, 1, 1], [], []>} : vector<128x16xf32>, vector<16x16xf32>, vector<128x16xf32> -> vector<128x16xf32>
    %234 = arith.addf %226, %233 : vector<128x16xf32>
    %c2_179 = arith.constant 2 : index
    %c0_180 = arith.constant 0 : index
    %c0_181 = arith.constant 0 : index
    %235 = vector.load %arg5[%c2_179, %c0_180, %c0_181] : memref<3x1x16xf32, #tpu.memory_space<vmem>>, vector<1x1x16xf32>
    %236 = vector.shape_cast %235 : vector<1x1x16xf32> to vector<1x16xf32>
    %237 = vector.broadcast %236 : vector<1x16xf32> to vector<128x16xf32>
    %238 = arith.addf %234, %237 : vector<128x16xf32>
    %c0_182 = arith.constant 0 : index
    %c0_183 = arith.constant 0 : index
    %239 = vector.load %arg2[%c0_182, %c0_183] : memref<64x64xf32, #tpu.memory_space<vmem>>, vector<16x64xf32>
    %cst_184 = arith.constant dense<0.000000e+00> : vector<128x64xf32>
    %240 = tpu.matmul %23, %239, %cst_184 {dimension_numbers = #tpu.dot_dimension_numbers<[1], [0], [0], [1], [0, 0, 1, 1], [], []>} : vector<128x16xf32>, vector<16x64xf32>, vector<128x64xf32> -> vector<128x64xf32>
    %c0_185 = arith.constant 0 : index
    %c0_186 = arith.constant 0 : index
    %241 = vector.load %arg3[%c0_185, %c0_186] : memref<1x64xf32, #tpu.memory_space<vmem>>, vector<1x64xf32>
    %242 = vector.broadcast %241 : vector<1x64xf32> to vector<128x64xf32>
    %243 = arith.addf %240, %242 : vector<128x64xf32>
    %c16_187 = arith.constant 16 : index
    %c0_188 = arith.constant 0 : index
    %244 = vector.load %arg2[%c16_187, %c0_188] : memref<64x64xf32, #tpu.memory_space<vmem>>, vector<16x64xf32>
    %cst_189 = arith.constant dense<0.000000e+00> : vector<128x64xf32>
    %245 = tpu.matmul %94, %244, %cst_189 {dimension_numbers = #tpu.dot_dimension_numbers<[1], [0], [0], [1], [0, 0, 1, 1], [], []>} : vector<128x16xf32>, vector<16x64xf32>, vector<128x64xf32> -> vector<128x64xf32>
    %246 = arith.addf %243, %245 : vector<128x64xf32>
    %c32 = arith.constant 32 : index
    %c0_190 = arith.constant 0 : index
    %247 = vector.load %arg2[%c32, %c0_190] : memref<64x64xf32, #tpu.memory_space<vmem>>, vector<16x64xf32>
    %cst_191 = arith.constant dense<0.000000e+00> : vector<128x64xf32>
    %248 = tpu.matmul %166, %247, %cst_191 {dimension_numbers = #tpu.dot_dimension_numbers<[1], [0], [0], [1], [0, 0, 1, 1], [], []>} : vector<128x16xf32>, vector<16x64xf32>, vector<128x64xf32> -> vector<128x64xf32>
    %249 = arith.addf %246, %248 : vector<128x64xf32>
    %c48 = arith.constant 48 : index
    %c0_192 = arith.constant 0 : index
    %250 = vector.load %arg2[%c48, %c0_192] : memref<64x64xf32, #tpu.memory_space<vmem>>, vector<16x64xf32>
    %cst_193 = arith.constant dense<0.000000e+00> : vector<128x64xf32>
    %251 = tpu.matmul %238, %250, %cst_193 {dimension_numbers = #tpu.dot_dimension_numbers<[1], [0], [0], [1], [0, 0, 1, 1], [], []>} : vector<128x16xf32>, vector<16x64xf32>, vector<128x64xf32> -> vector<128x64xf32>
    %252 = arith.addf %249, %251 : vector<128x64xf32>
    %253 = vector.shape_cast %252 : vector<128x64xf32> to vector<2x64x64xf32>
    %cst_194 = arith.constant dense<0.000000e+00> : vector<2x64xf32>
    %254 = vector.multi_reduction <add>, %253, %cst_194 [1] : vector<2x64x64xf32> to vector<2x64xf32>
    %cst_195 = arith.constant 1.562500e-02 : f32
    %255 = vector.broadcast %cst_195 : f32 to vector<2x64xf32>
    %256 = arith.mulf %254, %255 : vector<2x64xf32>
    %c0_196 = arith.constant 0 : index
    %c0_197 = arith.constant 0 : index
    %257 = vector.load %arg6[%c0_196, %c0_197] : memref<64x64xf32, #tpu.memory_space<vmem>>, vector<64x64xf32>
    %cst_198 = arith.constant dense<0.000000e+00> : vector<2x64xf32>
    %258 = tpu.matmul %256, %257, %cst_198 {dimension_numbers = #tpu.dot_dimension_numbers<[1], [0], [0], [1], [0, 0, 1, 1], [], []>} : vector<2x64xf32>, vector<64x64xf32>, vector<2x64xf32> -> vector<2x64xf32>
    %cst_199 = arith.constant 0.000000e+00 : f32
    %259 = vector.broadcast %cst_199 : f32 to vector<2x64xf32>
    %260 = arith.maximumf %258, %259 : vector<2x64xf32>
    %c0_200 = arith.constant 0 : index
    %c0_201 = arith.constant 0 : index
    %261 = vector.load %arg7[%c0_200, %c0_201] : memref<64x64xf32, #tpu.memory_space<vmem>>, vector<64x64xf32>
    %cst_202 = arith.constant dense<0.000000e+00> : vector<2x64xf32>
    %262 = tpu.matmul %260, %261, %cst_202 {dimension_numbers = #tpu.dot_dimension_numbers<[1], [0], [0], [1], [0, 0, 1, 1], [], []>} : vector<2x64xf32>, vector<64x64xf32>, vector<2x64xf32> -> vector<2x64xf32>
    %263 = arith.negf %262 : vector<2x64xf32>
    %264 = math.exp %263 : vector<2x64xf32>
    %cst_203 = arith.constant 1.000000e+00 : f32
    %265 = vector.broadcast %cst_203 : f32 to vector<2x64xf32>
    %266 = arith.addf %265, %264 : vector<2x64xf32>
    %267 = arith.divf %265, %266 : vector<2x64xf32>
    %268 = vector.shape_cast %267 : vector<2x64xf32> to vector<2x1x64xf32>
    %269 = vector.broadcast %268 : vector<2x1x64xf32> to vector<2x64x64xf32>
    %270 = arith.mulf %253, %269 : vector<2x64x64xf32>
    %271 = arith.addf %0, %270 : vector<2x64x64xf32>
    %c0_204 = arith.constant 0 : index
    %c0_205 = arith.constant 0 : index
    %c0_206 = arith.constant 0 : index
    %272 = vector.load %arg8[%c0_204, %c0_205, %c0_206] : memref<2x64x64xf32, #tpu.memory_space<vmem>>, vector<2x64x64xf32>
    tpu.vector_store %arg8[%c0_204, %c0_205, %c0_206], %271 {strides = array<i32>} : memref<2x64x64xf32, #tpu.memory_space<vmem>>, vector<2x64x64xf32>,
    return
  }
  func.func @transform_0(%arg0: i32) -> (i32, i32, i32) {
    %c0_i32 = arith.constant 0 : i32
    %c0_i32_0 = arith.constant 0 : i32
    %c0_i32_1 = arith.constant 0 : i32
    return %arg0, %c0_i32, %c0_i32_0 : i32, i32, i32
  }
  func.func @transform_1(%arg0: i32) -> (i32, i32) {
    %c0_i32 = arith.constant 0 : i32
    %c0_i32_0 = arith.constant 0 : i32
    %c0_i32_1 = arith.constant 0 : i32
    return %c0_i32, %c0_i32_0 : i32, i32
  }
  func.func @transform_2(%arg0: i32) -> (i32, i32) {
    %c0_i32 = arith.constant 0 : i32
    %c0_i32_0 = arith.constant 0 : i32
    %c0_i32_1 = arith.constant 0 : i32
    return %c0_i32, %c0_i32_0 : i32, i32
  }
  func.func @transform_3(%arg0: i32) -> (i32, i32, i32) {
    %c0_i32 = arith.constant 0 : i32
    %c0_i32_0 = arith.constant 0 : i32
    %c0_i32_1 = arith.constant 0 : i32
    %c0_i32_2 = arith.constant 0 : i32
    return %c0_i32, %c0_i32_0, %c0_i32_1 : i32, i32, i32
  }
  func.func @transform_4(%arg0: i32) -> (i32, i32, i32) {
    %c0_i32 = arith.constant 0 : i32
    %c0_i32_0 = arith.constant 0 : i32
    %c0_i32_1 = arith.constant 0 : i32
    %c0_i32_2 = arith.constant 0 : i32
    return %c0_i32, %c0_i32_0, %c0_i32_1 : i32, i32, i32
  }
  func.func @transform_5(%arg0: i32) -> (i32, i32) {
    %c0_i32 = arith.constant 0 : i32
    %c0_i32_0 = arith.constant 0 : i32
    %c0_i32_1 = arith.constant 0 : i32
    return %c0_i32, %c0_i32_0 : i32, i32
  }
  func.func @transform_6(%arg0: i32) -> (i32, i32) {
    %c0_i32 = arith.constant 0 : i32
    %c0_i32_0 = arith.constant 0 : i32
    %c0_i32_1 = arith.constant 0 : i32
    return %c0_i32, %c0_i32_0 : i32, i32
  }
  func.func @transform_7(%arg0: i32) -> (i32, i32, i32) {
    %c0_i32 = arith.constant 0 : i32
    %c0_i32_0 = arith.constant 0 : i32
    %c0_i32_1 = arith.constant 0 : i32
    return %arg0, %c0_i32, %c0_i32_0 : i32, i32, i32
  }
}

</mosaic_0001>

<bundles_post_ra>
// kernel: res2net_pallas.1
= control target key start
LH: loop header
LB: loop body
LE: loop exit
PB: predicated region body
PF: predicated region fallthrough
CT: control target
= control target key end

     0   :  { %vm13753_vm0 = vcmask 523264   ;;  %s13734_s0 = inlined_call_operand.vmem [shape: f32[2,64,64], index: 0, kind: input, shape index: {}]   ;;  %s13735_s1 = inlined_call_operand.vmem [shape: f32[64,64], index: 1, kind: input, shape index: {}]   ;;  %s13736_s2 = inlined_call_operand.vmem [shape: f32[1,64], index: 2, kind: input, shape index: {}]   ;;  %s13737_s3 = inlined_call_operand.vmem [shape: f32[27,16,16], index: 3, kind: input, shape index: {}]   ;;  %s13738_s4 = inlined_call_operand.vmem [shape: f32[3,1,16], index: 4, kind: input, shape index: {}]   ;;  %s13739_s5 = inlined_call_operand.vmem [shape: f32[64,64], index: 5, kind: input, shape index: {}]   ;;  %s13740_s6 = inlined_call_operand.vmem [shape: f32[64,64], index: 6, kind: input, shape index: {}]   ;;  %s13741_s7 = inlined_call_operand.hbm [shape: f32[2,64,64], index: 7, kind: output, shape index: {}]  }
   0x1   :  { %v43_v0 = vld [vmem:[%s13735_s1] sm:$0xff]  ;;  %v44_v1 = vld [vmem:[%s13735_s1 + $0x8] sm:$0xff]  ;;  %v45_v2 = vld [vmem:[%s13735_s1 + $0x10] sm:$0xff] }
   0x2   :  { %v10292_v3 = vpack.c.bf16 %v44_v1, %v43_v0  ;;  %v46_v4 = vld [vmem:[%s13735_s1 + $0x18] sm:$0xff]  ;;  %v47_v6 = vld [vmem:[%s13735_s1 + $0x20] sm:$0xff]  ;;  %v48_v7 = vld [vmem:[%s13735_s1 + $0x28] sm:$0xff] }
   0x3   :  { %v10296_v5 = vpack.c.bf16 %v46_v4, %v45_v2  ;;  %v27_v8 = vld [vmem:[%s13734_s0] sm:$0xff]  ;;  %v10300_v9 = vpack.c.bf16 %v48_v7, %v47_v6  ;;  %v49_v10 = vld [vmem:[%s13735_s1 + $0x30] sm:$0xff]  ;;  %v50_v11 = vld [vmem:[%s13735_s1 + $0x38] sm:$0xff] }
   0x4   :  { %10293 = vmatprep.subr.bf16.mxu0 %v10292_v3  ;;  %9362 = vmatprep.mubr.msk.f32.mxu0 %vm13753_vm0, %v27_v8 }
   0x5   :  { %10295 = vmatpush3.bf16.msra.mxu0 %v10292_v3 }
   0x6   :  { %10297 = vmatprep.subr.bf16.mxu0 %v10296_v5 }
   0x9   :  { %10299 = vmatpush3.bf16.msra.mxu0 %v10296_v5 }
   0xa   :  { %12 = vsyncpa [#allocation4], 0  ;;  %10301 = vmatprep.subr.bf16.mxu0 %v10300_v9  ;;  %v10304_v12 = vpack.c.bf16 %v50_v11, %v49_v10  ;;  %v28_v13 = vld [vmem:[%s13734_s0 + $0x8] sm:$0xff]  ;;  %v29_v14 = vld [vmem:[%s13734_s0 + $0x10] sm:$0xff]  ;;  %vm365_vm1 = vcmask 130048   ;;  %s10959_s9 = smov 112   ;;  %v252_v7 = vlaneseq }
   0xb   :  { %v30_v15 = vld [vmem:[%s13734_s0 + $0x18] sm:$0xff]  ;;  %v31_v16 = vld [vmem:[%s13734_s0 + $0x20] sm:$0xff]  ;;  %v32_v17 = vld [vmem:[%s13734_s0 + $0x28] sm:$0xff]  ;;  %v13742_v41 = vmov 0.0   ;;  %s10961_s18 = smov 96  }
   0xc   :  { %v33_v18 = vld [vmem:[%s13734_s0 + $0x30] sm:$0xff]  ;;  %v34_v19 = vld [vmem:[%s13734_s0 + $0x38] sm:$0xff]  ;;  %v35_v20 = vld [vmem:[%s13734_s0 + $0x40] sm:$0xff]  ;;  %9430 = vmatprep.mubr.f32.mxu1 %v13742_v41  ;;  %367 = vst.msk [vmem:[#allocation2 + $0x8] sm:$0xff] %vm365_vm1, %v13742_v41  ;;  %v11211_v8 = vshrl.u32 %v252_v7, 7 }
   0xd   :  { %10303 = vmatpush3.bf16.msra.mxu0 %v10300_v9  ;;  %v36_v21 = vld [vmem:[%s13734_s0 + $0x48] sm:$0xff]  ;;  %v37_v22 = vld [vmem:[%s13734_s0 + $0x50] sm:$0xff]  ;;  %v38_v23 = vld [vmem:[%s13734_s0 + $0x58] sm:$0xff]  ;;  %368 = vst.msk [vmem:[#allocation2 + $0x90] sm:$0xff] %vm365_vm1, %v13742_v41 }
   0xe   :  { %10305 = vmatprep.subr.bf16.mxu0 %v10304_v12  ;;  %v39_v24 = vld [vmem:[%s13734_s0 + $0x60] sm:$0xff]  ;;  %v40_v25 = vld [vmem:[%s13734_s0 + $0x68] sm:$0xff]  ;;  %v41_v26 = vld [vmem:[%s13734_s0 + $0x70] sm:$0xff]  ;;  %13883 = vst [vmem:[#allocation22_spill] sm:$0xff] %v11211_v8  ;;  %v262_v9 = vadd.s32 72, %v11211_v8  ;;  %v263_v10 = vadd.s32 80, %v11211_v8 }
   0xf   :  { %v42_v27 = vld [vmem:[%s13734_s0 + $0x78] sm:$0xff]  ;;  %v498_v34 = vld [vmem:[%s13737_s3] sm:$0xff]  ;;  %v499_v35 = vld [vmem:[%s13737_s3 + $0x8] sm:$0xff]  ;;  %v257_v7 = vadd.s32 32, %v11211_v8 }
  0x10   :  { %v11102_v36 = vpack.c.bf16 %v499_v35, %v498_v34  ;;  %v8208_v37 = vld [vmem:[%s13736_s2] ss:$0 sm:$0xff]  ;;  %v8256_v43 = vld [vmem:[%s13737_s3 + $0x28] sm:$0xff]  ;;  %v8225_v50 = vld [vmem:[%s13737_s3 + $0x10] sm:$0xff] }
  0x11   :  { %10307 = vmatpush3.bf16.msra.mxu0 %v10304_v12  ;;  %v8255_v42 = vld [vmem:[%s13737_s3 + $0x20] sm:$0xff]  ;;  %v8226_v51 = vld [vmem:[%s13737_s3 + $0x18] sm:$0xff]  ;;  %v278_v12 = vand.u32 63, %v262_v9 }
  0x12   :  { %10456 = vmatprep.subr.bf16.mxu1 %v11102_v36  ;;  %v11124_v45 = vpack.c.bf16 %v8256_v43, %v8255_v42  ;;  %v10308_v54 = vpack.c.bf16 %v8226_v51, %v8225_v50 }
  0x13   :  { %10457 = vmatpush3.bf16.msra.mxu1 %v11102_v36 }
  0x14   :  { %9363 = vmatmul.mubr.msk.f32.vlgmr.msra.gmra.mrb[0].mxu0 %vm13753_vm0, %v28_v13  ;;  %10317 = vmatprep.subr.bf16.mxu1 %v11124_v45  ;;  %v279_v13 = vand.u32 63, %v263_v10 }
  0x15   :  { %9365 = vmatprep.mubr.msk.f32.mxu0 %vm13753_vm0, %v29_v14  ;;  %10309 = vmatprep.subr.bf16.mxu0 %v10308_v54  ;;  %v264_v14 = vadd.s32 88, %v11211_v8 }
  0x16   :  { %10311 = vmatpush3.bf16.msra.mxu0 %v10308_v54 }
  0x17   :  { %10313 = vmatprep.subr.bf16.mxu0 %v11102_v36 }
  0x18   :  { %9366 = vmatmul.mubr.msk.f32.gmra.mrb[2].mxu0 %vm13753_vm0, %v30_v15  ;;  %v265_v15 = vadd.s32 96, %v11211_v8 }
  0x19   :  { %9368 = vmatprep.mubr.msk.f32.mxu0 %vm13753_vm0, %v31_v16 }
  0x1c   :  { %9369 = vmatmul.mubr.msk.f32.gmra.mrb[4].mxu0 %vm13753_vm0, %v32_v17 }
  0x1d   :  { %9371 = vmatprep.mubr.msk.f32.mxu0 %vm13753_vm0, %v33_v18  ;;  %v11229_v18 = vand.u32 7, %v278_v12 }
  0x1f   :  { %vm342_vm2 = vcmp.ge.s32.totalorder %v11229_v18, 1 }
  0x20   :  { %9372 = vmatmul.mubr.msk.f32.gmra.mrb[6].mxu0 %vm13753_vm0, %v34_v19  ;;  %v11231_v19 = vand.u32 7, %v279_v13 }
  0x21   :  { %9374 = vmatprep.mubr.msk.f32.mxu0 %vm13753_vm0, %v35_v20  ;;  %v280_v20 = vand.u32 63, %v264_v14 }
  0x22   :  { %vm343_vm3 = vcmp.ge.s32.totalorder %v11231_v19, 1 }
  0x24   :  { %9375 = vmatmul.mubr.msk.f32.gmra.mrb[8].mxu0 %vm13753_vm0, %v36_v21  ;;  %v281_v21 = vand.u32 63, %v265_v15  ;;  %v256_v15 = vadd.s32 24, %v11211_v8 }
  0x25   :  { %9377 = vmatprep.mubr.msk.f32.mxu0 %vm13753_vm0, %v37_v22  ;;  %v266_v22 = vadd.s32 104, %v11211_v8 }
  0x28   :  { %9378 = vmatmul.mubr.msk.f32.gmra.mrb[10].mxu0 %vm13753_vm0, %v38_v23  ;;  %v267_v23 = vadd.s32 112, %v11211_v8 }
  0x29   :  { %9380 = vmatprep.mubr.msk.f32.mxu0 %vm13753_vm0, %v39_v24 }
  0x2c   :  { %9381 = vmatmul.mubr.msk.f32.gmra.mrb[12].mxu0 %vm13753_vm0, %v40_v25 }
  0x2d   :  { %9383 = vmatprep.mubr.msk.f32.mxu0 %vm13753_vm0, %v41_v26  ;;  %v11245_v26 = vand.u32 7, %v280_v20 }
  0x2f   :  { %vm344_vm4 = vcmp.ge.s32.totalorder %v11245_v26, 1 }
  0x30   :  { %9384 = vmatmul.mubr.msk.f32.gmra.mrb[14].mxu0 %vm13753_vm0, %v42_v27  ;;  %v8271_v27 = vld [vmem:[%s13737_s3 + $0x30] sm:$0xff]  ;;  %vm13760_vm0 = vcmp.le.s32.totalorder %v11229_v18, 6 }
  0x31   :  { %9390 = vmatprep.mubr.f32.mxu0 %v13742_v41 }
  0xe7   :  { %v9364_v28 = vpop.f32.mrb[0].mxu0 }
  0xe8   :  { %v173_v29 = vpop.f32.mrb[1].mxu0  ;;  %v11167_v0 = vadd.f32 %v9364_v28, %v8208_v37  ;;  %v8272_v28 = vld [vmem:[%s13737_s3 + $0x38] sm:$0xff] }
  0xe9   :  { %v11159_v62 = vadd.f32 %v8208_v37, %v173_v29  ;;  %v11253_v29 = vand.u32 7, %v281_v21 }
  0xea   :  { %13876 = vst [vmem:[#allocation15_spill] sm:$0xff] %v11167_v0 }
  0xeb   :  { %v9367_v30 = vpop.f32.mrb[2].mxu0  ;;  %13874 = vst [vmem:[#allocation13_spill] sm:$0xff] %v11159_v62  ;;  %vm345_vm5 = vcmp.ge.s32.totalorder %v11253_v29, 1 }
  0xec   :  { %v183_v31 = vpop.f32.mrb[3].mxu0  ;;  %v11175_v2 = vadd.f32 %v9367_v30, %v8208_v37  ;;  %v282_v30 = vand.u32 63, %v266_v22 }
  0xed   :  { %v11169_v1 = vadd.f32 %v8208_v37, %v183_v31  ;;  %v283_v31 = vand.u32 63, %v267_v23  ;;  %v273_v23 = vand.u32 63, %v257_v7 }
  0xee   :  { %13878 = vst [vmem:[#allocation17_spill] sm:$0xff] %v11175_v2  ;;  %v11279_v43 = vand.u32 7, %v282_v30 }
  0xef   :  { %v9370_v32 = vpop.f32.mrb[4].mxu0  ;;  %13877 = vst [vmem:[#allocation16_spill] sm:$0xff] %v11169_v1 }
  0xf0   :  { %v193_v33 = vpop.f32.mrb[5].mxu0  ;;  %v11183_v4 = vadd.f32 %v9370_v32, %v8208_v37  ;;  %v268_v32 = vadd.s32 120, %v11211_v8  ;;  %vm346_vm6 = vcmp.ge.s32.totalorder %v11279_v43, 1 }
  0xf1   :  { %v11177_v3 = vadd.f32 %v8208_v37, %v193_v33 }
  0xf2   :  { %13880 = vst [vmem:[#allocation19_spill] sm:$0xff] %v11183_v4 }
  0xf3   :  { %v9373_v38 = vpop.f32.mrb[6].mxu0  ;;  %13879 = vst [vmem:[#allocation18_spill] sm:$0xff] %v11177_v3 }
  0xf4   :  { %v11108_v39 = vadd.f32 %v9373_v38, %v8208_v37  ;;  %v203_v40 = vpop.f32.mrb[7].mxu0  ;;  %v11264_v38 = vpack.c.bf16 %v8272_v28, %v8271_v27 }
  0xf5   :  { %v11185_v5 = vadd.f32 %v8208_v37, %v203_v40 }
  0xf6   :  { %13867 = vst [vmem:[#allocation6_spill] sm:$0xff] %v11108_v39  ;;  %400 = vrot.lane.b32.xlu0 %v11108_v39, %s10959_s9 }
  0xf7   :  { %v9376_v44 = vpop.f32.mrb[8].mxu0  ;;  %13881 = vst [vmem:[#allocation20_spill] sm:$0xff] %v11185_v5 }
  0xf8   :  { %v11127_v46 = vadd.f32 %v9376_v44, %v8208_v37  ;;  %v213_v47 = vpop.f32.mrb[9].mxu0  ;;  %v11281_v44 = vand.u32 7, %v283_v31 }
  0xf9   :  { %v11129_v48 = vadd.f32 %v8208_v37, %v213_v47  ;;  %v284_v47 = vand.u32 63, %v268_v32 }
  0xfa   :  { %13868 = vst [vmem:[#allocation7_spill] sm:$0xff] %v11127_v46  ;;  %404 = vrot.lane.b32.xlu1 %v11127_v46, %s10959_s9  ;;  %vm347_vm7 = vcmp.ge.s32.totalorder %v11281_v44, 1 }
  0xfb   :  { %13869 = vst [vmem:[#allocation8_spill] sm:$0xff] %v11129_v48  ;;  %v9379_v49 = vpop.f32.mrb[10].mxu0  ;;  %402 = vrot.lane.b32.xlu0 %v11129_v48, %s10959_s9 }
  0xfc   :  { %v11142_v52 = vadd.f32 %v9379_v49, %v8208_v37  ;;  %v223_v53 = vpop.f32.mrb[11].mxu0  ;;  %v255_v49 = vadd.s32 16, %v11211_v8 }
  0xfd   :  { %v11144_v55 = vadd.f32 %v8208_v37, %v223_v53 }
  0xfe   :  { %13870 = vst [vmem:[#allocation9_spill] sm:$0xff] %v11142_v52 }
  0xff   :  { %13871 = vst [vmem:[#allocation10_spill] sm:$0xff] %v11144_v55  ;;  %v9382_v56 = vpop.f32.mrb[12].mxu0  ;;  %406 = vrot.lane.b32.xlu1 %v11144_v55, %s10959_s9  ;;  %408 = vrot.lane.b32.xlu0 %v11142_v52, %s10959_s9 }
 0x100   :  { %v11150_v57 = vadd.f32 %v9382_v56, %v8208_v37  ;;  %v233_v58 = vpop.f32.mrb[13].mxu0  ;;  %v254_v56 = vadd.s32 8, %v11211_v8 }
 0x101   :  { %v11152_v59 = vadd.f32 %v8208_v37, %v233_v58 }
 0x102   :  { %13872 = vst [vmem:[#allocation11_spill] sm:$0xff] %v11150_v57  ;;  %v270_v14 = vand.u32 63, %v254_v56  ;;  %v8289_v56 = vld [vmem:[%s13737_s3 + $0x40] sm:$0xff] }
 0x103   :  { %13873 = vst [vmem:[#allocation12_spill] sm:$0xff] %v11152_v59  ;;  %v9385_v60 = vpop.f32.mrb[14].mxu0  ;;  %410 = vrot.lane.b32.xlu1 %v11152_v59, %s10959_s9  ;;  %412 = vrot.lane.b32.xlu0 %v11150_v57, %s10959_s9 }
 0x104   :  { %v243_v61 = vpop.f32.mrb[15].mxu0  ;;  %v11191_v6 = vadd.f32 %v9385_v60, %v8208_v37  ;;  %v11309_v60 = vand.u32 7, %v284_v47  ;;  %v11343_v32 = vand.u32 7, %v270_v14 }
 0x105   :  { %v11161_v63 = vadd.f32 %v8208_v37, %v243_v61  ;;  %v271_v61 = vand.u32 63, %v255_v49  ;;  %v259_v49 = vadd.s32 48, %v11211_v8 }
 0x106   :  { %13882 = vst [vmem:[#allocation21_spill] sm:$0xff] %v11191_v6  ;;  %13887 = vst [vmem:[#allocation26_spill] sm:$0xff] %v11309_v60  ;;  %vm13795_vm8 = vcmp.ge.s32.totalorder %v11309_v60, 1  ;;  %vm13798_vm9 = vcmp.le.s32.totalorder %v11343_v32, 6 }
 0x107   :  { %13875 = vst [vmem:[#allocation14_spill] sm:$0xff] %v11161_v63  ;;  %414 = vrot.lane.b32.xlu1 %v11161_v63, %s10959_s9  ;;  %386 = vrot.lane.b32.xlu0 %v11159_v62, %s10959_s9  ;;  %v11335_v22 = vand.u32 7, %v271_v61 }
 0x109   :  { %vm13799_vm10 = vcmp.le.s32.totalorder %v11335_v22, 6 }
 0x10b   :  { %388 = vrot.lane.b32.xlu1 %v11167_v0, %s10959_s9  ;;  %390 = vrot.lane.b32.xlu0 %v11169_v1, %s10959_s9 }
 0x10f   :  { %392 = vrot.lane.b32.xlu1 %v11175_v2, %s10959_s9  ;;  %394 = vrot.lane.b32.xlu0 %v11177_v3, %s10959_s9 }
 0x113   :  { %396 = vrot.lane.b32.xlu1 %v11183_v4, %s10959_s9  ;;  %398 = vrot.lane.b32.xlu0 %v11185_v5, %s10959_s9 }
 0x117   :  { %416 = vrot.lane.b32.xlu1 %v11191_v6, %s10959_s9  ;;  %4840 = vrot.lane.b32.xlu0 %v11159_v62, %s10961_s18 }
 0x11b   :  { %4842 = vrot.lane.b32.xlu1 %v11167_v0, %s10961_s18  ;;  %4844 = vrot.lane.b32.xlu0 %v11169_v1, %s10961_s18 }
 0x11f   :  { %4846 = vrot.lane.b32.xlu1 %v11175_v2, %s10961_s18  ;;  %4848 = vrot.lane.b32.xlu0 %v11177_v3, %s10961_s18 }
 0x123   :  { %4850 = vrot.lane.b32.xlu1 %v11183_v4, %s10961_s18  ;;  %4852 = vrot.lane.b32.xlu0 %v11185_v5, %s10961_s18 }
 0x127   :  { %4856 = vrot.lane.b32.xlu1 %v11129_v48, %s10961_s18  ;;  %4858 = vrot.lane.b32.xlu0 %v11127_v46, %s10961_s18  ;;  %v13896_v46 = vmov 0.0  }
 0x12b   :  { %4860 = vrot.lane.b32.xlu1 %v11144_v55, %s10961_s18  ;;  %4862 = vrot.lane.b32.xlu0 %v11142_v52, %s10961_s18 }
 0x12f   :  { %4864 = vrot.lane.b32.xlu1 %v11152_v59, %s10961_s18  ;;  %4866 = vrot.lane.b32.xlu0 %v11150_v57, %s10961_s18 }
 0x133   :  { %4868 = vrot.lane.b32.xlu1 %v11161_v63, %s10961_s18  ;;  %4854 = vrot.lane.b32.xlu0 %v11108_v39, %s10961_s18 }
 0x137   :  { %4870 = vrot.lane.b32.xlu1 %v11191_v6, %s10961_s18 }
 0x168   :  { %v11215_v11 = vpop.permute.xlu0 %400 }
 0x169   :  { %441 = vst.msk [vmem:[#allocation2 + $0x48] sm:$0xff] %vm365_vm1, %v11215_v11 }
 0x16c   :  { %v11221_v16 = vpop.permute.xlu1 %404 }
 0x16d   :  { %443 = vst.msk [vmem:[#allocation2 + $0x58] sm:$0xff] %vm365_vm1, %v11221_v16  ;;  %v11225_v17 = vpop.permute.xlu0 %402 }
 0x16e   :  { %442 = vst.msk [vmem:[#allocation2 + $0x50] sm:$0xff] %vm365_vm1, %v11225_v17 }
 0x171   :  { %v11235_v24 = vpop.permute.xlu1 %406  ;;  %v11237_v25 = vpop.permute.xlu0 %408 }
 0x172   :  { %444 = vst.msk [vmem:[#allocation2 + $0x60] sm:$0xff] %vm365_vm1, %v11235_v24  ;;  %445 = vst.msk [vmem:[#allocation2 + $0x68] sm:$0xff] %vm365_vm1, %v11237_v25 }
 0x175   :  { %v11256_v33 = vpop.permute.xlu1 %410  ;;  %v11258_v34 = vpop.permute.xlu0 %412  ;;  %v11260_v35 = vld [vmem:[#allocation2 + $0x4f] sm:$0xff]  ;;  %v11262_v37 = vld [vmem:[#allocation2 + $0x57] sm:$0xff] }
 0x176   :  { %13884 = vst [vmem:[#allocation23_spill] sm:$0xff] %v11256_v33  ;;  %13885 = vst [vmem:[#allocation24_spill] sm:$0xff] %v11258_v34  ;;  %v491_v40 = vsel %vm342_vm2, %v11260_v35, 0.0  ;;  %v492_v42 = vsel %vm343_vm3, %v11262_v37, 0.0  ;;  %v509_v48 = vld [vmem:[#allocation2 + $0x50] sm:$0xff] }
 0x177   :  { %446 = vst.msk [vmem:[#allocation2 + $0x70] sm:$0xff] %vm365_vm1, %v11256_v33  ;;  %447 = vst.msk [vmem:[#allocation2 + $0x78] sm:$0xff] %vm365_vm1, %v11258_v34  ;;  %9431 = vmatmul.mubr.msk.f32.vlgmr.msra.gmra.mrb[0].mxu1 %vm365_vm1, %v491_v40  ;;  %v272_v40 = vand.u32 63, %v256_v15  ;;  %v11469_v5 = vld [vmem:[#allocation2 + $0x51] sm:$0xff] }
 0x178   :  { %10319 = vmatpush3.bf16.msra.mxu1 %v11124_v45  ;;  %9433 = vmatprep.mubr.msk.f32.mxu1 %vm365_vm1, %v492_v42  ;;  %v258_v42 = vadd.s32 40, %v11211_v8 }
 0x179   :  { %v11286_v50 = vpop.permute.xlu1 %414  ;;  %v11288_v51 = vpop.permute.xlu0 %386  ;;  %v11290_v53 = vld [vmem:[#allocation2 + $0x5f] sm:$0xff]  ;;  %v11292_v54 = vld [vmem:[#allocation2 + $0x67] sm:$0xff]  ;;  %10321 = vmatprep.subr.bf16.mxu1 %v11264_v38 }
 0x17a   :  { %13886 = vst [vmem:[#allocation25_spill] sm:$0xff] %v11286_v50  ;;  %448 = vst.msk [vmem:[#allocation2 + $0x80] sm:$0xff] %vm365_vm1, %v11286_v50  ;;  %v493_v45 = vsel %vm344_vm4, %v11290_v53, 0.0  ;;  %v494_v58 = vsel %vm345_vm5, %v11292_v54, 0.0  ;;  %v11477_v4 = vld [vmem:[#allocation2 + $0x60] sm:$0xff] }
 0x17b   :  { %434 = vst.msk [vmem:[#allocation2 + $0x10] sm:$0xff] %vm365_vm1, %v11288_v51  ;;  %9434 = vmatmul.mubr.msk.f32.gmra.mrb[2].mxu1 %vm365_vm1, %v493_v45  ;;  %v8290_v45 = vld [vmem:[%s13737_s3 + $0x48] sm:$0xff]  ;;  %13898 = vst [vmem:[#allocation36_spill] sm:$0xff] %v11477_v4 }
 0x17c   :  { %9436 = vmatprep.mubr.msk.f32.mxu1 %vm365_vm1, %v494_v58  ;;  %v11366_v58 = vand.u32 7, %v273_v23  ;;  %v11491_v2 = vld [vmem:[#allocation2 + $0x61] sm:$0xff] }
 0x17d   :  { %v11313_v9 = vpop.permute.xlu1 %388  ;;  %v11315_v10 = vpop.permute.xlu0 %390 }
 0x17e   :  { %v11317_v12 = vld [vmem:[#allocation2 + $0x6f] sm:$0xff]  ;;  %v11319_v13 = vld [vmem:[#allocation2 + $0x77] sm:$0xff]  ;;  %435 = vst.msk [vmem:[#allocation2 + $0x18] sm:$0xff] %vm365_vm1, %v11313_v9  ;;  %436 = vst.msk [vmem:[#allocation2 + $0x20] sm:$0xff] %vm365_vm1, %v11315_v10  ;;  %vm13776_vm12 = vcmp.le.s32.totalorder %v11366_v58, 6 }
 0x17f   :  { %v495_v20 = vsel %vm346_vm6, %v11317_v12, 0.0  ;;  %v496_v21 = vsel %vm347_vm7, %v11319_v13, 0.0  ;;  %v11497_v1 = vld [vmem:[#allocation2 + $0x69] sm:$0xff] }
 0x180   :  { %9437 = vmatmul.mubr.msk.f32.gmra.mrb[4].mxu1 %vm365_vm1, %v495_v20  ;;  %v11500_v0 = vld [vmem:[#allocation2 + $0x70] sm:$0xff] }
 0x181   :  { %9439 = vmatprep.mubr.msk.f32.mxu1 %vm365_vm1, %v496_v21  ;;  %v11337_v27 = vpop.permute.xlu1 %392  ;;  %v11339_v28 = vpop.permute.xlu0 %394  ;;  %v11341_v31 = vld [vmem:[#allocation2 + $0x7f] sm:$0xff]  ;;  %v11378_v21 = vand.u32 7, %v272_v40  ;;  %13900 = vst [vmem:[#allocation38_spill] sm:$0xff] %v11500_v0 }
 0x182   :  { %v501_v30 = vld [vmem:[#allocation2 + $0x10] sm:$0xff]  ;;  %437 = vst.msk [vmem:[#allocation2 + $0x28] sm:$0xff] %vm365_vm1, %v11337_v27  ;;  %438 = vst.msk [vmem:[#allocation2 + $0x30] sm:$0xff] %vm365_vm1, %v11339_v28  ;;  %v497_v47 = vsel %vm13795_vm8, %v11341_v31, 0.0 }
 0x183   :  { %9391 = vmatmul.mubr.msk.f32.vlgmr.msra.gmra.mrb[16].mxu0 %vm365_vm1, %v501_v30  ;;  %v274_v30 = vand.u32 63, %v258_v42  ;;  %v275_v42 = vand.u32 63, %v259_v49  ;;  %vm13800_vm11 = vcmp.le.s32.totalorder %v11378_v21, 6 }
 0x184   :  { %9440 = vmatmul.mubr.msk.f32.gmra.mrb[6].mxu1 %vm365_vm1, %v497_v47  ;;  %10315 = vmatpush3.bf16.msra.mxu0 %v11102_v36  ;;  %v260_v36 = vadd.s32 56, %v11211_v8  ;;  %v11381_v47 = vpack.c.bf16 %v8290_v45, %v8289_v56 }
 0x185   :  { %9446 = vmatprep.mubr.f32.mxu1 %v13742_v41  ;;  %v11368_v61 = vpop.permute.xlu1 %396  ;;  %v11370_v7 = vpop.permute.xlu0 %398  ;;  %v11372_v14 = vld [vmem:[#allocation2 + $0x18] sm:$0xff]  ;;  %v11374_v15 = vld [vmem:[#allocation2 + $0x20] sm:$0xff]  ;;  %v11424_v57 = vand.u32 7, %v275_v42 }
 0x186   :  { %13888 = vst [vmem:[#allocation27_spill] sm:$0xff] %v11372_v14  ;;  %13889 = vst [vmem:[#allocation28_spill] sm:$0xff] %v11374_v15  ;;  %v11376_v20 = vld [vmem:[#allocation2 + $0x11] sm:$0xff]  ;;  %9393 = vmatprep.mubr.msk.f32.mxu0 %vm365_vm1, %v11372_v14  ;;  %v11392_v40 = vld [vmem:[#allocation2 + $0x19] sm:$0xff]  ;;  %v276_v63 = vand.u32 63, %v260_v36 }
 0x187   :  { %439 = vst.msk [vmem:[#allocation2 + $0x38] sm:$0xff] %vm365_vm1, %v11368_v61  ;;  %440 = vst.msk [vmem:[#allocation2 + $0x40] sm:$0xff] %vm365_vm1, %v11370_v7  ;;  %v954_v23 = vsel %vm13798_vm9, %v11376_v20, 0.0  ;;  %9394 = vmatmul.mubr.msk.f32.gmra.mrb[18].mxu0 %vm365_vm1, %v11374_v15  ;;  %v955_v56 = vsel %vm13799_vm10, %v11392_v40, 0.0  ;;  %vm13755_vm14 = vcmp.le.s32.totalorder %v11424_v57, 6  ;;  %v11564_v14 = vld [vmem:[#allocation2 + $0x1f] sm:$0xff] }
 0x188   :  { %9447 = vmatmul.mubr.msk.f32.vlgmr.msra.gmra.mrb[8].mxu1 %vm365_vm1, %v954_v23  ;;  %v11412_v23 = vand.u32 7, %v274_v30  ;;  %v11440_v42 = vand.u32 7, %v276_v63 }
 0x189   :  { %10323 = vmatpush3.bf16.msra.mxu1 %v11264_v38  ;;  %9449 = vmatprep.mubr.msk.f32.mxu1 %vm365_vm1, %v955_v56  ;;  %v11404_v45 = vpop.permute.xlu1 %416  ;;  %v11406_v49 = vld [vmem:[#allocation2 + $0x28] sm:$0xff]  ;;  %v11408_v41 = vld [vmem:[#allocation2 + $0x30] sm:$0xff] }
 0x18a   :  { %13890 = vst [vmem:[#allocation29_spill] sm:$0xff] %v11404_v45  ;;  %13891 = vst [vmem:[#allocation30_spill] sm:$0xff] %v11406_v49  ;;  %v11410_v6 = vld [vmem:[#allocation2 + $0x21] sm:$0xff]  ;;  %10325 = vmatprep.subr.bf16.mxu1 %v11381_v47  ;;  %9396 = vmatprep.mubr.msk.f32.mxu0 %vm365_vm1, %v11406_v49  ;;  %v11422_v56 = vld [vmem:[#allocation2 + $0x29] sm:$0xff]  ;;  %vm13773_vm13 = vcmp.le.s32.totalorder %v11412_v23, 6  ;;  %vm13758_vm15 = vcmp.le.s32.totalorder %v11440_v42, 6 }
 0x18b   :  { %13892 = vst [vmem:[#allocation31_spill] sm:$0xff] %v11408_v41  ;;  %449 = vst.msk [vmem:[#allocation2 + $0x88] sm:$0xff] %vm365_vm1, %v11404_v45  ;;  %v956_v38 = vsel %vm13800_vm11, %v11410_v6, 0.0  ;;  %9397 = vmatmul.mubr.msk.f32.gmra.mrb[20].mxu0 %vm365_vm1, %v11408_v41  ;;  %v957_v30 = vsel %vm13776_vm12, %v11422_v56, 0.0  ;;  %v8307_v41 = vld [vmem:[%s13737_s3 + $0x50] sm:$0xff] }
 0x18c   :  { %9450 = vmatmul.mubr.msk.f32.gmra.mrb[10].mxu1 %vm365_vm1, %v956_v38  ;;  %13895 = vst [vmem:[#allocation34_spill] sm:$0xff] %v11440_v42 }
 0x18d   :  { %9452 = vmatprep.mubr.msk.f32.mxu1 %vm365_vm1, %v957_v30 }
 0x18e   :  { %v11434_v36 = vld [vmem:[#allocation2 + $0x38] sm:$0xff]  ;;  %v11436_v59 = vld [vmem:[#allocation2 + $0x40] sm:$0xff] }
 0x18f   :  { %13893 = vst [vmem:[#allocation32_spill] sm:$0xff] %v11434_v36  ;;  %13894 = vst [vmem:[#allocation33_spill] sm:$0xff] %v11436_v59  ;;  %v11438_v52 = vld [vmem:[#allocation2 + $0x31] sm:$0xff]  ;;  %9399 = vmatprep.mubr.msk.f32.mxu0 %vm365_vm1, %v11434_v36  ;;  %v11448_v55 = vld [vmem:[#allocation2 + $0x39] sm:$0xff] }
 0x190   :  { %v958_v38 = vsel %vm13773_vm13, %v11438_v52, 0.0  ;;  %9400 = vmatmul.mubr.msk.f32.gmra.mrb[22].mxu0 %vm365_vm1, %v11436_v59  ;;  %v959_v63 = vsel %vm13755_vm14, %v11448_v55, 0.0  ;;  %v11456_v30 = vld [vmem:[#allocation2 + $0x41] sm:$0xff]  ;;  %vm13765_vm14 = vcmp.le.s32.totalorder %v11231_v19, 6  ;;  %vm13781_vm13 = vcmp.le.s32.totalorder %v11309_v60, 6 }
 0x191   :  { %9453 = vmatmul.mubr.msk.f32.gmra.mrb[12].mxu1 %vm365_vm1, %v958_v38  ;;  %9402 = vmatprep.mubr.f32.mxu0 %v13896_v46  ;;  %v960_v39 = vsel %vm13758_vm15, %v11456_v30, 0.0  ;;  %v11466_v38 = vld [vmem:[#allocation2 + $0x58] sm:$0xff]  ;;  %vm13767_vm15 = vcmp.le.s32.totalorder %v11245_v26, 6 }
 0x192   :  { %9455 = vmatprep.mubr.msk.f32.mxu1 %vm365_vm1, %v959_v63  ;;  %13897 = vst [vmem:[#allocation35_spill] sm:$0xff] %v11466_v38  ;;  %v11475_v63 = vld [vmem:[#allocation2 + $0x59] sm:$0xff]  ;;  %v964_v62 = vsel %vm13767_vm15, %v11491_v2, 0.0  ;;  %vm13783_vm15 = vcmp.le.s32.totalorder %v11281_v44, 6 }
 0x193   :  { %v963_v3 = vsel %vm13765_vm14, %v11475_v63, 0.0  ;;  %vm13774_vm14 = vcmp.le.s32.totalorder %v11279_v43, 6 }
 0x194   :  { %9403 = vmatmul.mubr.msk.f32.gmra.mrb[24].mxu0 %vm365_vm1, %v509_v48  ;;  %v11485_v48 = vld [vmem:[#allocation2 + $0x68] sm:$0xff] }
 0x195   :  { %9456 = vmatmul.mubr.msk.f32.gmra.mrb[14].mxu1 %vm365_vm1, %v960_v39  ;;  %9405 = vmatprep.mubr.msk.f32.mxu0 %vm365_vm1, %v11466_v38  ;;  %v962_v39 = vsel %vm13760_vm0, %v11469_v5, 0.0  ;;  %13899 = vst [vmem:[#allocation37_spill] sm:$0xff] %v11485_v48  ;;  %vm13771_vm0 = vcmp.le.s32.totalorder %v11253_v29, 6  ;;  %v11524_v38 = vld [vmem:[#allocation2 + $0x80] sm:$0xff] }
 0x196   :  { %9458 = vmatprep.mubr.f32.mxu1 %v13896_v46  ;;  %13903 = vst [vmem:[#allocation41_spill] sm:$0xff] %v11524_v38 }
 0x198   :  { %9406 = vmatmul.mubr.msk.f32.gmra.mrb[26].mxu0 %vm365_vm1, %v11477_v4  ;;  %v11514_v4 = vld [vmem:[#allocation2 + $0x71] sm:$0xff] }
 0x199   :  { %9459 = vmatmul.mubr.msk.f32.gmra.mrb[0].mxu1 %vm365_vm1, %v962_v39  ;;  %9408 = vmatprep.mubr.msk.f32.mxu0 %vm365_vm1, %v11485_v48  ;;  %v269_v39 = vand.u32 63, %v11211_v8  ;;  %v11508_v48 = vld [vmem:[#allocation2 + $0x78] sm:$0xff]  ;;  %v966_v59 = vsel %vm13774_vm14, %v11514_v4, 0.0  ;;  %vm13790_vm14 = vcmp.ge.s32.totalorder %v11335_v22, 1 }
 0x19a   :  { %9461 = vmatprep.mubr.msk.f32.mxu1 %vm365_vm1, %v963_v3  ;;  %13901 = vst [vmem:[#allocation39_spill] sm:$0xff] %v11508_v48  ;;  %v965_v3 = vsel %vm13771_vm0, %v11497_v1, 0.0  ;;  %vm13789_vm0 = vcmp.ge.s32.totalorder %v11343_v32, 1 }
 0x19c   :  { %9409 = vmatmul.mubr.msk.f32.gmra.mrb[28].mxu0 %vm365_vm1, %v11500_v0  ;;  %v11520_v0 = vld [vmem:[#allocation2 + $0x79] sm:$0xff] }
 0x19d   :  { %9462 = vmatmul.mubr.msk.f32.gmra.mrb[2].mxu1 %vm365_vm1, %v964_v62  ;;  %9411 = vmatprep.mubr.msk.f32.mxu0 %vm365_vm1, %v11508_v48  ;;  %13902 = vst [vmem:[#allocation40_spill] sm:$0xff] %v11520_v0  ;;  %v11522_v62 = vand.u32 7, %v269_v39  ;;  %v451_v48 = vld [vmem:[#allocation2 + $0xf] sm:$0xff]  ;;  %v11537_v39 = vld [vmem:[#allocation2 + $0x81] sm:$0xff] }
 0x19e   :  { %9464 = vmatprep.mubr.msk.f32.mxu1 %vm365_vm1, %v965_v3  ;;  %v967_v3 = vsel %vm13783_vm15, %v11520_v0, 0.0  ;;  %13904 = vst [vmem:[#allocation42_spill] sm:$0xff] %v11537_v39  ;;  %v968_v36 = vsel %vm13781_vm13, %v11537_v39, 0.0  ;;  %vm336_vm13 = vcmp.ge.s32.totalorder %v11378_v21, 1  ;;  %vm13794_vm15 = vcmp.ge.s32.totalorder %v11366_v58, 1 }
 0x19f   :  { %vm13788_vm12 = vcmp.ge.s32.totalorder %v11522_v62, 1  ;;  %v485_v0 = vsel %vm336_vm13, %v11564_v14, 0.0 }
 0x1a0   :  { %9412 = vmatmul.mubr.msk.f32.gmra.mrb[30].mxu0 %vm365_vm1, %v11524_v38  ;;  %v11542_v38 = vld [vmem:[#allocation2 + $0x17] sm:$0xff]  ;;  %v1197_v15 = vsel %vm13788_vm12, %v451_v48, 0.0  ;;  %vm338_vm12 = vcmp.ge.s32.totalorder %v11412_v23, 1 }
 0x1a1   :  { %9465 = vmatmul.mubr.msk.f32.gmra.mrb[4].mxu1 %vm365_vm1, %v966_v59  ;;  %9418 = vmatprep.mubr.f32.mxu0 %v13896_v46  ;;  %v483_v59 = vsel %vm13789_vm0, %v451_v48, 0.0  ;;  %v484_v49 = vsel %vm13790_vm14, %v11542_v38, 0.0  ;;  %v1198_v48 = vsel %vm13789_vm0, %v11542_v38, 0.0  ;;  %vm339_vm0 = vcmp.ge.s32.totalorder %v11424_v57, 1 }
 0x1a2   :  { %9467 = vmatprep.mubr.msk.f32.mxu1 %vm365_vm1, %v967_v3  ;;  %v8308_v3 = vld [vmem:[%s13737_s3 + $0x58] sm:$0xff] }
 0x1a3   :  { %v10328_v39 = vpack.c.bf16 %v8308_v3, %v8307_v41  ;;  %v1199_v41 = vsel %vm13790_vm14, %v11564_v14, 0.0  ;;  %vm13797_vm14 = vcmp.ge.s32.totalorder %v11440_v42, 1 }
 0x1a4   :  { %9419 = vmatmul.mubr.msk.f32.vlgmr.msra.gmra.mrb[16].mxu0 %vm365_vm1, %v483_v59  ;;  %v11569_v59 = vld [vmem:[#allocation2 + $0x27] sm:$0xff] }
 0x1a5   :  { %9468 = vmatmul.mubr.msk.f32.gmra.mrb[6].mxu1 %vm365_vm1, %v968_v36  ;;  %9421 = vmatprep.mubr.msk.f32.mxu0 %vm365_vm1, %v484_v49  ;;  %v261_v36 = vadd.s32 64, %v11211_v8  ;;  %v11584_v49 = vld [vmem:[#allocation2 + $0x2f] sm:$0xff] }
 0x1a6   :  { %9474 = vmatprep.mubr.msk.f32.mxu1 %vm365_vm1, %v1197_v15  ;;  %v486_v15 = vsel %vm13794_vm15, %v11569_v59, 0.0  ;;  %13905 = vst [vmem:[#allocation43_spill] sm:$0xff] %v11584_v49 }
 0x1a7   :  { %v277_v3 = vand.u32 63, %v261_v36  ;;  %v1201_v36 = vsel %vm13794_vm15, %v11584_v49, 0.0 }
 0x1a8   :  { %9422 = vmatmul.mubr.msk.f32.gmra.mrb[18].mxu0 %vm365_vm1, %v485_v0  ;;  %v11592_v0 = vld [vmem:[#allocation2 + $0x37] sm:$0xff] }
 0x1a9   :  { %9475 = vmatmul.mubr.msk.f32.vlgmr.msra.gmra.mrb[8].mxu1 %vm365_vm1, %v1198_v48  ;;  %9424 = vmatprep.mubr.msk.f32.mxu0 %vm365_vm1, %v486_v15  ;;  %v487_v48 = vsel %vm338_vm12, %v11584_v49, 0.0  ;;  %v488_v15 = vsel %vm339_vm0, %v11592_v0, 0.0  ;;  %v11614_v8 = vand.u32 7, %v277_v3  ;;  %v11627_v49 = vld [vmem:[#allocation2 + $0x47] sm:$0xff] }
 0x1aa   :  { %10327 = vmatpush3.bf16.msra.mxu1 %v11381_v47  ;;  %9477 = vmatprep.mubr.msk.f32.mxu1 %vm365_vm1, %v1199_v41  ;;  %v1200_v47 = vsel %vm336_vm13, %v11569_v59, 0.0  ;;  %v11610_v41 = vld [vmem:[#allocation2 + $0x3f] sm:$0xff]  ;;  %v1204_v3 = vsel %vm13797_vm14, %v11627_v49, 0.0 }
 0x1ab   :  { %10329 = vmatprep.subr.bf16.mxu1 %v10328_v39  ;;  %vm341_vm15 = vcmp.ge.s32.totalorder %v11614_v8, 1 }
 0x1ac   :  { %9425 = vmatmul.mubr.msk.f32.gmra.mrb[20].mxu0 %vm365_vm1, %v487_v48  ;;  %v489_v48 = vsel %vm13797_vm14, %v11610_v41, 0.0  ;;  %vm13906_vm14 = vcmp.le.s32.totalorder %v11366_v58, 6 }
 0x1ad   :  { %9478 = vmatmul.mubr.msk.f32.gmra.mrb[10].mxu1 %vm365_vm1, %v1200_v47  ;;  %9427 = vmatprep.mubr.msk.f32.mxu0 %vm365_vm1, %v488_v15  ;;  %v1202_v47 = vsel %vm338_vm12, %v11592_v0, 0.0  ;;  %v1203_v15 = vsel %vm339_vm0, %v11610_v41, 0.0 }
 0x1ae   :  { %9480 = vmatprep.mubr.msk.f32.mxu1 %vm365_vm1, %v1201_v36  ;;  %v1205_v36 = vsel %vm341_vm15, %v11260_v35, 0.0  ;;  %v1209_v35 = vsel %vm345_vm5, %v11317_v12, 0.0 }
 0x1b0   :  { %9428 = vmatmul.mubr.msk.f32.gmra.mrb[22].mxu0 %vm365_vm1, %v489_v48  ;;  %v1206_v48 = vsel %vm342_vm2, %v11262_v37, 0.0 }
 0x1b1   :  { %9481 = vmatmul.mubr.msk.f32.gmra.mrb[12].mxu1 %vm365_vm1, %v1202_v47  ;;  %9642 = vmatprep.mubr.f32.mxu0 %v13896_v46  ;;  %v1207_v47 = vsel %vm343_vm3, %v11290_v53, 0.0 }
 0x1b2   :  { %9483 = vmatprep.mubr.msk.f32.mxu1 %vm365_vm1, %v1203_v15  ;;  %v1208_v15 = vsel %vm344_vm4, %v11292_v54, 0.0 }
 0x1b5   :  { %9484 = vmatmul.mubr.msk.f32.gmra.mrb[14].mxu1 %vm365_vm1, %v1204_v3  ;;  %v1210_v3 = vsel %vm346_vm6, %v11319_v13, 0.0 }
 0x1b6   :  { %9486 = vmatprep.mubr.msk.f32.mxu1 %vm365_vm1, %v1205_v36  ;;  %v1211_v36 = vsel %vm347_vm7, %v11341_v31, 0.0 }
 0x1b9   :  { %9487 = vmatmul.mubr.msk.f32.gmra.mrb[0].mxu1 %vm365_vm1, %v1206_v48  ;;  %v11663_v48 = vld [vmem:[#allocation2 + $0x87] sm:$0xff] }
 0x1ba   :  { %9489 = vmatprep.mubr.msk.f32.mxu1 %vm365_vm1, %v1207_v47  ;;  %v1212_v47 = vsel %vm13795_vm8, %v11663_v48, 0.0  ;;  %vm349_vm8 = vcmp.le.s32.totalorder %v11522_v62, 6 }
 0x1bd   :  { %9490 = vmatmul.mubr.msk.f32.gmra.mrb[2].mxu1 %vm365_vm1, %v1208_v15  ;;  %v8325_v15 = vld [vmem:[%s13737_s3 + $0x60] sm:$0xff] }
 0x1be   :  { %9492 = vmatprep.mubr.msk.f32.mxu1 %vm365_vm1, %v1209_v35  ;;  %v8326_v35 = vld [vmem:[%s13737_s3 + $0x68] sm:$0xff] }
 0x1c1   :  { %9493 = vmatmul.mubr.msk.f32.gmra.mrb[4].mxu1 %vm365_vm1, %v1210_v3  ;;  %v10332_v3 = vpack.c.bf16 %v8326_v35, %v8325_v15  ;;  %v1638_v35 = vsel %vm13798_vm9, %v11392_v40, 0.0  ;;  %vm13907_vm9 = vcmp.le.s32.totalorder %v11412_v23, 6 }
 0x1c2   :  { %9495 = vmatprep.mubr.msk.f32.mxu1 %vm365_vm1, %v1211_v36  ;;  %v8342_v36 = vld [vmem:[%s13737_s3 + $0x78] sm:$0xff] }
 0x1c5   :  { %9496 = vmatmul.mubr.msk.f32.gmra.mrb[6].mxu1 %vm365_vm1, %v1212_v47  ;;  %v1637_v47 = vsel %vm349_vm8, %v11376_v20, 0.0  ;;  %v1640_v20 = vsel %vm13800_vm11, %v11422_v56, 0.0  ;;  %vm13801_vm11 = vcmp.le.s32.totalorder %v11614_v8, 6 }
 0x1c6   :  { %9502 = vmatprep.mubr.msk.f32.mxu1 %vm365_vm1, %v11288_v51 }
 0x1c9   :  { %9503 = vmatmul.mubr.msk.f32.vlgmr.msra.gmra.mrb[8].mxu1 %vm365_vm1, %v11313_v9 }
 0x1ca   :  { %10331 = vmatpush3.bf16.msra.mxu1 %v10328_v39  ;;  %9505 = vmatprep.mubr.msk.f32.mxu1 %vm365_vm1, %v11315_v10  ;;  %v8341_v39 = vld [vmem:[%s13737_s3 + $0x70] sm:$0xff] }
 0x1cb   :  { %10333 = vmatprep.subr.bf16.mxu1 %v10332_v3  ;;  %v10336_v15 = vpack.c.bf16 %v8342_v36, %v8341_v39  ;;  %v1641_v39 = vsel %vm13906_vm14, %v11438_v52, 0.0  ;;  %v1642_v36 = vsel %vm13907_vm9, %v11448_v55, 0.0  ;;  %vm13909_vm14 = vcmp.le.s32.totalorder %v11440_v42, 6 }
 0x1cc   :  { %vm13910_vm9 = vcmp.le.s32.totalorder %v11229_v18, 6 }
 0x1cd   :  { %9506 = vmatmul.mubr.msk.f32.gmra.mrb[10].mxu1 %vm365_vm1, %v11337_v27 }
 0x1ce   :  { %9508 = vmatprep.mubr.msk.f32.mxu1 %vm365_vm1, %v11339_v28 }
 0x1d1   :  { %9509 = vmatmul.mubr.msk.f32.gmra.mrb[12].mxu1 %vm365_vm1, %v11368_v61 }
 0x1d2   :  { %9511 = vmatprep.mubr.msk.f32.mxu1 %vm365_vm1, %v11370_v7 }
 0x1d5   :  { %9512 = vmatmul.mubr.msk.f32.gmra.mrb[14].mxu1 %vm365_vm1, %v11215_v11 }
 0x1d6   :  { %9514 = vmatprep.mubr.msk.f32.mxu1 %vm365_vm1, %v11225_v17 }
 0x1d9   :  { %9515 = vmatmul.mubr.msk.f32.gmra.mrb[0].mxu1 %vm365_vm1, %v11221_v16 }
 0x1da   :  { %9517 = vmatprep.mubr.msk.f32.mxu1 %vm365_vm1, %v11235_v24 }
 0x1dd   :  { %9518 = vmatmul.mubr.msk.f32.gmra.mrb[2].mxu1 %vm365_vm1, %v11237_v25 }
 0x1de   :  { %9520 = vmatprep.mubr.msk.f32.mxu1 %vm365_vm1, %v11256_v33 }
 0x1e1   :  { %9521 = vmatmul.mubr.msk.f32.gmra.mrb[4].mxu1 %vm365_vm1, %v11258_v34  ;;  %v13922_v34 = vld [vmem:[#allocation43_spill] sm:$0xff] }
 0x1e2   :  { %9523 = vmatprep.mubr.msk.f32.mxu1 %vm365_vm1, %v11286_v50  ;;  %v1639_v50 = vsel %vm13799_vm10, %v11410_v6, 0.0  ;;  %vm13908_vm10 = vcmp.le.s32.totalorder %v11424_v57, 6 }
 0x1e5   :  { %9524 = vmatmul.mubr.msk.f32.gmra.mrb[6].mxu1 %vm365_vm1, %v11404_v45 }
 0x1e6   :  { %9530 = vmatprep.mubr.msk.f32.mxu1 %vm365_vm1, %v1637_v47 }
 0x1e9   :  { %9531 = vmatmul.mubr.msk.f32.vlgmr.msra.gmra.mrb[8].mxu1 %vm365_vm1, %v1638_v35  ;;  %v1645_v35 = vsel %vm13801_vm11, %v11469_v5, 0.0  ;;  %vm13913_vm11 = vcmp.le.s32.totalorder %v11253_v29, 6 }
 0x1ea   :  { %10335 = vmatpush3.bf16.msra.mxu1 %v10332_v3  ;;  %9533 = vmatprep.mubr.msk.f32.mxu1 %vm365_vm1, %v1639_v50  ;;  %v1643_v50 = vsel %vm13908_vm10, %v11456_v30, 0.0  ;;  %v11742_v3 = vld [vmem:[#allocation2 + $0x49] sm:$0xff]  ;;  %vm13911_vm10 = vcmp.le.s32.totalorder %v11231_v19, 6  ;;  %v1649_v5 = vsel %vm13913_vm11, %v11514_v4, 0.0  ;;  %vm13919_vm11 = vcmp.ge.s32.totalorder %v11522_v62, 1 }
 0x1eb   :  { %10337 = vmatprep.subr.bf16.mxu1 %v10336_v15  ;;  %v1644_v47 = vsel %vm13909_vm14, %v11742_v3, 0.0  ;;  %vm13912_vm14 = vcmp.le.s32.totalorder %v11245_v26, 6  ;;  %v1897_v42 = vsel %vm13919_vm11, %v11542_v38, 0.0  ;;  %vm13936_vm11 = vcmp.le.s32.totalorder %v11343_v32, 6 }
 0x1ed   :  { %9534 = vmatmul.mubr.msk.f32.gmra.mrb[10].mxu1 %vm365_vm1, %v1640_v20  ;;  %v1646_v20 = vsel %vm13910_vm9, %v11475_v63, 0.0  ;;  %vm13915_vm9 = vcmp.le.s32.totalorder %v11279_v43, 6 }
 0x1ee   :  { %9536 = vmatprep.mubr.msk.f32.mxu1 %vm365_vm1, %v1641_v39  ;;  %v1647_v39 = vsel %vm13911_vm10, %v11491_v2, 0.0  ;;  %vm13917_vm10 = vcmp.le.s32.totalorder %v11281_v44, 6 }
 0x1f1   :  { %9537 = vmatmul.mubr.msk.f32.gmra.mrb[12].mxu1 %vm365_vm1, %v1642_v36  ;;  %v1648_v36 = vsel %vm13912_vm14, %v11497_v1, 0.0  ;;  %vm13918_vm14 = vcmp.le.s32.totalorder %v11309_v60, 6  ;;  %v8377_v60 = vld [vmem:[%s13737_s3 + $0xa8] sm:$0xff] }
 0x1f2   :  { %9539 = vmatprep.mubr.msk.f32.mxu1 %vm365_vm1, %v1643_v50  ;;  %v13914_v50 = vld [vmem:[#allocation40_spill] sm:$0xff] }
 0x1f5   :  { %9540 = vmatmul.mubr.msk.f32.gmra.mrb[14].mxu1 %vm365_vm1, %v1644_v47  ;;  %v1650_v47 = vsel %vm13915_vm9, %v13914_v50, 0.0  ;;  %vm13920_vm9 = vcmp.ge.s32.totalorder %v11343_v32, 1 }
 0x1f6   :  { %9542 = vmatprep.mubr.msk.f32.mxu1 %vm365_vm1, %v1645_v35  ;;  %v13916_v35 = vld [vmem:[#allocation42_spill] sm:$0xff] }
 0x1f9   :  { %9543 = vmatmul.mubr.msk.f32.gmra.mrb[0].mxu1 %vm365_vm1, %v1646_v20  ;;  %v1651_v20 = vsel %vm13917_vm10, %v13916_v35, 0.0  ;;  %vm13921_vm10 = vcmp.ge.s32.totalorder %v11335_v22, 1 }
 0x1fa   :  { %9545 = vmatprep.mubr.msk.f32.mxu1 %vm365_vm1, %v1647_v39  ;;  %v11777_v39 = vld [vmem:[#allocation2 + $0x89] sm:$0xff]  ;;  %v1899_v38 = vsel %vm13921_vm10, %v11569_v59, 0.0  ;;  %v1906_v59 = vsel %vm342_vm2, %v11290_v53, 0.0  ;;  %v1910_v53 = vsel %vm346_vm6, %v11341_v31, 0.0  ;;  %vm13938_vm10 = vcmp.le.s32.totalorder %v11378_v21, 6 }
 0x1fb   :  { %v13927_v31 = vld [vmem:[#allocation31_spill] sm:$0xff] }
 0x1fd   :  { %9546 = vmatmul.mubr.msk.f32.gmra.mrb[2].mxu1 %vm365_vm1, %v1648_v36  ;;  %v1652_v36 = vsel %vm13918_vm14, %v11777_v39, 0.0  ;;  %vm13923_vm14 = vcmp.ge.s32.totalorder %v11366_v58, 1 }
 0x1fe   :  { %9548 = vmatprep.mubr.msk.f32.mxu1 %vm365_vm1, %v1649_v5  ;;  %v8357_v5 = vld [vmem:[%s13737_s3 + $0x80] sm:$0xff] }
 0x201   :  { %9549 = vmatmul.mubr.msk.f32.gmra.mrb[4].mxu1 %vm365_vm1, %v1650_v47  ;;  %v8358_v47 = vld [vmem:[%s13737_s3 + $0x88] sm:$0xff] }
 0x202   :  { %9551 = vmatprep.mubr.msk.f32.mxu1 %vm365_vm1, %v1651_v20  ;;  %v8376_v20 = vld [vmem:[%s13737_s3 + $0xa0] sm:$0xff]  ;;  %v10340_v33 = vpack.c.bf16 %v8358_v47, %v8357_v5  ;;  %v2131_v5 = vld [vmem:[#allocation2 + $0x48] sm:$0xff] }
 0x203   :  { %v10344_v45 = vpack.c.bf16 %v8377_v60, %v8376_v20  ;;  %v1900_v60 = vsel %vm336_vm13, %v13922_v34, 0.0  ;;  %v1905_v34 = vsel %vm341_vm15, %v11262_v37, 0.0  ;;  %v1909_v37 = vsel %vm345_vm5, %v11319_v13, 0.0  ;;  %v13925_v13 = vld [vmem:[#allocation28_spill] sm:$0xff]  ;;  %v13930_v47 = vld [vmem:[#allocation35_spill] sm:$0xff]  ;;  %v13932_v20 = vld [vmem:[#allocation37_spill] sm:$0xff] }
 0x205   :  { %9552 = vmatmul.mubr.msk.f32.gmra.mrb[6].mxu1 %vm365_vm1, %v1652_v36  ;;  %v1898_v36 = vsel %vm13920_vm9, %v11564_v14, 0.0  ;;  %10345 = vmatprep.subr.bf16.mxu0 %v10344_v45  ;;  %v1901_v14 = vsel %vm13923_vm14, %v11592_v0, 0.0  ;;  %v1908_v0 = vsel %vm344_vm4, %v11317_v12, 0.0  ;;  %v13924_v12 = vld [vmem:[#allocation27_spill] sm:$0xff]  ;;  %vm13937_vm9 = vcmp.le.s32.totalorder %v11335_v22, 6 }
 0x206   :  { %9558 = vmatprep.mubr.msk.f32.mxu1 %vm365_vm1, %v1897_v42  ;;  %10347 = vmatpush3.bf16.msra.mxu0 %v10344_v45  ;;  %v1902_v45 = vsel %vm338_vm12, %v11610_v41, 0.0  ;;  %v1903_v42 = vsel %vm339_vm0, %v11627_v49, 0.0  ;;  %v1907_v49 = vsel %vm343_vm3, %v11292_v54, 0.0  ;;  %v1911_v54 = vsel %vm347_vm7, %v11663_v48, 0.0  ;;  %v13926_v41 = vld [vmem:[#allocation30_spill] sm:$0xff]  ;;  %v13929_v48 = vld [vmem:[#allocation33_spill] sm:$0xff] }
 0x207   :  { %vm13939_vm14 = vcmp.le.s32.totalorder %v11366_v58, 6 }
 0x209   :  { %9559 = vmatmul.mubr.msk.f32.vlgmr.msra.gmra.mrb[8].mxu1 %vm365_vm1, %v1898_v36  ;;  %v13933_v36 = vld [vmem:[#allocation38_spill] sm:$0xff] }
 0x20a   :  { %10339 = vmatpush3.bf16.msra.mxu1 %v10336_v15  ;;  %9561 = vmatprep.mubr.msk.f32.mxu1 %vm365_vm1, %v1899_v38  ;;  %v13928_v15 = vld [vmem:[#allocation32_spill] sm:$0xff]  ;;  %v13934_v38 = vld [vmem:[#allocation39_spill] sm:$0xff] }
 0x20b   :  { %10341 = vmatprep.subr.bf16.mxu1 %v10340_v33 }
 0x20d   :  { %9562 = vmatmul.mubr.msk.f32.gmra.mrb[10].mxu1 %vm365_vm1, %v1900_v60  ;;  %v13935_v60 = vld [vmem:[#allocation41_spill] sm:$0xff] }
 0x20e   :  { %9564 = vmatprep.mubr.msk.f32.mxu1 %vm365_vm1, %v1901_v14  ;;  %v2139_v14 = vld [vmem:[#allocation2 + $0x88] sm:$0xff] }
 0x211   :  { %9565 = vmatmul.mubr.msk.f32.gmra.mrb[12].mxu1 %vm365_vm1, %v1902_v45  ;;  %v2401_v45 = vsel %vm349_vm8, %v11392_v40, 0.0  ;;  %v2405_v40 = vsel %vm13939_vm14, %v11448_v55, 0.0  ;;  %vm13943_vm14 = vcmp.le.s32.totalorder %v11229_v18, 6 }
 0x212   :  { %9567 = vmatprep.mubr.msk.f32.mxu1 %vm365_vm1, %v1903_v42  ;;  %v2402_v42 = vsel %vm13936_vm11, %v11410_v6, 0.0  ;;  %vm13940_vm11 = vcmp.le.s32.totalorder %v11412_v23, 6  ;;  %v2410_v55 = vsel %vm13943_vm14, %v11491_v2, 0.0  ;;  %vm13947_vm14 = vcmp.le.s32.totalorder %v11279_v43, 6 }
 0x213   :  { %v2406_v6 = vsel %vm13940_vm11, %v11456_v30, 0.0  ;;  %vm13944_vm11 = vcmp.le.s32.totalorder %v11231_v19, 6  ;;  %v2414_v2 = vsel %vm13947_vm14, %v13916_v35, 0.0  ;;  %vm13983_vm14 = vcmp.ge.s32.totalorder %v11366_v58, 1 }
 0x214   :  { %v2411_v30 = vsel %vm13944_vm11, %v11497_v1, 0.0  ;;  %vm13948_vm11 = vcmp.le.s32.totalorder %v11281_v44, 6 }
 0x215   :  { %9568 = vmatmul.mubr.f32.gmra.mrb[14].mxu1 %v13896_v46  ;;  %v2415_v1 = vsel %vm13948_vm11, %v11777_v39, 0.0 }
 0x216   :  { %9570 = vmatprep.mubr.msk.f32.mxu1 %vm365_vm1, %v1905_v34  ;;  %v2403_v34 = vsel %vm13937_vm9, %v11422_v56, 0.0  ;;  %vm13941_vm9 = vcmp.le.s32.totalorder %v11424_v57, 6 }
 0x217   :  { %v2407_v56 = vsel %vm13941_vm9, %v11742_v3, 0.0  ;;  %vm13945_vm9 = vcmp.le.s32.totalorder %v11245_v26, 6 }
 0x218   :  { %v2412_v3 = vsel %vm13945_vm9, %v11514_v4, 0.0  ;;  %vm13981_vm9 = vcmp.ge.s32.totalorder %v11343_v32, 1 }
 0x219   :  { %9571 = vmatmul.mubr.msk.f32.gmra.mrb[0].mxu1 %vm365_vm1, %v1906_v59  ;;  %v2404_v59 = vsel %vm13938_vm10, %v11438_v52, 0.0  ;;  %vm13942_vm10 = vcmp.le.s32.totalorder %v11614_v8, 6 }
 0x21a   :  { %9573 = vmatprep.mubr.msk.f32.mxu1 %vm365_vm1, %v1907_v49  ;;  %v2409_v52 = vsel %vm13942_vm10, %v11475_v63, 0.0  ;;  %vm13946_vm10 = vcmp.le.s32.totalorder %v11253_v29, 6 }
 0x21b   :  { %v2413_v63 = vsel %vm13946_vm10, %v13914_v50, 0.0  ;;  %vm13982_vm10 = vcmp.ge.s32.totalorder %v11335_v22, 1 }
 0x21d   :  { %9574 = vmatmul.mubr.msk.f32.gmra.mrb[2].mxu1 %vm365_vm1, %v1908_v0 }
 0x21e   :  { %9576 = vmatprep.mubr.msk.f32.mxu1 %vm365_vm1, %v1909_v37 }
 0x221   :  { %9577 = vmatmul.mubr.msk.f32.gmra.mrb[4].mxu1 %vm365_vm1, %v1910_v53 }
 0x222   :  { %9579 = vmatprep.mubr.msk.f32.mxu1 %vm365_vm1, %v1911_v54 }
 0x225   :  { %9580 = vmatmul.mubr.f32.gmra.mrb[6].mxu1 %v13896_v46 }
 0x226   :  { %9586 = vmatprep.mubr.msk.f32.mxu1 %vm365_vm1, %v13924_v12 }
 0x229   :  { %9587 = vmatmul.mubr.msk.f32.vlgmr.msra.gmra.mrb[8].mxu1 %vm365_vm1, %v13925_v13 }
 0x22a   :  { %10343 = vmatpush3.bf16.msra.mxu1 %v10340_v33  ;;  %9589 = vmatprep.mubr.msk.f32.mxu1 %vm365_vm1, %v13926_v41  ;;  %v13931_v33 = vld [vmem:[#allocation36_spill] sm:$0xff] }
 0x22d   :  { %9590 = vmatmul.mubr.msk.f32.gmra.mrb[10].mxu1 %vm365_vm1, %v13927_v31 }
 0x22e   :  { %9592 = vmatprep.mubr.msk.f32.mxu1 %vm365_vm1, %v13928_v15 }
 0x231   :  { %9593 = vmatmul.mubr.msk.f32.gmra.mrb[12].mxu1 %vm365_vm1, %v13929_v48 }
 0x232   :  { %9595 = vmatprep.mubr.msk.f32.mxu1 %vm365_vm1, %v2131_v5 }
 0x235   :  { %9596 = vmatmul.mubr.f32.gmra.mrb[14].mxu1 %v13896_v46 }
 0x236   :  { %9598 = vmatprep.mubr.msk.f32.mxu1 %vm365_vm1, %v13930_v47  ;;  %v8374_v47 = vld [vmem:[%s13737_s3 + $0x90] sm:$0xff] }
 0x239   :  { %9599 = vmatmul.mubr.msk.f32.gmra.mrb[0].mxu1 %vm365_vm1, %v13931_v33  ;;  %v8375_v33 = vld [vmem:[%s13737_s3 + $0x98] sm:$0xff] }
 0x23a   :  { %9601 = vmatprep.mubr.msk.f32.mxu1 %vm365_vm1, %v13932_v20  ;;  %v10348_v20 = vpack.c.bf16 %v8375_v33, %v8374_v47 }
 0x23c   :  { %10349 = vmatprep.subr.bf16.mxu0 %v10348_v20 }
 0x23d   :  { %9602 = vmatmul.mubr.msk.f32.gmra.mrb[2].mxu1 %vm365_vm1, %v13933_v36 }
 0x23e   :  { %9604 = vmatprep.mubr.msk.f32.mxu1 %vm365_vm1, %v13934_v38  ;;  %v11966_v38 = vld [vmem:[%s13738_s4] ss:$0 sm:$0xff] }
 0x241   :  { %9605 = vmatmul.mubr.msk.f32.gmra.mrb[4].mxu1 %vm365_vm1, %v13935_v60 }
 0x242   :  { %9607 = vmatprep.mubr.msk.f32.mxu1 %vm365_vm1, %v2139_v14 }
 0x245   :  { %9608 = vmatmul.mubr.f32.gmra.mrb[6].mxu1 %v13896_v46 }
 0x246   :  { %9614 = vmatprep.mubr.msk.f32.mxu1 %vm365_vm1, %v2401_v45 }
 0x249   :  { %9615 = vmatmul.mubr.msk.f32.vlgmr.msra.gmra.mrb[8].mxu1 %vm365_vm1, %v2402_v42 }
 0x24a   :  { %9617 = vmatprep.mubr.msk.f32.mxu1 %vm365_vm1, %v2403_v34 }
 0x24d   :  { %9618 = vmatmul.mubr.msk.f32.gmra.mrb[10].mxu1 %vm365_vm1, %v2404_v59 }
 0x24e   :  { %9620 = vmatprep.mubr.msk.f32.mxu1 %vm365_vm1, %v2405_v40 }
 0x251   :  { %9621 = vmatmul.mubr.msk.f32.gmra.mrb[12].mxu1 %vm365_vm1, %v2406_v6 }
 0x252   :  { %9623 = vmatprep.mubr.msk.f32.mxu1 %vm365_vm1, %v2407_v56 }
 0x255   :  { %9624 = vmatmul.mubr.f32.gmra.mrb[14].mxu1 %v13896_v46 }
 0x256   :  { %9626 = vmatprep.mubr.msk.f32.mxu1 %vm365_vm1, %v2409_v52 }
 0x259   :  { %9627 = vmatmul.mubr.msk.f32.gmra.mrb[0].mxu1 %vm365_vm1, %v2410_v55 }
 0x25a   :  { %9629 = vmatprep.mubr.msk.f32.mxu1 %vm365_vm1, %v2411_v30 }
 0x25d   :  { %9630 = vmatmul.mubr.msk.f32.gmra.mrb[2].mxu1 %vm365_vm1, %v2412_v3 }
 0x25e   :  { %9632 = vmatprep.mubr.msk.f32.mxu1 %vm365_vm1, %v2413_v63 }
 0x261   :  { %9633 = vmatmul.mubr.msk.f32.gmra.mrb[4].mxu1 %vm365_vm1, %v2414_v2 }
 0x262   :  { %9635 = vmatprep.mubr.msk.f32.mxu1 %vm365_vm1, %v2415_v1 }
 0x265   :  { %9636 = vmatmul.mubr.f32.gmra.mrb[6].mxu1 %v13896_v46 }
 0x266   :  { %9894 = vmatprep.mubr.f32.mxu1 %v13896_v46 }
 0x267   :  { %v11941_v4 = vpop.f32.mrb[24].mxu0 }
 0x268   :  { %v11943_v50 = vpop.f32.mrb[25].mxu0 }
 0x26b   :  { %v11945_v49 = vpop.f32.mrb[26].mxu0 }
 0x26c   :  { %v11947_v0 = vpop.f32.mrb[27].mxu0 }
 0x26f   :  { %v11949_v35 = vpop.f32.mrb[28].mxu0 }
 0x270   :  { %v11951_v37 = vpop.f32.mrb[29].mxu0 }
 0x273   :  { %v11953_v53 = vpop.f32.mrb[30].mxu0 }
 0x274   :  { %v11955_v39 = vpop.f32.mrb[31].mxu0 }
 0x277   :  { %v9420_v54 = vpop.f32.mrb[16].mxu0 }
 0x278   :  { %v842_v12 = vpop.f32.mrb[17].mxu0 }
 0x27b   :  { %v9423_v13 = vpop.f32.mrb[18].mxu0 }
 0x27c   :  { %v852_v41 = vpop.f32.mrb[19].mxu0 }
 0x27f   :  { %v9426_v31 = vpop.f32.mrb[20].mxu0 }
 0x280   :  { %v862_v15 = vpop.f32.mrb[21].mxu0 }
 0x283   :  { %v9429_v48 = vpop.f32.mrb[22].mxu0 }
 0x284   :  { %v872_v5 = vpop.f32.mrb[23].mxu0 }
 0x31c   :  { %v9616_v36 = vpop.f32.mrb[8].mxu1 }
 0x31d   :  { %v10458_v60 = vadd.f32 %v9616_v36, %v9420_v54  ;;  %v2534_v14 = vpop.f32.mrb[9].mxu1 }
 0x31e   :  { %v10459_v45 = vadd.f32 %v2534_v14, %v842_v12 }
 0x31f   :  { %v11969_v42 = vadd.f32 %v10458_v60, %v11966_v38 }
 0x320   :  { %v11972_v34 = vadd.f32 %v10459_v45, %v11966_v38  ;;  %v9619_v59 = vpop.f32.mrb[10].mxu1 }
 0x321   :  { %13949 = vst [vmem:[#allocation40_spill] sm:$0xff] %v11969_v42  ;;  %v11976_v40 = vadd.f32 %v11969_v42, %v11313_v9  ;;  %v10460_v6 = vadd.f32 %v9619_v59, %v9423_v13  ;;  %v2544_v56 = vpop.f32.mrb[11].mxu1  ;;  %v8406_v13 = vld [vmem:[%s13737_s3 + $0xb0] sm:$0xff]  ;;  %v13986_v42 = vld [vmem:[#allocation26_spill] sm:$0xff] }
 0x322   :  { %13950 = vst [vmem:[#allocation42_spill] sm:$0xff] %v11972_v34  ;;  %v11980_v52 = vadd.f32 %v11972_v34, %v11288_v51  ;;  %v10461_v55 = vadd.f32 %v2544_v56, %v852_v41  ;;  %v8440_v34 = vld [vmem:[%s13737_s3 + $0xd0] sm:$0xff] }
 0x323   :  { %2669 = vst.msk [vmem:[#allocation2 + $0x18] sm:$0xff] %vm365_vm1, %v11976_v40  ;;  %v11985_v30 = vadd.f32 %v10460_v6, %v11966_v38 }
 0x324   :  { %2668 = vst.msk [vmem:[#allocation2 + $0x10] sm:$0xff] %vm365_vm1, %v11980_v52  ;;  %v11990_v3 = vadd.f32 %v10461_v55, %v11966_v38  ;;  %v9622_v9 = vpop.f32.mrb[12].mxu1 }
 0x325   :  { %13951 = vst [vmem:[#allocation43_spill] sm:$0xff] %v11985_v30  ;;  %v11994_v63 = vadd.f32 %v11985_v30, %v11337_v27  ;;  %v10462_v51 = vadd.f32 %v9622_v9, %v9426_v31  ;;  %v2554_v2 = vpop.f32.mrb[13].mxu1  ;;  %v8407_v27 = vld [vmem:[%s13737_s3 + $0xb8] sm:$0xff] }
 0x326   :  { %13952 = vst [vmem:[#allocation27_spill] sm:$0xff] %v11990_v3  ;;  %v11998_v1 = vadd.f32 %v11990_v3, %v11315_v10  ;;  %v10463_v54 = vadd.f32 %v2554_v2, %v862_v15  ;;  %v12024_v60 = vpack.c.bf16 %v8407_v27, %v8406_v13 }
 0x327   :  { %2671 = vst.msk [vmem:[#allocation2 + $0x28] sm:$0xff] %vm365_vm1, %v11994_v63  ;;  %v12003_v12 = vadd.f32 %v10462_v51, %v11966_v38 }
 0x328   :  { %2670 = vst.msk [vmem:[#allocation2 + $0x20] sm:$0xff] %vm365_vm1, %v11998_v1  ;;  %v12014_v10 = vadd.f32 %v10463_v54, %v11966_v38  ;;  %v9625_v41 = vpop.f32.mrb[14].mxu1 }
 0x329   :  { %13953 = vst [vmem:[#allocation28_spill] sm:$0xff] %v12003_v12  ;;  %v12018_v31 = vadd.f32 %v12003_v12, %v11368_v61  ;;  %v10464_v15 = vadd.f32 %v9625_v41, %v9429_v48  ;;  %v2564_v47 = vpop.f32.mrb[15].mxu1 }
 0x32a   :  { %13954 = vst [vmem:[#allocation30_spill] sm:$0xff] %v12014_v10  ;;  %v12022_v33 = vadd.f32 %v12014_v10, %v11339_v28  ;;  %v10465_v36 = vadd.f32 %v2564_v47, %v872_v5  ;;  %v12037_v28 = vld [vmem:[#allocation2 + $0x18] sm:$0xff] }
 0x32b   :  { %2673 = vst.msk [vmem:[#allocation2 + $0x38] sm:$0xff] %vm365_vm1, %v12018_v31  ;;  %v12029_v14 = vadd.f32 %v10464_v15, %v11966_v38  ;;  %v2720_v45 = vld [vmem:[#allocation2 + $0x10] sm:$0xff]  ;;  %13957 = vst [vmem:[#allocation33_spill] sm:$0xff] %v12037_v28 }
 0x32c   :  { %2672 = vst.msk [vmem:[#allocation2 + $0x30] sm:$0xff] %vm365_vm1, %v12022_v33  ;;  %v12034_v61 = vadd.f32 %v10465_v36, %v11966_v38  ;;  %v9628_v48 = vpop.f32.mrb[0].mxu1  ;;  %9643 = vmatmul.mubr.msk.f32.vlgmr.msra.gmra.mrb[32].mxu0 %vm365_vm1, %v2720_v45 }
 0x32d   :  { %13955 = vst [vmem:[#allocation31_spill] sm:$0xff] %v12029_v14  ;;  %v12041_v5 = vadd.f32 %v12029_v14, %v11215_v11  ;;  %v10466_v59 = vadd.f32 %v9628_v48, %v11941_v4  ;;  %10351 = vmatpush3.bf16.msra.mxu0 %v10348_v20  ;;  %v2574_v6 = vpop.f32.mrb[1].mxu1  ;;  %9645 = vmatprep.mubr.msk.f32.mxu0 %vm365_vm1, %v12037_v28 }
 0x32e   :  { %13956 = vst [vmem:[#allocation32_spill] sm:$0xff] %v12034_v61  ;;  %v12048_v56 = vadd.f32 %v12034_v61, %v11370_v7  ;;  %v10467_v55 = vadd.f32 %v2574_v6, %v11943_v50  ;;  %10353 = vmatprep.subr.bf16.mxu0 %v12024_v60  ;;  %v12066_v50 = vld [vmem:[#allocation2 + $0x28] sm:$0xff] }
 0x32f   :  { %2675 = vst.msk [vmem:[#allocation2 + $0x48] sm:$0xff] %vm365_vm1, %v12041_v5  ;;  %v12055_v11 = vadd.f32 %v10466_v59, %v11966_v38  ;;  %v12057_v4 = vld [vmem:[#allocation2 + $0x20] sm:$0xff]  ;;  %13961 = vst [vmem:[#allocation38_spill] sm:$0xff] %v12066_v50 }
 0x330   :  { %13959 = vst [vmem:[#allocation36_spill] sm:$0xff] %v12057_v4  ;;  %2674 = vst.msk [vmem:[#allocation2 + $0x40] sm:$0xff] %vm365_vm1, %v12048_v56  ;;  %v12062_v20 = vadd.f32 %v10467_v55, %v11966_v38  ;;  %v9631_v7 = vpop.f32.mrb[2].mxu1  ;;  %9646 = vmatmul.mubr.msk.f32.gmra.mrb[34].mxu0 %vm365_vm1, %v12057_v4 }
 0x331   :  { %13958 = vst [vmem:[#allocation35_spill] sm:$0xff] %v12055_v11  ;;  %v12070_v9 = vadd.f32 %v12055_v11, %v11221_v16  ;;  %v10468_v51 = vadd.f32 %v9631_v7, %v11945_v49  ;;  %v2584_v2 = vpop.f32.mrb[3].mxu1  ;;  %9648 = vmatprep.mubr.msk.f32.mxu0 %vm365_vm1, %v12066_v50  ;;  %v13970_v7 = vld [vmem:[#allocation23_spill] sm:$0xff]  ;;  %v13984_v11 = vld [vmem:[#allocation34_spill] sm:$0xff] }
 0x332   :  { %13960 = vst [vmem:[#allocation37_spill] sm:$0xff] %v12062_v20  ;;  %v12077_v54 = vadd.f32 %v12062_v20, %v11225_v17  ;;  %v10469_v13 = vadd.f32 %v2584_v2, %v11947_v0  ;;  %v12094_v17 = vld [vmem:[#allocation2 + $0x38] sm:$0xff]  ;;  %vm13985_vm11 = vcmp.ge.s32.totalorder %v13984_v11, 1 }
 0x333   :  { %2677 = vst.msk [vmem:[#allocation2 + $0x58] sm:$0xff] %vm365_vm1, %v12070_v9  ;;  %v12083_v27 = vadd.f32 %v10468_v51, %v11966_v38  ;;  %v12085_v16 = vld [vmem:[#allocation2 + $0x30] sm:$0xff]  ;;  %13965 = vst [vmem:[#allocation45_spill] sm:$0xff] %v12094_v17 }
 0x334   :  { %13963 = vst [vmem:[#allocation41_spill] sm:$0xff] %v12085_v16  ;;  %2676 = vst.msk [vmem:[#allocation2 + $0x50] sm:$0xff] %vm365_vm1, %v12077_v54  ;;  %v12090_v49 = vadd.f32 %v10469_v13, %v11966_v38  ;;  %v9634_v41 = vpop.f32.mrb[4].mxu1  ;;  %9649 = vmatmul.mubr.msk.f32.gmra.mrb[36].mxu0 %vm365_vm1, %v12085_v16 }
 0x335   :  { %13962 = vst [vmem:[#allocation39_spill] sm:$0xff] %v12083_v27  ;;  %v12098_v0 = vadd.f32 %v12083_v27, %v11237_v25  ;;  %v10470_v15 = vadd.f32 %v9634_v41, %v11949_v35  ;;  %v2594_v47 = vpop.f32.mrb[5].mxu1  ;;  %9651 = vmatprep.mubr.msk.f32.mxu0 %vm365_vm1, %v12094_v17  ;;  %v12202_v27 = vld [vmem:[#allocation2 + $0x27] sm:$0xff] }
 0x336   :  { %13964 = vst [vmem:[#allocation44_spill] sm:$0xff] %v12090_v49  ;;  %v12105_v36 = vadd.f32 %v12090_v49, %v11235_v24  ;;  %v10471_v45 = vadd.f32 %v2594_v47, %v11951_v37  ;;  %v13969_v24 = vld [vmem:[#allocation24_spill] sm:$0xff]  ;;  %v13974_v47 = vld [vmem:[#allocation29_spill] sm:$0xff] }
 0x337   :  { %2679 = vst.msk [vmem:[#allocation2 + $0x68] sm:$0xff] %vm365_vm1, %v12098_v0  ;;  %v12111_v48 = vadd.f32 %v10470_v15, %v11966_v38  ;;  %v12113_v25 = vld [vmem:[#allocation2 + $0x40] sm:$0xff] }
 0x338   :  { %13967 = vst [vmem:[#allocation47_spill] sm:$0xff] %v12113_v25  ;;  %2678 = vst.msk [vmem:[#allocation2 + $0x60] sm:$0xff] %vm365_vm1, %v12105_v36  ;;  %v12118_v35 = vadd.f32 %v10471_v45, %v11966_v38  ;;  %v9637_v59 = vpop.f32.mrb[6].mxu1  ;;  %9652 = vmatmul.mubr.msk.f32.gmra.mrb[38].mxu0 %vm365_vm1, %v12113_v25  ;;  %v13975_v45 = vld [vmem:[#allocation25_spill] sm:$0xff] }
 0x339   :  { %13966 = vst [vmem:[#allocation46_spill] sm:$0xff] %v12111_v48  ;;  %v12124_v37 = vadd.f32 %v12111_v48, %v13969_v24  ;;  %v10472_v6 = vadd.f32 %v9637_v59, %v11953_v53  ;;  %v2604_v55 = vpop.f32.mrb[7].mxu1  ;;  %9654 = vmatprep.mubr.f32.mxu0 %v13896_v46  ;;  %v12223_v49 = vld [vmem:[#allocation2 + $0x3f] sm:$0xff] }
 0x33a   :  { %13968 = vst [vmem:[#allocation48_spill] sm:$0xff] %v12118_v35  ;;  %v12130_v51 = vadd.f32 %v12118_v35, %v13970_v7  ;;  %v10473_v2 = vadd.f32 %v2604_v55, %v11955_v39  ;;  %v12144_v15 = vld [vmem:[#allocation2 + $0x58] sm:$0xff] }
 0x33b   :  { %2681 = vst.msk [vmem:[#allocation2 + $0x78] sm:$0xff] %vm365_vm1, %v12124_v37  ;;  %v12136_v13 = vadd.f32 %v10472_v6, %v11966_v38  ;;  %v2728_v41 = vld [vmem:[#allocation2 + $0x50] sm:$0xff]  ;;  %13973 = vst [vmem:[#allocation49_spill] sm:$0xff] %v12144_v15  ;;  %v12198_v35 = vld [vmem:[#allocation2 + $0x1f] sm:$0xff] }
 0x33c   :  { %2680 = vst.msk [vmem:[#allocation2 + $0x70] sm:$0xff] %vm365_vm1, %v12130_v51  ;;  %v12141_v53 = vadd.f32 %v10473_v2, %v11966_v38  ;;  %9655 = vmatmul.mubr.msk.f32.gmra.mrb[40].mxu0 %vm365_vm1, %v2728_v41  ;;  %v8422_v2 = vld [vmem:[%s13737_s3 + $0xc0] sm:$0xff]  ;;  %v8423_v41 = vld [vmem:[%s13737_s3 + $0xc8] sm:$0xff]  ;;  %v12233_v14 = vld [vmem:[#allocation2 + $0x57] sm:$0xff] }
 0x33d   :  { %13971 = vst [vmem:[#allocation24_spill] sm:$0xff] %v12136_v13  ;;  %v12148_v39 = vadd.f32 %v12136_v13, %v13974_v47  ;;  %9657 = vmatprep.mubr.msk.f32.mxu0 %vm365_vm1, %v12144_v15  ;;  %v12186_v47 = vld [vmem:[#allocation2 + $0xf] sm:$0xff]  ;;  %v10356_v13 = vpack.c.bf16 %v8423_v41, %v8422_v2  ;;  %v2703_v2 = vsel %vm336_vm13, %v12198_v35, 0.0  ;;  %v12315_v15 = vld [vmem:[#allocation2 + $0x41] sm:$0xff] }
 0x33e   :  { %13972 = vst [vmem:[#allocation23_spill] sm:$0xff] %v12141_v53  ;;  %v12154_v59 = vadd.f32 %v12141_v53, %v13975_v45  ;;  %v12164_v24 = vld [vmem:[#allocation2 + $0x68] sm:$0xff]  ;;  %v12189_v45 = vld [vmem:[#allocation2 + $0x17] sm:$0xff]  ;;  %v2701_v53 = vsel %vm13981_vm9, %v12186_v47, 0.0  ;;  %vm13987_vm9 = vcmp.ge.s32.totalorder %v13986_v42, 1 }
 0x33f   :  { %2683 = vst.msk [vmem:[#allocation2 + $0x88] sm:$0xff] %vm365_vm1, %v12148_v39  ;;  %v12158_v38 = vld [vmem:[#allocation2 + $0x60] sm:$0xff]  ;;  %13977 = vst [vmem:[#allocation25_spill] sm:$0xff] %v12164_v24  ;;  %v2702_v48 = vsel %vm13982_vm10, %v12189_v45, 0.0  ;;  %v12211_v41 = vld [vmem:[#allocation2 + $0x2f] sm:$0xff]  ;;  %vm13988_vm10 = vcmp.le.s32.totalorder %v11343_v32, 6 }
 0x340   :  { %13976 = vst [vmem:[#allocation29_spill] sm:$0xff] %v12158_v38  ;;  %2682 = vst.msk [vmem:[#allocation2 + $0x80] sm:$0xff] %vm365_vm1, %v12154_v59  ;;  %9658 = vmatmul.mubr.msk.f32.gmra.mrb[42].mxu0 %vm365_vm1, %v12158_v38  ;;  %v12230_v20 = vld [vmem:[#allocation2 + $0x4f] sm:$0xff]  ;;  %v12242_v61 = vld [vmem:[#allocation2 + $0x5f] sm:$0xff] }
 0x341   :  { %9660 = vmatprep.mubr.msk.f32.mxu0 %vm365_vm1, %v12164_v24  ;;  %v2711_v12 = vsel %vm344_vm4, %v12242_v61, 0.0  ;;  %v12291_v38 = vld [vmem:[#allocation2 + $0x21] sm:$0xff]  ;;  %v12322_v25 = vld [vmem:[#allocation2 + $0x51] sm:$0xff]  ;;  %v12325_v17 = vld [vmem:[#allocation2 + $0x59] sm:$0xff] }
 0x342   :  { %v12172_v55 = vld [vmem:[#allocation2 + $0x78] sm:$0xff]  ;;  %v12334_v16 = vld [vmem:[#allocation2 + $0x61] sm:$0xff] }
 0x343   :  { %v12168_v6 = vld [vmem:[#allocation2 + $0x70] sm:$0xff]  ;;  %13979 = vst [vmem:[#allocation51_spill] sm:$0xff] %v12172_v55 }
 0x344   :  { %13978 = vst [vmem:[#allocation50_spill] sm:$0xff] %v12168_v6  ;;  %9661 = vmatmul.mubr.msk.f32.gmra.mrb[44].mxu0 %vm365_vm1, %v12168_v6  ;;  %v12254_v10 = vld [vmem:[#allocation2 + $0x6f] sm:$0xff]  ;;  %v12257_v30 = vld [vmem:[#allocation2 + $0x77] sm:$0xff] }
 0x345   :  { %9663 = vmatprep.mubr.msk.f32.mxu0 %vm365_vm1, %v12172_v55  ;;  %v12282_v55 = vld [vmem:[#allocation2 + $0x19] sm:$0xff]  ;;  %v12346_v4 = vld [vmem:[#allocation2 + $0x71] sm:$0xff] }
 0x346   :  { %14000 = vst [vmem:[#allocation26_spill] sm:$0xff] %v12346_v4 }
 0x347   :  { %v12176_v7 = vld [vmem:[#allocation2 + $0x80] sm:$0xff] }
 0x348   :  { %13980 = vst [vmem:[#allocation52_spill] sm:$0xff] %v12176_v7  ;;  %9664 = vmatmul.mubr.msk.f32.gmra.mrb[46].mxu0 %vm365_vm1, %v12176_v7  ;;  %v12266_v3 = vld [vmem:[#allocation2 + $0x7f] sm:$0xff]  ;;  %v12279_v7 = vld [vmem:[#allocation2 + $0x11] sm:$0xff] }
 0x349   :  { %9670 = vmatprep.mubr.f32.mxu0 %v13896_v46  ;;  %v3157_v6 = vsel %vm13988_vm10, %v12279_v7, 0.0  ;;  %vm13992_vm10 = vcmp.le.s32.totalorder %v11412_v23, 6  ;;  %v12349_v28 = vld [vmem:[#allocation2 + $0x79] sm:$0xff] }
 0x34a   :  { %14001 = vst [vmem:[#allocation53_spill] sm:$0xff] %v12349_v28 }
 0x34c   :  { %9671 = vmatmul.mubr.msk.f32.vlgmr.msra.gmra.mrb[32].mxu0 %vm365_vm1, %v2701_v53  ;;  %v2704_v53 = vsel %vm13983_vm14, %v12202_v27, 0.0  ;;  %vm13989_vm14 = vcmp.le.s32.totalorder %v11335_v22, 6 }
 0x34d   :  { %10355 = vmatpush3.bf16.msra.mxu0 %v12024_v60  ;;  %9673 = vmatprep.mubr.msk.f32.mxu0 %vm365_vm1, %v2702_v48  ;;  %v12214_v60 = vld [vmem:[#allocation2 + $0x37] sm:$0xff]  ;;  %v2705_v48 = vsel %vm338_vm12, %v12211_v41, 0.0  ;;  %v3158_v24 = vsel %vm13989_vm14, %v12282_v55, 0.0  ;;  %vm13993_vm14 = vcmp.le.s32.totalorder %v11424_v57, 6 }
 0x34e   :  { %10357 = vmatprep.subr.bf16.mxu0 %v10356_v13 }
 0x350   :  { %9674 = vmatmul.mubr.msk.f32.gmra.mrb[34].mxu0 %vm365_vm1, %v2703_v2  ;;  %v2706_v2 = vsel %vm339_vm0, %v12214_v60, 0.0 }
 0x351   :  { %9676 = vmatprep.mubr.msk.f32.mxu0 %vm365_vm1, %v2704_v53  ;;  %v2707_v53 = vsel %vm13985_vm11, %v12223_v49, 0.0  ;;  %vm13990_vm11 = vcmp.le.s32.totalorder %v11378_v21, 6 }
 0x354   :  { %9677 = vmatmul.mubr.msk.f32.gmra.mrb[36].mxu0 %vm365_vm1, %v2705_v48  ;;  %v2709_v48 = vsel %vm342_vm2, %v12230_v20, 0.0 }
 0x355   :  { %9679 = vmatprep.mubr.msk.f32.mxu0 %vm365_vm1, %v2706_v2  ;;  %v2710_v2 = vsel %vm343_vm3, %v12233_v14, 0.0 }
 0x358   :  { %9680 = vmatmul.mubr.msk.f32.gmra.mrb[38].mxu0 %vm365_vm1, %v2707_v53  ;;  %v12245_v53 = vld [vmem:[#allocation2 + $0x67] sm:$0xff] }
 0x359   :  { %9682 = vmatprep.mubr.f32.mxu0 %v13896_v46 }
 0x35c   :  { %9683 = vmatmul.mubr.msk.f32.gmra.mrb[40].mxu0 %vm365_vm1, %v2709_v48  ;;  %v2712_v48 = vsel %vm345_vm5, %v12245_v53, 0.0 }
 0x35d   :  { %9685 = vmatprep.mubr.msk.f32.mxu0 %vm365_vm1, %v2710_v2  ;;  %v2713_v2 = vsel %vm346_vm6, %v12254_v10, 0.0 }
 0x360   :  { %9686 = vmatmul.mubr.msk.f32.gmra.mrb[42].mxu0 %vm365_vm1, %v2711_v12  ;;  %v2714_v12 = vsel %vm347_vm7, %v12257_v30, 0.0 }
 0x361   :  { %9688 = vmatprep.mubr.msk.f32.mxu0 %vm365_vm1, %v2712_v48  ;;  %v2715_v48 = vsel %vm13987_vm9, %v12266_v3, 0.0  ;;  %vm13991_vm9 = vcmp.le.s32.totalorder %v11366_v58, 6 }
 0x364   :  { %9689 = vmatmul.mubr.msk.f32.gmra.mrb[44].mxu0 %vm365_vm1, %v2713_v2  ;;  %v8441_v2 = vld [vmem:[%s13737_s3 + $0xd8] sm:$0xff] }
 0x365   :  { %9691 = vmatprep.mubr.msk.f32.mxu0 %vm365_vm1, %v2714_v12  ;;  %v10360_v12 = vpack.c.bf16 %v8441_v2, %v8440_v34  ;;  %v3159_v34 = vsel %vm13990_vm11, %v12291_v38, 0.0  ;;  %v12303_v2 = vld [vmem:[#allocation2 + $0x31] sm:$0xff]  ;;  %vm13994_vm11 = vcmp.le.s32.totalorder %v13984_v11, 6 }
 0x368   :  { %9692 = vmatmul.mubr.msk.f32.gmra.mrb[46].mxu0 %vm365_vm1, %v2715_v48  ;;  %v12294_v48 = vld [vmem:[#allocation2 + $0x29] sm:$0xff] }
 0x369   :  { %9698 = vmatprep.mubr.f32.mxu0 %v13896_v46 }
 0x36c   :  { %9699 = vmatmul.mubr.msk.f32.vlgmr.msra.gmra.mrb[32].mxu0 %vm365_vm1, %v3157_v6  ;;  %v3160_v6 = vsel %vm13991_vm9, %v12294_v48, 0.0  ;;  %vm13995_vm9 = vcmp.le.s32.totalorder %v11229_v18, 6 }
 0x36d   :  { %10359 = vmatpush3.bf16.msra.mxu0 %v10356_v13  ;;  %9701 = vmatprep.mubr.msk.f32.mxu0 %vm365_vm1, %v3158_v24  ;;  %v12306_v13 = vld [vmem:[#allocation2 + $0x39] sm:$0xff]  ;;  %v3161_v24 = vsel %vm13992_vm10, %v12303_v2, 0.0  ;;  %vm13996_vm10 = vcmp.le.s32.totalorder %v11231_v19, 6 }
 0x36e   :  { %10361 = vmatprep.subr.bf16.mxu0 %v10360_v12 }
 0x370   :  { %9702 = vmatmul.mubr.msk.f32.gmra.mrb[34].mxu0 %vm365_vm1, %v3159_v34  ;;  %v3162_v34 = vsel %vm13993_vm14, %v12306_v13, 0.0  ;;  %vm13998_vm14 = vcmp.le.s32.totalorder %v11245_v26, 6 }
 0x371   :  { %9704 = vmatprep.mubr.msk.f32.mxu0 %vm365_vm1, %v3160_v6  ;;  %v3163_v6 = vsel %vm13994_vm11, %v12315_v15, 0.0  ;;  %v3167_v50 = vsel %vm13998_vm14, %v12334_v16, 0.0  ;;  %vm13999_vm11 = vcmp.le.s32.totalorder %v11253_v29, 6  ;;  %vm14005_vm14 = vcmp.le.s32.totalorder %v13986_v42, 6 }
 0x374   :  { %9705 = vmatmul.mubr.msk.f32.gmra.mrb[36].mxu0 %vm365_vm1, %v3161_v24  ;;  %v3165_v24 = vsel %vm13995_vm9, %v12322_v25, 0.0  ;;  %vm14002_vm9 = vcmp.le.s32.totalorder %v11279_v43, 6 }
 0x375   :  { %9707 = vmatprep.mubr.msk.f32.mxu0 %vm365_vm1, %v3162_v34  ;;  %v3166_v34 = vsel %vm13996_vm10, %v12325_v17, 0.0  ;;  %vm14003_vm10 = vcmp.le.s32.totalorder %v11281_v44, 6 }
 0x378   :  { %9708 = vmatmul.mubr.msk.f32.gmra.mrb[38].mxu0 %vm365_vm1, %v3163_v6  ;;  %v12337_v6 = vld [vmem:[#allocation2 + $0x69] sm:$0xff] }
 0x379   :  { %9710 = vmatprep.mubr.f32.mxu0 %v13896_v46  ;;  %13997 = vst [vmem:[#allocation34_spill] sm:$0xff] %v12337_v6  ;;  %v12358_v46 = vld [vmem:[#allocation2 + $0x81] sm:$0xff] }
 0x37a   :  { %14004 = vst [vmem:[#allocation54_spill] sm:$0xff] %v12358_v46 }
 0x37c   :  { %9711 = vmatmul.mubr.msk.f32.gmra.mrb[40].mxu0 %vm365_vm1, %v3165_v24  ;;  %v3168_v24 = vsel %vm13999_vm11, %v12337_v6, 0.0  ;;  %v8458_v6 = vld [vmem:[%s13737_s3 + $0xe0] sm:$0xff]  ;;  %vm14006_vm11 = vcmp.ge.s32.totalorder %v11522_v62, 1 }
 0x37d   :  { %9713 = vmatprep.mubr.msk.f32.mxu0 %vm365_vm1, %v3166_v34  ;;  %v3169_v34 = vsel %vm14002_vm9, %v12346_v4, 0.0  ;;  %vm14007_vm9 = vcmp.ge.s32.totalorder %v11343_v32, 1 }
 0x380   :  { %9714 = vmatmul.mubr.msk.f32.gmra.mrb[42].mxu0 %vm365_vm1, %v3167_v50  ;;  %v3170_v50 = vsel %vm14003_vm10, %v12349_v28, 0.0  ;;  %v3400_v28 = vsel %vm14006_vm11, %v12186_v47, 0.0  ;;  %vm14008_vm10 = vcmp.ge.s32.totalorder %v11335_v22, 1  ;;  %v3403_v47 = vsel %vm336_vm13, %v12202_v27, 0.0 }
 0x381   :  { %9716 = vmatprep.mubr.msk.f32.mxu0 %vm365_vm1, %v3168_v24  ;;  %v3171_v24 = vsel %vm14005_vm14, %v12358_v46, 0.0  ;;  %v3401_v46 = vsel %vm14007_vm9, %v12189_v45, 0.0  ;;  %v3402_v4 = vsel %vm14008_vm10, %v12198_v35, 0.0  ;;  %vm14009_vm14 = vcmp.ge.s32.totalorder %v11366_v58, 1 }
 0x382   :  { %vm14010_vm11 = vcmp.ge.s32.totalorder %v13984_v11, 1  ;;  %vm14011_vm9 = vcmp.ge.s32.totalorder %v13986_v42, 1  ;;  %vm14012_vm10 = vcmp.le.s32.totalorder %v11343_v32, 6 }
 0x384   :  { %9717 = vmatmul.mubr.msk.f32.gmra.mrb[44].mxu0 %vm365_vm1, %v3169_v34  ;;  %v8459_v34 = vld [vmem:[%s13737_s3 + $0xe8] sm:$0xff] }
 0x385   :  { %9719 = vmatprep.mubr.msk.f32.mxu0 %vm365_vm1, %v3170_v50  ;;  %v10364_v50 = vpack.c.bf16 %v8459_v34, %v8458_v6  ;;  %v3409_v34 = vsel %vm342_vm2, %v12233_v14, 0.0 }
 0x388   :  { %9720 = vmatmul.mubr.msk.f32.gmra.mrb[46].mxu0 %vm365_vm1, %v3171_v24  ;;  %v3408_v24 = vsel %vm341_vm15, %v12230_v20, 0.0  ;;  %v3412_v20 = vsel %vm345_vm5, %v12254_v10, 0.0 }
 0x389   :  { %9726 = vmatprep.mubr.msk.f32.mxu0 %vm365_vm1, %v3400_v28  ;;  %v3404_v28 = vsel %vm14009_vm14, %v12211_v41, 0.0  ;;  %vm14013_vm14 = vcmp.le.s32.totalorder %v11335_v22, 6 }
 0x38c   :  { %9727 = vmatmul.mubr.msk.f32.vlgmr.msra.gmra.mrb[32].mxu0 %vm365_vm1, %v3401_v46  ;;  %v3405_v46 = vsel %vm338_vm12, %v12214_v60, 0.0 }
 0x38d   :  { %10363 = vmatpush3.bf16.msra.mxu0 %v10360_v12  ;;  %9729 = vmatprep.mubr.msk.f32.mxu0 %vm365_vm1, %v3402_v4  ;;  %v3406_v4 = vsel %vm339_vm0, %v12223_v49, 0.0  ;;  %v12398_v12 = vld [vmem:[#allocation2 + $0x47] sm:$0xff] }
 0x38e   :  { %10365 = vmatprep.subr.bf16.mxu0 %v10364_v50  ;;  %v3407_v6 = vsel %vm14010_vm11, %v12398_v12, 0.0  ;;  %vm14014_vm11 = vcmp.le.s32.totalorder %v11378_v21, 6 }
 0x390   :  { %9730 = vmatmul.mubr.msk.f32.gmra.mrb[34].mxu0 %vm365_vm1, %v3403_v47  ;;  %v3410_v47 = vsel %vm343_vm3, %v12242_v61, 0.0 }
 0x391   :  { %9732 = vmatprep.mubr.msk.f32.mxu0 %vm365_vm1, %v3404_v28  ;;  %v3411_v28 = vsel %vm344_vm4, %v12245_v53, 0.0 }
 0x394   :  { %9733 = vmatmul.mubr.msk.f32.gmra.mrb[36].mxu0 %vm365_vm1, %v3405_v46  ;;  %v3413_v46 = vsel %vm346_vm6, %v12257_v30, 0.0 }
 0x395   :  { %9735 = vmatprep.mubr.msk.f32.mxu0 %vm365_vm1, %v3406_v4  ;;  %v3414_v4 = vsel %vm347_vm7, %v12266_v3, 0.0 }
 0x398   :  { %9736 = vmatmul.mubr.msk.f32.gmra.mrb[38].mxu0 %vm365_vm1, %v3407_v6  ;;  %v12432_v6 = vld [vmem:[#allocation2 + $0x87] sm:$0xff] }
 0x399   :  { %9738 = vmatprep.mubr.msk.f32.mxu0 %vm365_vm1, %v3408_v24  ;;  %v3415_v24 = vsel %vm14011_vm9, %v12432_v6, 0.0  ;;  %vm14015_vm9 = vcmp.le.s32.totalorder %v11366_v58, 6 }
 0x39c   :  { %9739 = vmatmul.mubr.msk.f32.gmra.mrb[40].mxu0 %vm365_vm1, %v3409_v34  ;;  %v8476_v34 = vld [vmem:[%s13737_s3 + $0xf0] sm:$0xff] }
 0x39d   :  { %9741 = vmatprep.mubr.msk.f32.mxu0 %vm365_vm1, %v3410_v47  ;;  %v8477_v47 = vld [vmem:[%s13737_s3 + $0xf8] sm:$0xff] }
 0x3a0   :  { %9742 = vmatmul.mubr.msk.f32.gmra.mrb[42].mxu0 %vm365_vm1, %v3411_v28  ;;  %v10368_v28 = vpack.c.bf16 %v8477_v47, %v8476_v34  ;;  %v12544_v34 = vld [vmem:[#allocation2 + $0x89] sm:$0xff] }
 0x3a1   :  { %9744 = vmatprep.mubr.msk.f32.mxu0 %vm365_vm1, %v3412_v20  ;;  %v14026_v20 = vld [vmem:[#allocation53_spill] sm:$0xff] }
 0x3a4   :  { %9745 = vmatmul.mubr.msk.f32.gmra.mrb[44].mxu0 %vm365_vm1, %v3413_v46 }
 0x3a5   :  { %9747 = vmatprep.mubr.msk.f32.mxu0 %vm365_vm1, %v3414_v4  ;;  %v14028_v4 = vld [vmem:[#allocation54_spill] sm:$0xff] }
 0x3a8   :  { %9748 = vmatmul.mubr.msk.f32.gmra.mrb[46].mxu0 %vm365_vm1, %v3415_v24 }
 0x3a9   :  { %9754 = vmatprep.mubr.msk.f32.mxu0 %vm365_vm1, %v11980_v52  ;;  %v8493_v52 = vld [vmem:[%s13737_s3 + $0x108] sm:$0xff] }
 0x3ac   :  { %9755 = vmatmul.mubr.msk.f32.vlgmr.msra.gmra.mrb[32].mxu0 %vm365_vm1, %v11976_v40  ;;  %v8492_v40 = vld [vmem:[%s13737_s3 + $0x100] sm:$0xff] }
 0x3ad   :  { %10367 = vmatpush3.bf16.msra.mxu0 %v10364_v50  ;;  %9757 = vmatprep.mubr.msk.f32.mxu0 %vm365_vm1, %v11998_v1  ;;  %v10372_v1 = vpack.c.bf16 %v8493_v52, %v8492_v40  ;;  %v8509_v40 = vld [vmem:[%s13737_s3 + $0x118] sm:$0xff] }
 0x3ae   :  { %10369 = vmatprep.subr.bf16.mxu0 %v10368_v28 }
 0x3b0   :  { %9758 = vmatmul.mubr.msk.f32.gmra.mrb[34].mxu0 %vm365_vm1, %v11994_v63  ;;  %v3856_v63 = vsel %vm349_vm8, %v12279_v7, 0.0 }
 0x3b1   :  { %9760 = vmatprep.mubr.msk.f32.mxu0 %vm365_vm1, %v12022_v33  ;;  %v3858_v33 = vsel %vm14013_vm14, %v12291_v38, 0.0  ;;  %vm14017_vm14 = vcmp.le.s32.totalorder %v11424_v57, 6 }
 0x3b4   :  { %9761 = vmatmul.mubr.msk.f32.gmra.mrb[36].mxu0 %vm365_vm1, %v12018_v31  ;;  %v3857_v31 = vsel %vm14012_vm10, %v12282_v55, 0.0  ;;  %vm14016_vm10 = vcmp.le.s32.totalorder %v11412_v23, 6 }
 0x3b5   :  { %9763 = vmatprep.mubr.msk.f32.mxu0 %vm365_vm1, %v12048_v56  ;;  %v3860_v56 = vsel %vm14015_vm9, %v12303_v2, 0.0  ;;  %vm14019_vm9 = vcmp.le.s32.totalorder %v11614_v8, 6 }
 0x3b8   :  { %9764 = vmatmul.mubr.msk.f32.gmra.mrb[38].mxu0 %vm365_vm1, %v12041_v5  ;;  %v3859_v5 = vsel %vm14014_vm11, %v12294_v48, 0.0  ;;  %vm14018_vm11 = vcmp.le.s32.totalorder %v13984_v11, 6 }
 0x3b9   :  { %9766 = vmatprep.mubr.msk.f32.mxu0 %vm365_vm1, %v12077_v54  ;;  %v3862_v54 = vsel %vm14017_vm14, %v12315_v15, 0.0  ;;  %vm14021_vm14 = vcmp.le.s32.totalorder %v11231_v19, 6 }
 0x3bc   :  { %9767 = vmatmul.mubr.msk.f32.gmra.mrb[40].mxu0 %vm365_vm1, %v12070_v9  ;;  %v3861_v9 = vsel %vm14016_vm10, %v12306_v13, 0.0  ;;  %vm14020_vm10 = vcmp.le.s32.totalorder %v11229_v18, 6 }
 0x3bd   :  { %9769 = vmatprep.mubr.msk.f32.mxu0 %vm365_vm1, %v12105_v36 }
 0x3c0   :  { %9770 = vmatmul.mubr.msk.f32.gmra.mrb[42].mxu0 %vm365_vm1, %v12098_v0  ;;  %v12510_v0 = vld [vmem:[#allocation2 + $0x49] sm:$0xff] }
 0x3c1   :  { %9772 = vmatprep.mubr.msk.f32.mxu0 %vm365_vm1, %v12130_v51  ;;  %v3863_v36 = vsel %vm14018_vm11, %v12510_v0, 0.0  ;;  %v3865_v51 = vsel %vm14020_vm10, %v12325_v17, 0.0  ;;  %vm14023_vm11 = vcmp.le.s32.totalorder %v11245_v26, 6  ;;  %vm14027_vm10 = vcmp.le.s32.totalorder %v11279_v43, 6 }
 0x3c2   :  { %v3869_v46 = vsel %vm14027_vm10, %v14026_v20, 0.0  ;;  %vm14032_vm10 = vcmp.ge.s32.totalorder %v11343_v32, 1 }
 0x3c4   :  { %9773 = vmatmul.mubr.msk.f32.gmra.mrb[44].mxu0 %vm365_vm1, %v12124_v37  ;;  %v3864_v37 = vsel %vm14019_vm9, %v12322_v25, 0.0  ;;  %v14024_v25 = vld [vmem:[#allocation26_spill] sm:$0xff]  ;;  %vm14025_vm9 = vcmp.le.s32.totalorder %v11253_v29, 6 }
 0x3c5   :  { %9775 = vmatprep.mubr.msk.f32.mxu0 %vm365_vm1, %v12154_v59  ;;  %v14022_v59 = vld [vmem:[#allocation34_spill] sm:$0xff]  ;;  %v3868_v50 = vsel %vm14025_vm9, %v14024_v25, 0.0  ;;  %vm14031_vm9 = vcmp.ge.s32.totalorder %v11522_v62, 1 }
 0x3c6   :  { %v3867_v7 = vsel %vm14023_vm11, %v14022_v59, 0.0  ;;  %vm14030_vm11 = vcmp.le.s32.totalorder %v13986_v42, 6  ;;  %v4100_v52 = vsel %vm14031_vm9, %v12189_v45, 0.0  ;;  %v4103_v45 = vsel %vm336_vm13, %v12211_v41, 0.0 }
 0x3c7   :  { %v3871_v47 = vsel %vm14030_vm11, %v12544_v34, 0.0  ;;  %vm14034_vm11 = vcmp.ge.s32.totalorder %v11366_v58, 1  ;;  %v14035_v41 = vmov 0.0   ;;  %vm14048_vm9 = vcmp.le.s32.totalorder %v11343_v32, 6 }
 0x3c8   :  { %9776 = vmatmul.mubr.msk.f32.gmra.mrb[46].mxu0 %vm365_vm1, %v12148_v39  ;;  %v3866_v39 = vsel %vm14021_vm14, %v12334_v16, 0.0  ;;  %vm14029_vm14 = vcmp.le.s32.totalorder %v11281_v44, 6 }
 0x3c9   :  { %9782 = vmatprep.mubr.msk.f32.mxu0 %vm365_vm1, %v3856_v63  ;;  %v3870_v24 = vsel %vm14029_vm14, %v14028_v4, 0.0  ;;  %vm14033_vm14 = vcmp.ge.s32.totalorder %v11335_v22, 1 }
 0x3cc   :  { %9783 = vmatmul.mubr.msk.f32.vlgmr.msra.gmra.mrb[32].mxu0 %vm365_vm1, %v3857_v31  ;;  %v4101_v31 = vsel %vm14032_vm10, %v12198_v35, 0.0  ;;  %v4104_v35 = vsel %vm14034_vm11, %v12214_v60, 0.0  ;;  %v4108_v60 = vsel %vm341_vm15, %v12233_v14, 0.0  ;;  %v4112_v14 = vsel %vm345_vm5, %v12257_v30, 0.0  ;;  %v7077_v30 = vld [vmem:[%s13735_s1 + $0x8] sm:$0xff] }
 0x3cd   :  { %10371 = vmatpush3.bf16.msra.mxu0 %v10368_v28  ;;  %9785 = vmatprep.mubr.msk.f32.mxu0 %vm365_vm1, %v3858_v33  ;;  %v8508_v28 = vld [vmem:[%s13737_s3 + $0x110] sm:$0xff]  ;;  %v4102_v33 = vsel %vm14033_vm14, %v12202_v27, 0.0  ;;  %v4105_v27 = vsel %vm338_vm12, %v12223_v49, 0.0  ;;  %v4109_v49 = vsel %vm342_vm2, %v12242_v61, 0.0  ;;  %v4113_v61 = vsel %vm346_vm6, %v12266_v3, 0.0 }
 0x3ce   :  { %10373 = vmatprep.subr.bf16.mxu0 %v10372_v1  ;;  %v10376_v63 = vpack.c.bf16 %v8509_v40, %v8508_v28  ;;  %v8528_v3 = vld [vmem:[%s13737_s3 + $0x130] sm:$0xff]  ;;  %v14045_v28 = vld [vmem:[#allocation50_spill] sm:$0xff]  ;;  %v14046_v40 = vld [vmem:[#allocation51_spill] sm:$0xff]  ;;  %vm14049_vm10 = vcmp.le.s32.totalorder %v11335_v22, 6  ;;  %vm14050_vm14 = vcmp.le.s32.totalorder %v11378_v21, 6  ;;  %vm14051_vm11 = vcmp.le.s32.totalorder %v11366_v58, 6 }
 0x3d0   :  { %9786 = vmatmul.mubr.msk.f32.gmra.mrb[34].mxu0 %vm365_vm1, %v3859_v5  ;;  %v4111_v5 = vsel %vm344_vm4, %v12254_v10, 0.0  ;;  %v7076_v10 = vld [vmem:[%s13735_s1] sm:$0xff] }
 0x3d1   :  { %9788 = vmatprep.mubr.msk.f32.mxu0 %vm365_vm1, %v3860_v56  ;;  %v14036_v56 = vld [vmem:[#allocation33_spill] sm:$0xff] }
 0x3d4   :  { %9789 = vmatmul.mubr.msk.f32.gmra.mrb[36].mxu0 %vm365_vm1, %v3861_v9 }
 0x3d5   :  { %9791 = vmatprep.mubr.msk.f32.mxu0 %vm365_vm1, %v3862_v54  ;;  %v10416_v54 = vpack.c.bf16 %v7077_v30, %v7076_v10  ;;  %v14071_v10 = vld [vmem:[#allocation10_spill] sm:$0xff]  ;;  %v14072_v30 = vld [vmem:[#allocation9_spill] sm:$0xff] }
 0x3d8   :  { %9792 = vmatmul.mubr.msk.f32.gmra.mrb[38].mxu0 %vm365_vm1, %v3863_v36  ;;  %v14037_v36 = vld [vmem:[#allocation36_spill] sm:$0xff] }
 0x3d9   :  { %9794 = vmatprep.mubr.msk.f32.mxu0 %vm365_vm1, %v3864_v37  ;;  %v14038_v37 = vld [vmem:[#allocation38_spill] sm:$0xff] }
 0x3dc   :  { %9795 = vmatmul.mubr.msk.f32.gmra.mrb[40].mxu0 %vm365_vm1, %v3865_v51  ;;  %v14039_v51 = vld [vmem:[#allocation41_spill] sm:$0xff] }
 0x3dd   :  { %9797 = vmatprep.mubr.msk.f32.mxu0 %vm365_vm1, %v3866_v39  ;;  %v14040_v39 = vld [vmem:[#allocation45_spill] sm:$0xff] }
 0x3e0   :  { %9798 = vmatmul.mubr.msk.f32.gmra.mrb[42].mxu0 %vm365_vm1, %v3867_v7  ;;  %v14041_v7 = vld [vmem:[#allocation47_spill] sm:$0xff] }
 0x3e1   :  { %9800 = vmatprep.mubr.msk.f32.mxu0 %vm365_vm1, %v3868_v50  ;;  %v4334_v50 = vld [vmem:[#allocation2 + $0x48] sm:$0xff] }
 0x3e4   :  { %9801 = vmatmul.mubr.msk.f32.gmra.mrb[44].mxu0 %vm365_vm1, %v3869_v46  ;;  %v14042_v46 = vld [vmem:[#allocation49_spill] sm:$0xff] }
 0x3e5   :  { %9803 = vmatprep.mubr.msk.f32.mxu0 %vm365_vm1, %v3870_v24  ;;  %v14043_v24 = vld [vmem:[#allocation29_spill] sm:$0xff] }
 0x3e8   :  { %9804 = vmatmul.mubr.msk.f32.gmra.mrb[46].mxu0 %vm365_vm1, %v3871_v47  ;;  %v14044_v47 = vld [vmem:[#allocation25_spill] sm:$0xff] }
 0x3e9   :  { %9810 = vmatprep.mubr.msk.f32.mxu0 %vm365_vm1, %v4100_v52  ;;  %v14047_v52 = vld [vmem:[#allocation52_spill] sm:$0xff] }
 0x3ec   :  { %9811 = vmatmul.mubr.msk.f32.vlgmr.msra.gmra.mrb[32].mxu0 %vm365_vm1, %v4101_v31  ;;  %v7262_v31 = vld [vmem:[%s13735_s1 + $0x10] sm:$0xff] }
 0x3ed   :  { %10375 = vmatpush3.bf16.msra.mxu0 %v10372_v1  ;;  %9813 = vmatprep.mubr.msk.f32.mxu0 %vm365_vm1, %v4102_v33  ;;  %v4106_v1 = vsel %vm339_vm0, %v12398_v12, 0.0  ;;  %v4110_v12 = vsel %vm343_vm3, %v12245_v53, 0.0  ;;  %v4114_v53 = vsel %vm347_vm7, %v12432_v6, 0.0  ;;  %v8529_v6 = vld [vmem:[%s13737_s3 + $0x138] sm:$0xff] }
 0x3ee   :  { %10377 = vmatprep.subr.bf16.mxu0 %v10376_v63  ;;  %v10380_v9 = vpack.c.bf16 %v8529_v6, %v8528_v3  ;;  %v7263_v33 = vld [vmem:[%s13735_s1 + $0x18] sm:$0xff]  ;;  %v14073_v3 = vld [vmem:[#allocation12_spill] sm:$0xff]  ;;  %v14074_v6 = vld [vmem:[#allocation11_spill] sm:$0xff] }
 0x3f0   :  { %9814 = vmatmul.mubr.msk.f32.gmra.mrb[34].mxu0 %vm365_vm1, %v4103_v45  ;;  %10381 = vmatprep.subr.bf16.mxu1 %v10380_v9  ;;  %v4588_v45 = vsel %vm349_vm8, %v12282_v55, 0.0  ;;  %v4591_v55 = vsel %vm14050_vm14, %v12303_v2, 0.0  ;;  %vm14054_vm14 = vcmp.le.s32.totalorder %v11614_v8, 6 }
 0x3f1   :  { %9816 = vmatprep.mubr.msk.f32.mxu0 %vm365_vm1, %v4104_v35  ;;  %10383 = vmatpush3.bf16.msra.mxu1 %v10380_v9  ;;  %v10420_v35 = vpack.c.bf16 %v7263_v33, %v7262_v31  ;;  %v4596_v2 = vsel %vm14054_vm14, %v12325_v17, 0.0  ;;  %vm14058_vm14 = vcmp.le.s32.totalorder %v11253_v29, 6  ;;  %v14076_v9 = vld [vmem:[#allocation21_spill] sm:$0xff]  ;;  %v14091_v31 = vld [vmem:[#allocation23_spill] sm:$0xff]  ;;  %v7473_v33 = vld [vmem:[%s13735_s1 + $0x20] sm:$0xff] }
 0x3f2   :  { %v4600_v17 = vsel %vm14058_vm14, %v14026_v20, 0.0  ;;  %v14062_v20 = vld [vmem:[#allocation15_spill] sm:$0xff]  ;;  %vm14106_vm14 = vcmp.ge.s32.totalorder %v11335_v22, 1 }
 0x3f4   :  { %9817 = vmatmul.mubr.msk.f32.gmra.mrb[36].mxu0 %vm365_vm1, %v4105_v27  ;;  %v4589_v27 = vsel %vm14048_vm9, %v12291_v38, 0.0  ;;  %v4592_v38 = vsel %vm14051_vm11, %v12306_v13, 0.0  ;;  %vm14052_vm9 = vcmp.le.s32.totalorder %v11412_v23, 6  ;;  %vm14055_vm11 = vcmp.le.s32.totalorder %v11229_v18, 6 }
 0x3f5   :  { %9819 = vmatprep.mubr.msk.f32.mxu0 %vm365_vm1, %v4106_v1  ;;  %v4590_v1 = vsel %vm14049_vm10, %v12294_v48, 0.0  ;;  %v4593_v48 = vsel %vm14052_vm9, %v12315_v15, 0.0  ;;  %vm14053_vm10 = vcmp.le.s32.totalorder %v11424_v57, 6  ;;  %v4597_v15 = vsel %vm14055_vm11, %v12334_v16, 0.0 }
 0x3f6   :  { %vm14056_vm9 = vcmp.le.s32.totalorder %v11231_v19, 6  ;;  %vm14059_vm11 = vcmp.le.s32.totalorder %v11279_v43, 6 }
 0x3f7   :  { %v4598_v13 = vsel %vm14056_vm9, %v14022_v59, 0.0  ;;  %v4601_v16 = vsel %vm14059_vm11, %v14028_v4, 0.0  ;;  %vm14060_vm9 = vcmp.le.s32.totalorder %v11281_v44, 6  ;;  %v14064_v4 = vld [vmem:[#allocation17_spill] sm:$0xff]  ;;  %vm14107_vm11 = vcmp.ge.s32.totalorder %v11366_v58, 1 }
 0x3f8   :  { %9820 = vmatmul.mubr.f32.gmra.mrb[38].mxu0 %v14035_v41  ;;  %v4602_v59 = vsel %vm14060_vm9, %v12544_v34, 0.0  ;;  %v14066_v34 = vld [vmem:[#allocation19_spill] sm:$0xff]  ;;  %vm14108_vm9 = vcmp.ge.s32.totalorder %v13984_v11, 1 }
 0x3f9   :  { %9822 = vmatprep.mubr.msk.f32.mxu0 %vm365_vm1, %v4108_v60  ;;  %v4594_v60 = vsel %vm14053_vm10, %v12510_v0, 0.0  ;;  %vm14057_vm10 = vcmp.le.s32.totalorder %v11245_v26, 6 }
 0x3fa   :  { %v4599_v0 = vsel %vm14057_vm10, %v14024_v25, 0.0  ;;  %v14061_v25 = vld [vmem:[#allocation13_spill] sm:$0xff]  ;;  %vm14105_vm10 = vcmp.ge.s32.totalorder %v11343_v32, 1 }
 0x3fc   :  { %9823 = vmatmul.mubr.msk.f32.gmra.mrb[40].mxu0 %vm365_vm1, %v4109_v49  ;;  %v14063_v49 = vld [vmem:[#allocation16_spill] sm:$0xff] }
 0x3fd   :  { %9825 = vmatprep.mubr.msk.f32.mxu0 %vm365_vm1, %v4110_v12  ;;  %v14065_v12 = vld [vmem:[#allocation18_spill] sm:$0xff] }
 0x400   :  { %9826 = vmatmul.mubr.msk.f32.gmra.mrb[42].mxu0 %vm365_vm1, %v4111_v5  ;;  %v14067_v5 = vld [vmem:[#allocation20_spill] sm:$0xff] }
 0x401   :  { %9828 = vmatprep.mubr.msk.f32.mxu0 %vm365_vm1, %v4112_v14  ;;  %v14068_v14 = vld [vmem:[#allocation6_spill] sm:$0xff] }
 0x404   :  { %9829 = vmatmul.mubr.msk.f32.gmra.mrb[44].mxu0 %vm365_vm1, %v4113_v61  ;;  %v14069_v61 = vld [vmem:[#allocation8_spill] sm:$0xff] }
 0x405   :  { %9831 = vmatprep.mubr.msk.f32.mxu0 %vm365_vm1, %v4114_v53  ;;  %v14070_v53 = vld [vmem:[#allocation7_spill] sm:$0xff] }
 0x408   :  { %9832 = vmatmul.mubr.f32.gmra.mrb[46].mxu0 %v14035_v41 }
 0x409   :  { %9838 = vmatprep.mubr.msk.f32.mxu0 %vm365_vm1, %v14036_v56  ;;  %v14075_v56 = vld [vmem:[#allocation14_spill] sm:$0xff] }
 0x40c   :  { %9839 = vmatmul.mubr.msk.f32.vlgmr.msra.gmra.mrb[32].mxu0 %vm365_vm1, %v14037_v36  ;;  %v14078_v36 = vld [vmem:[#allocation40_spill] sm:$0xff] }
 0x40d   :  { %10379 = vmatpush3.bf16.msra.mxu0 %v10376_v63  ;;  %9841 = vmatprep.mubr.msk.f32.mxu0 %vm365_vm1, %v14038_v37  ;;  %v4342_v63 = vld [vmem:[#allocation2 + $0x88] sm:$0xff] }
 0x40e   :  { %10417 = vmatprep.subr.bf16.mxu0 %v10416_v54  ;;  %v14079_v37 = vld [vmem:[#allocation27_spill] sm:$0xff] }
 0x410   :  { %9842 = vmatmul.mubr.msk.f32.gmra.mrb[34].mxu0 %vm365_vm1, %v14039_v51  ;;  %v14080_v51 = vld [vmem:[#allocation43_spill] sm:$0xff] }
 0x411   :  { %9844 = vmatprep.mubr.msk.f32.mxu0 %vm365_vm1, %v14040_v39  ;;  %v14081_v39 = vld [vmem:[#allocation30_spill] sm:$0xff] }
 0x414   :  { %9845 = vmatmul.mubr.msk.f32.gmra.mrb[36].mxu0 %vm365_vm1, %v14041_v7  ;;  %v14082_v7 = vld [vmem:[#allocation28_spill] sm:$0xff] }
 0x415   :  { %9847 = vmatprep.mubr.msk.f32.mxu0 %vm365_vm1, %v4334_v50  ;;  %v14083_v50 = vld [vmem:[#allocation32_spill] sm:$0xff] }
 0x418   :  { %9848 = vmatmul.mubr.f32.gmra.mrb[38].mxu0 %v14035_v41 }
 0x419   :  { %9850 = vmatprep.mubr.msk.f32.mxu0 %vm365_vm1, %v14042_v46  ;;  %v14084_v46 = vld [vmem:[#allocation31_spill] sm:$0xff] }
 0x41c   :  { %9851 = vmatmul.mubr.msk.f32.gmra.mrb[40].mxu0 %vm365_vm1, %v14043_v24  ;;  %v14085_v24 = vld [vmem:[#allocation37_spill] sm:$0xff] }
 0x41d   :  { %9853 = vmatprep.mubr.msk.f32.mxu0 %vm365_vm1, %v14044_v47  ;;  %v14086_v47 = vld [vmem:[#allocation35_spill] sm:$0xff] }
 0x420   :  { %9854 = vmatmul.mubr.msk.f32.gmra.mrb[42].mxu0 %vm365_vm1, %v14045_v28  ;;  %v14087_v28 = vld [vmem:[#allocation44_spill] sm:$0xff] }
 0x421   :  { %9856 = vmatprep.mubr.msk.f32.mxu0 %vm365_vm1, %v14046_v40  ;;  %v14088_v40 = vld [vmem:[#allocation39_spill] sm:$0xff] }
 0x424   :  { %9857 = vmatmul.mubr.msk.f32.gmra.mrb[44].mxu0 %vm365_vm1, %v14047_v52  ;;  %v14089_v52 = vld [vmem:[#allocation48_spill] sm:$0xff] }
 0x425   :  { %9859 = vmatprep.mubr.msk.f32.mxu0 %vm365_vm1, %v4342_v63  ;;  %v14090_v63 = vld [vmem:[#allocation46_spill] sm:$0xff] }
 0x428   :  { %9860 = vmatmul.mubr.f32.gmra.mrb[46].mxu0 %v14035_v41 }
 0x429   :  { %9866 = vmatprep.mubr.msk.f32.mxu0 %vm365_vm1, %v4588_v45  ;;  %v7474_v45 = vld [vmem:[%s13735_s1 + $0x28] sm:$0xff] }
 0x42c   :  { %9867 = vmatmul.mubr.msk.f32.vlgmr.msra.gmra.mrb[32].mxu0 %vm365_vm1, %v4589_v27  ;;  %v14092_v27 = vld [vmem:[#allocation24_spill] sm:$0xff] }
 0x42d   :  { %9869 = vmatprep.mubr.msk.f32.mxu0 %vm365_vm1, %v4590_v1  ;;  %10419 = vmatpush3.bf16.msra.mxu0 %v10416_v54  ;;  %v14077_v54 = vld [vmem:[#allocation42_spill] sm:$0xff] }
 0x42e   :  { %10421 = vmatprep.subr.bf16.mxu0 %v10420_v35  ;;  %v8526_v1 = vld [vmem:[%s13737_s3 + $0x120] sm:$0xff] }
 0x430   :  { %9870 = vmatmul.mubr.msk.f32.gmra.mrb[34].mxu0 %vm365_vm1, %v4591_v55  ;;  %v8527_v55 = vld [vmem:[%s13737_s3 + $0x128] sm:$0xff] }
 0x431   :  { %9872 = vmatprep.mubr.msk.f32.mxu0 %vm365_vm1, %v4592_v38  ;;  %v10384_v38 = vpack.c.bf16 %v8527_v55, %v8526_v1 }
 0x433   :  { %10385 = vmatprep.subr.bf16.mxu1 %v10384_v38 }
 0x434   :  { %9873 = vmatmul.mubr.msk.f32.gmra.mrb[36].mxu0 %vm365_vm1, %v4593_v48  ;;  %v4841_v48 = vpop.permute.xlu0 %4840 }
 0x435   :  { %9875 = vmatprep.mubr.msk.f32.mxu0 %vm365_vm1, %v4594_v60 }
 0x438   :  { %9876 = vmatmul.mubr.f32.gmra.mrb[38].mxu0 %v14035_v41  ;;  %v4845_v60 = vpop.permute.xlu0 %4844 }
 0x439   :  { %9878 = vmatprep.mubr.msk.f32.mxu0 %vm365_vm1, %v4596_v2 }
 0x43c   :  { %9879 = vmatmul.mubr.msk.f32.gmra.mrb[40].mxu0 %vm365_vm1, %v4597_v15  ;;  %v4849_v2 = vpop.permute.xlu0 %4848  ;;  %v4843_v15 = vpop.permute.xlu1 %4842 }
 0x43d   :  { %9881 = vmatprep.mubr.msk.f32.mxu0 %vm365_vm1, %v4598_v13 }
 0x440   :  { %9882 = vmatmul.mubr.msk.f32.gmra.mrb[42].mxu0 %vm365_vm1, %v4599_v0  ;;  %v4853_v13 = vpop.permute.xlu0 %4852  ;;  %v4847_v0 = vpop.permute.xlu1 %4846 }
 0x441   :  { %9884 = vmatprep.mubr.msk.f32.mxu0 %vm365_vm1, %v4600_v17 }
 0x444   :  { %9885 = vmatmul.mubr.msk.f32.gmra.mrb[44].mxu0 %vm365_vm1, %v4601_v16  ;;  %v12795_v17 = vpop.permute.xlu0 %4858  ;;  %v12800_v16 = vld [vmem:[%s13738_s4 + $0x1] ss:$0 sm:$0xff] }
 0x445   :  { %9887 = vmatprep.mubr.msk.f32.mxu0 %vm365_vm1, %v4602_v59  ;;  %v4851_v59 = vpop.permute.xlu1 %4850 }
 0x448   :  { %9888 = vmatmul.mubr.f32.gmra.mrb[46].mxu0 %v14035_v41 }
 0x449   :  { %10146 = vmatprep.mubr.msk.f32.mxu0 %vm365_vm1, %v14061_v25 }
 0x44c   :  { %10147 = vmatmul.mubr.msk.f32.vlgmr.msra.gmra.mrb[48].mxu0 %vm365_vm1, %v14062_v20 }
 0x44d   :  { %10149 = vmatprep.mubr.msk.f32.mxu0 %vm365_vm1, %v14063_v49  ;;  %10423 = vmatpush3.bf16.msra.mxu0 %v10420_v35  ;;  %v10424_v35 = vpack.c.bf16 %v7474_v45, %v7473_v33 }
 0x44f   :  { %10425 = vmatprep.subr.bf16.mxu0 %v10424_v35 }
 0x450   :  { %10150 = vmatmul.mubr.msk.f32.gmra.mrb[50].mxu0 %vm365_vm1, %v14064_v4  ;;  %v12803_v4 = vpop.permute.xlu0 %4862 }
 0x451   :  { %10152 = vmatprep.mubr.msk.f32.mxu0 %vm365_vm1, %v14065_v12 }
 0x454   :  { %10153 = vmatmul.mubr.msk.f32.gmra.mrb[52].mxu0 %vm365_vm1, %v14066_v34 }
 0x455   :  { %10155 = vmatprep.mubr.msk.f32.mxu0 %vm365_vm1, %v14067_v5 }
 0x458   :  { %10156 = vmatmul.mubr.msk.f32.gmra.mrb[54].mxu0 %vm365_vm1, %v14068_v14 }
 0x459   :  { %10158 = vmatprep.mubr.msk.f32.mxu0 %vm365_vm1, %v14069_v61 }
 0x45c   :  { %10159 = vmatmul.mubr.msk.f32.gmra.mrb[56].mxu0 %vm365_vm1, %v14070_v53 }
 0x45d   :  { %10161 = vmatprep.mubr.msk.f32.mxu0 %vm365_vm1, %v14071_v10  ;;  %v4857_v10 = vpop.permute.xlu1 %4856 }
 0x460   :  { %10162 = vmatmul.mubr.msk.f32.gmra.mrb[58].mxu0 %vm365_vm1, %v14072_v30 }
 0x461   :  { %10164 = vmatprep.mubr.msk.f32.mxu0 %vm365_vm1, %v14073_v3 }
 0x464   :  { %10165 = vmatmul.mubr.msk.f32.gmra.mrb[60].mxu0 %vm365_vm1, %v14074_v6  ;;  %v12820_v6 = vpop.permute.xlu0 %4866 }
 0x465   :  { %10167 = vmatprep.mubr.msk.f32.mxu0 %vm365_vm1, %v14075_v56 }
 0x468   :  { %10168 = vmatmul.mubr.msk.f32.gmra.mrb[62].mxu0 %vm365_vm1, %v14076_v9 }
 0x469   :  { %10174 = vmatprep.mubr.msk.f32.mxu0 %vm365_vm1, %v14077_v54 }
 0x46c   :  { %10175 = vmatmul.mubr.msk.f32.vlgmr.msra.gmra.mrb[48].mxu0 %vm365_vm1, %v14078_v36 }
 0x46d   :  { %10177 = vmatprep.mubr.msk.f32.mxu0 %vm365_vm1, %v14079_v37  ;;  %10427 = vmatpush3.bf16.msra.mxu0 %v10424_v35  ;;  %v8558_v37 = vld [vmem:[%s13737_s3 + $0x140] sm:$0xff] }
 0x470   :  { %10178 = vmatmul.mubr.msk.f32.gmra.mrb[50].mxu0 %vm365_vm1, %v14080_v51  ;;  %v8559_v51 = vld [vmem:[%s13737_s3 + $0x148] sm:$0xff] }
 0x471   :  { %10180 = vmatprep.mubr.msk.f32.mxu0 %vm365_vm1, %v14081_v39 }
 0x474   :  { %10181 = vmatmul.mubr.msk.f32.gmra.mrb[52].mxu0 %vm365_vm1, %v14082_v7 }
 0x475   :  { %10183 = vmatprep.mubr.msk.f32.mxu0 %vm365_vm1, %v14083_v50  ;;  %v4861_v50 = vpop.permute.xlu1 %4860 }
 0x478   :  { %10184 = vmatmul.mubr.msk.f32.gmra.mrb[54].mxu0 %vm365_vm1, %v14084_v46 }
 0x479   :  { %10186 = vmatprep.mubr.msk.f32.mxu0 %vm365_vm1, %v14085_v24 }
 0x47c   :  { %10187 = vmatmul.mubr.msk.f32.gmra.mrb[56].mxu0 %vm365_vm1, %v14086_v47  ;;  %v12843_v47 = vpack.c.bf16 %v8559_v51, %v8558_v37 }
 0x47d   :  { %10189 = vmatprep.mubr.msk.f32.mxu0 %vm365_vm1, %v14087_v28 }
 0x480   :  { %10190 = vmatmul.mubr.msk.f32.gmra.mrb[58].mxu0 %vm365_vm1, %v14088_v40 }
 0x481   :  { %10192 = vmatprep.mubr.msk.f32.mxu0 %vm365_vm1, %v14089_v52 }
 0x484   :  { %10193 = vmatmul.mubr.msk.f32.gmra.mrb[60].mxu0 %vm365_vm1, %v14090_v63  ;;  %v4855_v63 = vpop.permute.xlu0 %4854 }
 0x485   :  { %10195 = vmatprep.mubr.msk.f32.mxu0 %vm365_vm1, %v14091_v31 }
 0x488   :  { %10196 = vmatmul.mubr.msk.f32.gmra.mrb[62].mxu0 %vm365_vm1, %v14092_v27 }
 0x4ff   :  { %v9868_v25 = vpop.f32.mrb[32].mxu0 }
 0x500   :  { %v4825_v20 = vadd.f32 %v9868_v25, %v12800_v16  ;;  %v4721_v49 = vpop.f32.mrb[33].mxu0 }
 0x501   :  { %v4824_v12 = vadd.f32 %v12800_v16, %v4721_v49 }
 0x502   :  { %v12806_v34 = vadd.f32 %v4843_v15, %v4825_v20 }
 0x503   :  { %v12808_v5 = vadd.f32 %v4841_v48, %v4824_v12  ;;  %v9871_v14 = vpop.f32.mrb[34].mxu0  ;;  %10202 = vmatprep.mubr.msk.f32.mxu0 %vm365_vm1, %v4824_v12 }
 0x504   :  { %4905 = vst.msk [vmem:[#allocation2 + $0x18] sm:$0xff] %vm365_vm1, %v12806_v34  ;;  %v4827_v61 = vadd.f32 %v9871_v14, %v12800_v16  ;;  %v4731_v53 = vpop.f32.mrb[35].mxu0  ;;  %10203 = vmatmul.mubr.msk.f32.vlgmr.msra.gmra.mrb[48].mxu0 %vm365_vm1, %v4825_v20 }
 0x505   :  { %4904 = vst.msk [vmem:[#allocation2 + $0x10] sm:$0xff] %vm365_vm1, %v12808_v5  ;;  %v4826_v30 = vadd.f32 %v12800_v16, %v4731_v53 }
 0x506   :  { %v12818_v3 = vadd.f32 %v4847_v0, %v4827_v61 }
 0x507   :  { %v12822_v56 = vadd.f32 %v4845_v60, %v4826_v30  ;;  %v9874_v9 = vpop.f32.mrb[36].mxu0  ;;  %10205 = vmatprep.mubr.msk.f32.mxu0 %vm365_vm1, %v4826_v30 }
 0x508   :  { %4907 = vst.msk [vmem:[#allocation2 + $0x28] sm:$0xff] %vm365_vm1, %v12818_v3  ;;  %v4829_v54 = vadd.f32 %v9874_v9, %v12800_v16  ;;  %v4741_v36 = vpop.f32.mrb[37].mxu0  ;;  %10206 = vmatmul.mubr.msk.f32.gmra.mrb[50].mxu0 %vm365_vm1, %v4827_v61 }
 0x509   :  { %4906 = vst.msk [vmem:[#allocation2 + $0x20] sm:$0xff] %vm365_vm1, %v12822_v56  ;;  %v4828_v39 = vadd.f32 %v12800_v16, %v4741_v36 }
 0x50a   :  { %v12838_v7 = vadd.f32 %v4851_v59, %v4829_v54 }
 0x50b   :  { %v12840_v46 = vadd.f32 %v4849_v2, %v4828_v39  ;;  %v9877_v24 = vpop.f32.mrb[38].mxu0  ;;  %10208 = vmatprep.mubr.msk.f32.mxu0 %vm365_vm1, %v4828_v39  ;;  %v12853_v33 = vld [vmem:[#allocation2 + $0x18] sm:$0xff] }
 0x50c   :  { %4909 = vst.msk [vmem:[#allocation2 + $0x38] sm:$0xff] %vm365_vm1, %v12838_v7  ;;  %v4831_v28 = vadd.f32 %v9877_v24, %v12800_v16  ;;  %v4751_v40 = vpop.f32.mrb[39].mxu0  ;;  %10209 = vmatmul.mubr.msk.f32.gmra.mrb[52].mxu0 %vm365_vm1, %v4829_v54  ;;  %v4956_v52 = vld [vmem:[#allocation2 + $0x10] sm:$0xff]  ;;  %14093 = vst [vmem:[#allocation34_spill] sm:$0xff] %v12853_v33 }
 0x50d   :  { %4908 = vst.msk [vmem:[#allocation2 + $0x30] sm:$0xff] %vm365_vm1, %v12840_v46  ;;  %v4830_v31 = vadd.f32 %v12800_v16, %v4751_v40  ;;  %9895 = vmatmul.mubr.msk.f32.vlgmr.msra.gmra.mrb[16].mxu1 %vm365_vm1, %v4956_v52 }
 0x50e   :  { %v12855_v45 = vadd.f32 %v4855_v63, %v4831_v28  ;;  %10387 = vmatpush3.bf16.msra.mxu1 %v10384_v38  ;;  %9897 = vmatprep.mubr.msk.f32.mxu1 %vm365_vm1, %v12853_v33  ;;  %v4865_v38 = vpop.permute.xlu1 %4864 }
 0x50f   :  { %v12859_v35 = vadd.f32 %v4853_v13, %v4830_v31  ;;  %v9880_v27 = vpop.f32.mrb[40].mxu0  ;;  %10211 = vmatprep.mubr.msk.f32.mxu0 %vm365_vm1, %v4830_v31  ;;  %10389 = vmatprep.subr.bf16.mxu1 %v12843_v47  ;;  %v12874_v2 = vld [vmem:[#allocation2 + $0x28] sm:$0xff] }
 0x510   :  { %4911 = vst.msk [vmem:[#allocation2 + $0x48] sm:$0xff] %vm365_vm1, %v12855_v45  ;;  %v4833_v1 = vadd.f32 %v9880_v27, %v12800_v16  ;;  %v4761_v55 = vpop.f32.mrb[41].mxu0  ;;  %10212 = vmatmul.mubr.msk.f32.gmra.mrb[54].mxu0 %vm365_vm1, %v4831_v28  ;;  %v12867_v48 = vld [vmem:[#allocation2 + $0x20] sm:$0xff]  ;;  %14095 = vst [vmem:[#allocation53_spill] sm:$0xff] %v12874_v2 }
 0x511   :  { %14094 = vst [vmem:[#allocation26_spill] sm:$0xff] %v12867_v48  ;;  %4910 = vst.msk [vmem:[#allocation2 + $0x40] sm:$0xff] %vm365_vm1, %v12859_v35  ;;  %v4832_v60 = vadd.f32 %v12800_v16, %v4761_v55  ;;  %9898 = vmatmul.mubr.msk.f32.gmra.mrb[18].mxu1 %vm365_vm1, %v12867_v48  ;;  %v8574_v55 = vld [vmem:[%s13737_s3 + $0x150] sm:$0xff] }
 0x512   :  { %v12877_v15 = vadd.f32 %v12795_v17, %v4833_v1  ;;  %9900 = vmatprep.mubr.msk.f32.mxu1 %vm365_vm1, %v12874_v2  ;;  %v4869_v14 = vpop.permute.xlu1 %4868 }
 0x513   :  { %v12881_v13 = vadd.f32 %v4857_v10, %v4832_v60  ;;  %v9883_v0 = vpop.f32.mrb[42].mxu0  ;;  %10214 = vmatprep.mubr.msk.f32.mxu0 %vm365_vm1, %v4832_v60  ;;  %v12895_v49 = vld [vmem:[#allocation2 + $0x38] sm:$0xff]  ;;  %v12971_v60 = vld [vmem:[#allocation2 + $0xf] sm:$0xff] }
 0x514   :  { %4913 = vst.msk [vmem:[#allocation2 + $0x58] sm:$0xff] %vm365_vm1, %v12877_v15  ;;  %v4835_v59 = vadd.f32 %v9883_v0, %v12800_v16  ;;  %v4771_v25 = vpop.f32.mrb[43].mxu0  ;;  %10215 = vmatmul.mubr.msk.f32.gmra.mrb[56].mxu0 %vm365_vm1, %v4833_v1  ;;  %v12888_v20 = vld [vmem:[#allocation2 + $0x30] sm:$0xff]  ;;  %14097 = vst [vmem:[#allocation33_spill] sm:$0xff] %v12895_v49 }
 0x515   :  { %14096 = vst [vmem:[#allocation54_spill] sm:$0xff] %v12888_v20  ;;  %4912 = vst.msk [vmem:[#allocation2 + $0x50] sm:$0xff] %vm365_vm1, %v12881_v13  ;;  %v4834_v17 = vadd.f32 %v12800_v16, %v4771_v25  ;;  %9901 = vmatmul.mubr.msk.f32.gmra.mrb[20].mxu1 %vm365_vm1, %v12888_v20  ;;  %v12974_v0 = vld [vmem:[#allocation2 + $0x17] sm:$0xff]  ;;  %v4937_v25 = vsel %vm14105_vm10, %v12971_v60, 0.0  ;;  %vm14109_vm10 = vcmp.ge.s32.totalorder %v13986_v42, 1 }
 0x516   :  { %v12898_v12 = vadd.f32 %v12803_v4, %v4835_v59  ;;  %9903 = vmatprep.mubr.msk.f32.mxu1 %vm365_vm1, %v12895_v49  ;;  %v4871_v24 = vpop.permute.xlu1 %4870 }
 0x517   :  { %v12902_v61 = vadd.f32 %v4861_v50, %v4834_v17  ;;  %v9886_v53 = vpop.f32.mrb[44].mxu0  ;;  %10217 = vmatprep.mubr.msk.f32.mxu0 %vm365_vm1, %v4834_v17  ;;  %v4938_v17 = vsel %vm14106_vm14, %v12974_v0, 0.0  ;;  %vm14110_vm14 = vcmp.le.s32.totalorder %v11343_v32, 6 }
 0x518   :  { %4915 = vst.msk [vmem:[#allocation2 + $0x68] sm:$0xff] %vm365_vm1, %v12898_v12  ;;  %v4837_v10 = vadd.f32 %v9886_v53, %v12800_v16  ;;  %v4781_v30 = vpop.f32.mrb[45].mxu0  ;;  %10218 = vmatmul.mubr.msk.f32.gmra.mrb[58].mxu0 %vm365_vm1, %v4835_v59  ;;  %v12909_v9 = vld [vmem:[#allocation2 + $0x40] sm:$0xff] }
 0x519   :  { %14098 = vst [vmem:[#allocation36_spill] sm:$0xff] %v12909_v9  ;;  %4914 = vst.msk [vmem:[#allocation2 + $0x60] sm:$0xff] %vm365_vm1, %v12902_v61  ;;  %v4836_v4 = vadd.f32 %v12800_v16, %v4781_v30  ;;  %9904 = vmatmul.mubr.msk.f32.gmra.mrb[22].mxu1 %vm365_vm1, %v12909_v9  ;;  %v12987_v53 = vld [vmem:[#allocation2 + $0x27] sm:$0xff] }
 0x51a   :  { %v12917_v54 = vadd.f32 %v12820_v6, %v4837_v10  ;;  %9906 = vmatprep.mubr.f32.mxu1 %v14035_v41  ;;  %v4940_v30 = vsel %vm14107_vm11, %v12987_v53, 0.0  ;;  %vm14111_vm11 = vcmp.le.s32.totalorder %v11335_v22, 6 }
 0x51b   :  { %v12920_v36 = vadd.f32 %v4865_v38, %v4836_v4  ;;  %v9889_v37 = vpop.f32.mrb[46].mxu0  ;;  %10220 = vmatprep.mubr.msk.f32.mxu0 %vm365_vm1, %v4836_v4  ;;  %v12931_v28 = vld [vmem:[#allocation2 + $0x58] sm:$0xff]  ;;  %v12996_v4 = vld [vmem:[#allocation2 + $0x2f] sm:$0xff] }
 0x51c   :  { %4917 = vst.msk [vmem:[#allocation2 + $0x78] sm:$0xff] %vm365_vm1, %v12917_v54  ;;  %v4839_v51 = vadd.f32 %v9889_v37, %v12800_v16  ;;  %v4791_v39 = vpop.f32.mrb[47].mxu0  ;;  %10221 = vmatmul.mubr.msk.f32.gmra.mrb[60].mxu0 %vm365_vm1, %v4837_v10  ;;  %v4964_v50 = vld [vmem:[#allocation2 + $0x50] sm:$0xff]  ;;  %14099 = vst [vmem:[#allocation38_spill] sm:$0xff] %v12931_v28  ;;  %v8575_v38 = vld [vmem:[%s13737_s3 + $0x158] sm:$0xff]  ;;  %v4941_v37 = vsel %vm338_vm12, %v12996_v4, 0.0 }
 0x51d   :  { %4916 = vst.msk [vmem:[#allocation2 + $0x70] sm:$0xff] %vm365_vm1, %v12920_v36  ;;  %v4838_v6 = vadd.f32 %v12800_v16, %v4791_v39  ;;  %9907 = vmatmul.mubr.msk.f32.gmra.mrb[24].mxu1 %vm365_vm1, %v4964_v50  ;;  %v10392_v59 = vpack.c.bf16 %v8575_v38, %v8574_v55  ;;  %v13008_v39 = vld [vmem:[#allocation2 + $0x3f] sm:$0xff]  ;;  %v13107_v9 = vld [vmem:[#allocation2 + $0x51] sm:$0xff] }
 0x51e   :  { %v12933_v40 = vadd.f32 %v4871_v24, %v4839_v51  ;;  %9909 = vmatprep.mubr.msk.f32.mxu1 %vm365_vm1, %v12931_v28  ;;  %v4943_v50 = vsel %vm14108_vm9, %v13008_v39, 0.0  ;;  %v13015_v24 = vld [vmem:[#allocation2 + $0x4f] sm:$0xff]  ;;  %vm14112_vm9 = vcmp.le.s32.totalorder %v11378_v21, 6  ;;  %v13100_v28 = vld [vmem:[#allocation2 + $0x41] sm:$0xff] }
 0x51f   :  { %v12937_v52 = vadd.f32 %v4869_v14, %v4838_v6  ;;  %10223 = vmatprep.mubr.msk.f32.mxu0 %vm365_vm1, %v4838_v6  ;;  %v12949_v16 = vld [vmem:[#allocation2 + $0x68] sm:$0xff]  ;;  %v12983_v14 = vld [vmem:[#allocation2 + $0x1f] sm:$0xff]  ;;  %v13018_v6 = vld [vmem:[#allocation2 + $0x57] sm:$0xff]  ;;  %v4945_v55 = vsel %vm342_vm2, %v13015_v24, 0.0 }
 0x520   :  { %4919 = vst.msk [vmem:[#allocation2 + $0x88] sm:$0xff] %vm365_vm1, %v12933_v40  ;;  %10224 = vmatmul.mubr.msk.f32.gmra.mrb[62].mxu0 %vm365_vm1, %v4839_v51  ;;  %v12943_v63 = vld [vmem:[#allocation2 + $0x60] sm:$0xff]  ;;  %14101 = vst [vmem:[#allocation45_spill] sm:$0xff] %v12949_v16  ;;  %v4939_v10 = vsel %vm336_vm13, %v12983_v14, 0.0  ;;  %v4946_v38 = vsel %vm343_vm3, %v13018_v6, 0.0 }
 0x521   :  { %14100 = vst [vmem:[#allocation41_spill] sm:$0xff] %v12943_v63  ;;  %4918 = vst.msk [vmem:[#allocation2 + $0x80] sm:$0xff] %vm365_vm1, %v12937_v52  ;;  %9910 = vmatmul.mubr.msk.f32.gmra.mrb[26].mxu1 %vm365_vm1, %v12943_v63  ;;  %v13076_v63 = vld [vmem:[#allocation2 + $0x21] sm:$0xff]  ;;  %v13110_v49 = vld [vmem:[#allocation2 + $0x59] sm:$0xff] }
 0x522   :  { %9912 = vmatprep.mubr.msk.f32.mxu1 %vm365_vm1, %v12949_v16  ;;  %v13119_v20 = vld [vmem:[#allocation2 + $0x61] sm:$0xff] }
 0x523   :  { %v12957_v27 = vld [vmem:[#allocation2 + $0x78] sm:$0xff] }
 0x524   :  { %v12953_v31 = vld [vmem:[#allocation2 + $0x70] sm:$0xff]  ;;  %14103 = vst [vmem:[#allocation49_spill] sm:$0xff] %v12957_v27 }
 0x525   :  { %14102 = vst [vmem:[#allocation47_spill] sm:$0xff] %v12953_v31  ;;  %9913 = vmatmul.mubr.msk.f32.gmra.mrb[28].mxu1 %vm365_vm1, %v12953_v31  ;;  %v13131_v48 = vld [vmem:[#allocation2 + $0x71] sm:$0xff] }
 0x526   :  { %9915 = vmatprep.mubr.msk.f32.mxu1 %vm365_vm1, %v12957_v27  ;;  %v13067_v27 = vld [vmem:[#allocation2 + $0x19] sm:$0xff]  ;;  %14122 = vst [vmem:[#allocation50_spill] sm:$0xff] %v13131_v48 }
 0x527   :  { %v5394_v16 = vsel %vm14111_vm11, %v13067_v27, 0.0  ;;  %vm14115_vm11 = vcmp.le.s32.totalorder %v11424_v57, 6 }
 0x528   :  { %v12961_v1 = vld [vmem:[#allocation2 + $0x80] sm:$0xff] }
 0x529   :  { %14104 = vst [vmem:[#allocation29_spill] sm:$0xff] %v12961_v1  ;;  %9916 = vmatmul.mubr.msk.f32.gmra.mrb[30].mxu1 %vm365_vm1, %v12961_v1  ;;  %v13064_v1 = vld [vmem:[#allocation2 + $0x11] sm:$0xff]  ;;  %v13134_v33 = vld [vmem:[#allocation2 + $0x79] sm:$0xff] }
 0x52a   :  { %9922 = vmatprep.mubr.f32.mxu1 %v14035_v41  ;;  %v5393_v31 = vsel %vm14110_vm14, %v13064_v1, 0.0  ;;  %vm14114_vm14 = vcmp.le.s32.totalorder %v11412_v23, 6  ;;  %14123 = vst [vmem:[#allocation51_spill] sm:$0xff] %v13134_v33 }
 0x52d   :  { %9923 = vmatmul.mubr.msk.f32.vlgmr.msra.gmra.mrb[16].mxu1 %vm365_vm1, %v4937_v25  ;;  %v13027_v25 = vld [vmem:[#allocation2 + $0x5f] sm:$0xff] }
 0x52e   :  { %10391 = vmatpush3.bf16.msra.mxu1 %v12843_v47  ;;  %9925 = vmatprep.mubr.msk.f32.mxu1 %vm365_vm1, %v4938_v17  ;;  %v12999_v47 = vld [vmem:[#allocation2 + $0x37] sm:$0xff]  ;;  %v13030_v17 = vld [vmem:[#allocation2 + $0x67] sm:$0xff] }
 0x52f   :  { %10393 = vmatprep.subr.bf16.mxu1 %v10392_v59  ;;  %v4942_v51 = vsel %vm339_vm0, %v12999_v47, 0.0 }
 0x531   :  { %9926 = vmatmul.mubr.msk.f32.gmra.mrb[18].mxu1 %vm365_vm1, %v4939_v10  ;;  %v4947_v10 = vsel %vm344_vm4, %v13027_v25, 0.0 }
 0x532   :  { %9928 = vmatprep.mubr.msk.f32.mxu1 %vm365_vm1, %v4940_v30  ;;  %v4948_v30 = vsel %vm345_vm5, %v13030_v17, 0.0 }
 0x535   :  { %9929 = vmatmul.mubr.msk.f32.gmra.mrb[20].mxu1 %vm365_vm1, %v4941_v37  ;;  %v13039_v37 = vld [vmem:[#allocation2 + $0x6f] sm:$0xff] }
 0x536   :  { %9931 = vmatprep.mubr.msk.f32.mxu1 %vm365_vm1, %v4942_v51  ;;  %v13042_v51 = vld [vmem:[#allocation2 + $0x77] sm:$0xff] }
 0x539   :  { %9932 = vmatmul.mubr.msk.f32.gmra.mrb[22].mxu1 %vm365_vm1, %v4943_v50  ;;  %v4949_v50 = vsel %vm346_vm6, %v13039_v37, 0.0 }
 0x53a   :  { %9934 = vmatprep.mubr.f32.mxu1 %v14035_v41 }
 0x53d   :  { %9935 = vmatmul.mubr.msk.f32.gmra.mrb[24].mxu1 %vm365_vm1, %v4945_v55  ;;  %v4950_v55 = vsel %vm347_vm7, %v13042_v51, 0.0 }
 0x53e   :  { %9937 = vmatprep.mubr.msk.f32.mxu1 %vm365_vm1, %v4946_v38  ;;  %v13051_v38 = vld [vmem:[#allocation2 + $0x7f] sm:$0xff] }
 0x541   :  { %9938 = vmatmul.mubr.msk.f32.gmra.mrb[26].mxu1 %vm365_vm1, %v4947_v10  ;;  %v4951_v10 = vsel %vm14109_vm10, %v13051_v38, 0.0  ;;  %vm14113_vm10 = vcmp.le.s32.totalorder %v11366_v58, 6 }
 0x542   :  { %9940 = vmatprep.mubr.msk.f32.mxu1 %vm365_vm1, %v4948_v30  ;;  %v8592_v30 = vld [vmem:[%s13737_s3 + $0x160] sm:$0xff] }
 0x545   :  { %9941 = vmatmul.mubr.msk.f32.gmra.mrb[28].mxu1 %vm365_vm1, %v4949_v50  ;;  %v8593_v50 = vld [vmem:[%s13737_s3 + $0x168] sm:$0xff] }
 0x546   :  { %9943 = vmatprep.mubr.msk.f32.mxu1 %vm365_vm1, %v4950_v55  ;;  %v10396_v55 = vpack.c.bf16 %v8593_v50, %v8592_v30  ;;  %v5395_v30 = vsel %vm14112_vm9, %v13076_v63, 0.0  ;;  %v13088_v50 = vld [vmem:[#allocation2 + $0x31] sm:$0xff]  ;;  %vm14116_vm9 = vcmp.le.s32.totalorder %v13984_v11, 6 }
 0x549   :  { %9944 = vmatmul.mubr.msk.f32.gmra.mrb[30].mxu1 %vm365_vm1, %v4951_v10  ;;  %v13079_v10 = vld [vmem:[#allocation2 + $0x29] sm:$0xff] }
 0x54a   :  { %9950 = vmatprep.mubr.f32.mxu1 %v14035_v41 }
 0x54d   :  { %9951 = vmatmul.mubr.msk.f32.vlgmr.msra.gmra.mrb[16].mxu1 %vm365_vm1, %v5393_v31  ;;  %v5396_v31 = vsel %vm14113_vm10, %v13079_v10, 0.0  ;;  %vm14117_vm10 = vcmp.le.s32.totalorder %v11229_v18, 6 }
 0x54e   :  { %10395 = vmatpush3.bf16.msra.mxu1 %v10392_v59  ;;  %9953 = vmatprep.mubr.msk.f32.mxu1 %vm365_vm1, %v5394_v16  ;;  %v13091_v59 = vld [vmem:[#allocation2 + $0x39] sm:$0xff]  ;;  %v5397_v16 = vsel %vm14114_vm14, %v13088_v50, 0.0  ;;  %vm14118_vm14 = vcmp.le.s32.totalorder %v11231_v19, 6 }
 0x54f   :  { %10397 = vmatprep.subr.bf16.mxu1 %v10396_v55 }
 0x551   :  { %9954 = vmatmul.mubr.msk.f32.gmra.mrb[18].mxu1 %vm365_vm1, %v5395_v30  ;;  %v5398_v30 = vsel %vm14115_vm11, %v13091_v59, 0.0  ;;  %vm14120_vm11 = vcmp.le.s32.totalorder %v11245_v26, 6 }
 0x552   :  { %9956 = vmatprep.mubr.msk.f32.mxu1 %vm365_vm1, %v5396_v31  ;;  %v5399_v31 = vsel %vm14116_vm9, %v13100_v28, 0.0  ;;  %v5403_v2 = vsel %vm14120_vm11, %v13119_v20, 0.0  ;;  %vm14121_vm9 = vcmp.le.s32.totalorder %v11253_v29, 6  ;;  %vm14127_vm11 = vcmp.le.s32.totalorder %v13986_v42, 6 }
 0x555   :  { %9957 = vmatmul.mubr.msk.f32.gmra.mrb[20].mxu1 %vm365_vm1, %v5397_v16  ;;  %v5401_v16 = vsel %vm14117_vm10, %v13107_v9, 0.0  ;;  %vm14124_vm10 = vcmp.le.s32.totalorder %v11279_v43, 6 }
 0x556   :  { %9959 = vmatprep.mubr.msk.f32.mxu1 %vm365_vm1, %v5398_v30  ;;  %v5402_v30 = vsel %vm14118_vm14, %v13110_v49, 0.0  ;;  %vm14125_vm14 = vcmp.le.s32.totalorder %v11281_v44, 6 }
 0x559   :  { %9960 = vmatmul.mubr.msk.f32.gmra.mrb[22].mxu1 %vm365_vm1, %v5399_v31  ;;  %v13122_v31 = vld [vmem:[#allocation2 + $0x69] sm:$0xff] }
 0x55a   :  { %9962 = vmatprep.mubr.f32.mxu1 %v14035_v41  ;;  %14119 = vst [vmem:[#allocation25_spill] sm:$0xff] %v13122_v31  ;;  %v13143_v41 = vld [vmem:[#allocation2 + $0x81] sm:$0xff] }
 0x55b   :  { %14126 = vst [vmem:[#allocation52_spill] sm:$0xff] %v13143_v41 }
 0x55d   :  { %9963 = vmatmul.mubr.msk.f32.gmra.mrb[24].mxu1 %vm365_vm1, %v5401_v16  ;;  %v5404_v16 = vsel %vm14121_vm9, %v13122_v31, 0.0  ;;  %v8610_v31 = vld [vmem:[%s13737_s3 + $0x170] sm:$0xff]  ;;  %vm14128_vm9 = vcmp.ge.s32.totalorder %v11522_v62, 1 }
 0x55e   :  { %9965 = vmatprep.mubr.msk.f32.mxu1 %vm365_vm1, %v5402_v30  ;;  %v5405_v30 = vsel %vm14124_vm10, %v13131_v48, 0.0  ;;  %vm14129_vm10 = vcmp.ge.s32.totalorder %v11343_v32, 1 }
 0x561   :  { %9966 = vmatmul.mubr.msk.f32.gmra.mrb[26].mxu1 %vm365_vm1, %v5403_v2  ;;  %v5406_v2 = vsel %vm14125_vm14, %v13134_v33, 0.0  ;;  %v5636_v33 = vsel %vm14128_vm9, %v12971_v60, 0.0  ;;  %vm14130_vm14 = vcmp.ge.s32.totalorder %v11335_v22, 1  ;;  %v5639_v60 = vsel %vm336_vm13, %v12987_v53, 0.0 }
 0x562   :  { %9968 = vmatprep.mubr.msk.f32.mxu1 %vm365_vm1, %v5404_v16  ;;  %v5407_v16 = vsel %vm14127_vm11, %v13143_v41, 0.0  ;;  %v5637_v41 = vsel %vm14129_vm10, %v12974_v0, 0.0  ;;  %v5638_v48 = vsel %vm14130_vm14, %v12983_v14, 0.0  ;;  %vm14131_vm11 = vcmp.ge.s32.totalorder %v11366_v58, 1 }
 0x563   :  { %vm14132_vm9 = vcmp.ge.s32.totalorder %v13984_v11, 1  ;;  %vm14133_vm10 = vcmp.ge.s32.totalorder %v13986_v42, 1  ;;  %vm14134_vm14 = vcmp.le.s32.totalorder %v11343_v32, 6 }
 0x565   :  { %9969 = vmatmul.mubr.msk.f32.gmra.mrb[28].mxu1 %vm365_vm1, %v5405_v30  ;;  %v8611_v30 = vld [vmem:[%s13737_s3 + $0x178] sm:$0xff] }
 0x566   :  { %9971 = vmatprep.mubr.msk.f32.mxu1 %vm365_vm1, %v5406_v2  ;;  %v10400_v2 = vpack.c.bf16 %v8611_v30, %v8610_v31  ;;  %v5645_v30 = vsel %vm342_vm2, %v13018_v6, 0.0 }
 0x569   :  { %9972 = vmatmul.mubr.msk.f32.gmra.mrb[30].mxu1 %vm365_vm1, %v5407_v16  ;;  %v5644_v16 = vsel %vm341_vm15, %v13015_v24, 0.0  ;;  %v5648_v24 = vsel %vm345_vm5, %v13039_v37, 0.0 }
 0x56a   :  { %9978 = vmatprep.mubr.msk.f32.mxu1 %vm365_vm1, %v5636_v33  ;;  %v5640_v33 = vsel %vm14131_vm11, %v12996_v4, 0.0  ;;  %vm14135_vm11 = vcmp.le.s32.totalorder %v11335_v22, 6 }
 0x56d   :  { %9979 = vmatmul.mubr.msk.f32.vlgmr.msra.gmra.mrb[16].mxu1 %vm365_vm1, %v5637_v41  ;;  %v5641_v41 = vsel %vm338_vm12, %v12999_v47, 0.0 }
 0x56e   :  { %10399 = vmatpush3.bf16.msra.mxu1 %v10396_v55  ;;  %9981 = vmatprep.mubr.msk.f32.mxu1 %vm365_vm1, %v5638_v48  ;;  %v5642_v48 = vsel %vm339_vm0, %v13008_v39, 0.0  ;;  %v13183_v55 = vld [vmem:[#allocation2 + $0x47] sm:$0xff] }
 0x56f   :  { %10401 = vmatprep.subr.bf16.mxu1 %v10400_v2  ;;  %v5643_v31 = vsel %vm14132_vm9, %v13183_v55, 0.0  ;;  %vm14136_vm9 = vcmp.le.s32.totalorder %v11378_v21, 6 }
 0x571   :  { %9982 = vmatmul.mubr.msk.f32.gmra.mrb[18].mxu1 %vm365_vm1, %v5639_v60  ;;  %v5646_v60 = vsel %vm343_vm3, %v13027_v25, 0.0 }
 0x572   :  { %9984 = vmatprep.mubr.msk.f32.mxu1 %vm365_vm1, %v5640_v33  ;;  %v5647_v33 = vsel %vm344_vm4, %v13030_v17, 0.0 }
 0x575   :  { %9985 = vmatmul.mubr.msk.f32.gmra.mrb[20].mxu1 %vm365_vm1, %v5641_v41  ;;  %v5649_v41 = vsel %vm346_vm6, %v13042_v51, 0.0 }
 0x576   :  { %9987 = vmatprep.mubr.msk.f32.mxu1 %vm365_vm1, %v5642_v48  ;;  %v5650_v48 = vsel %vm347_vm7, %v13051_v38, 0.0 }
 0x579   :  { %9988 = vmatmul.mubr.msk.f32.gmra.mrb[22].mxu1 %vm365_vm1, %v5643_v31  ;;  %v13217_v31 = vld [vmem:[#allocation2 + $0x87] sm:$0xff] }
 0x57a   :  { %9990 = vmatprep.mubr.msk.f32.mxu1 %vm365_vm1, %v5644_v16  ;;  %v5651_v16 = vsel %vm14133_vm10, %v13217_v31, 0.0  ;;  %vm14137_vm10 = vcmp.le.s32.totalorder %v11366_v58, 6 }
 0x57d   :  { %9991 = vmatmul.mubr.msk.f32.gmra.mrb[24].mxu1 %vm365_vm1, %v5645_v30  ;;  %v8628_v30 = vld [vmem:[%s13737_s3 + $0x180] sm:$0xff] }
 0x57e   :  { %9993 = vmatprep.mubr.msk.f32.mxu1 %vm365_vm1, %v5646_v60  ;;  %v8629_v60 = vld [vmem:[%s13737_s3 + $0x188] sm:$0xff] }
 0x581   :  { %9994 = vmatmul.mubr.msk.f32.gmra.mrb[26].mxu1 %vm365_vm1, %v5647_v33  ;;  %v10404_v33 = vpack.c.bf16 %v8629_v60, %v8628_v30  ;;  %v14150_v30 = vld [vmem:[#allocation52_spill] sm:$0xff] }
 0x582   :  { %9996 = vmatprep.mubr.msk.f32.mxu1 %vm365_vm1, %v5648_v24 }
 0x585   :  { %9997 = vmatmul.mubr.msk.f32.gmra.mrb[28].mxu1 %vm365_vm1, %v5649_v41 }
 0x586   :  { %9999 = vmatprep.mubr.msk.f32.mxu1 %vm365_vm1, %v5650_v48  ;;  %v14148_v48 = vld [vmem:[#allocation51_spill] sm:$0xff] }
 0x589   :  { %10000 = vmatmul.mubr.msk.f32.gmra.mrb[30].mxu1 %vm365_vm1, %v5651_v16 }
 0x58a   :  { %10006 = vmatprep.mubr.msk.f32.mxu1 %vm365_vm1, %v12808_v5  ;;  %v8645_v5 = vld [vmem:[%s13737_s3 + $0x198] sm:$0xff] }
 0x58d   :  { %10007 = vmatmul.mubr.msk.f32.vlgmr.msra.gmra.mrb[16].mxu1 %vm365_vm1, %v12806_v34  ;;  %v8644_v34 = vld [vmem:[%s13737_s3 + $0x190] sm:$0xff] }
 0x58e   :  { %10403 = vmatpush3.bf16.msra.mxu1 %v10400_v2  ;;  %10009 = vmatprep.mubr.msk.f32.mxu1 %vm365_vm1, %v12822_v56  ;;  %v7684_v56 = vld [vmem:[%s13735_s1 + $0x30] sm:$0xff] }
 0x58f   :  { %10405 = vmatprep.subr.bf16.mxu1 %v10404_v33 }
 0x591   :  { %10010 = vmatmul.mubr.msk.f32.gmra.mrb[18].mxu1 %vm365_vm1, %v12818_v3  ;;  %v6092_v3 = vsel %vm349_vm8, %v13064_v1, 0.0 }
 0x592   :  { %10012 = vmatprep.mubr.msk.f32.mxu1 %vm365_vm1, %v12840_v46 }
 0x595   :  { %10013 = vmatmul.mubr.msk.f32.gmra.mrb[20].mxu1 %vm365_vm1, %v12838_v7  ;;  %v7685_v7 = vld [vmem:[%s13735_s1 + $0x38] sm:$0xff] }
 0x596   :  { %10015 = vmatprep.mubr.msk.f32.mxu1 %vm365_vm1, %v12859_v35  ;;  %v10428_v46 = vpack.c.bf16 %v7685_v7, %v7684_v56  ;;  %v6093_v35 = vsel %vm14134_vm14, %v13067_v27, 0.0  ;;  %vm14138_vm14 = vcmp.le.s32.totalorder %v11412_v23, 6 }
 0x598   :  { %10429 = vmatprep.subr.bf16.mxu0 %v10428_v46 }
 0x599   :  { %10016 = vmatmul.mubr.msk.f32.gmra.mrb[22].mxu1 %vm365_vm1, %v12855_v45  ;;  %v10408_v45 = vpack.c.bf16 %v8645_v5, %v8644_v34  ;;  %10431 = vmatpush3.bf16.msra.mxu0 %v10428_v46  ;;  %v8660_v5 = vld [vmem:[%s13737_s3 + $0x1a0] sm:$0xff] }
 0x59a   :  { %10018 = vmatprep.mubr.msk.f32.mxu1 %vm365_vm1, %v12881_v13  ;;  %v6095_v13 = vsel %vm14136_vm9, %v13079_v10, 0.0  ;;  %vm14140_vm9 = vcmp.le.s32.totalorder %v13984_v11, 6  ;;  %v14144_v11 = vld [vmem:[#allocation25_spill] sm:$0xff] }
 0x59d   :  { %10019 = vmatmul.mubr.msk.f32.gmra.mrb[24].mxu1 %vm365_vm1, %v12877_v15  ;;  %v6094_v15 = vsel %vm14135_vm11, %v13076_v63, 0.0  ;;  %vm14139_vm11 = vcmp.le.s32.totalorder %v11424_v57, 6 }
 0x59e   :  { %10021 = vmatprep.mubr.msk.f32.mxu1 %vm365_vm1, %v12902_v61  ;;  %v6097_v61 = vsel %vm14138_vm14, %v13091_v59, 0.0  ;;  %vm14142_vm14 = vcmp.le.s32.totalorder %v11229_v18, 6 }
 0x59f   :  { %v6101_v1 = vsel %vm14142_vm14, %v13110_v49, 0.0  ;;  %vm14149_vm14 = vcmp.le.s32.totalorder %v11279_v43, 6 }
 0x5a0   :  { %v6105_v16 = vsel %vm14149_vm14, %v14148_v48, 0.0  ;;  %vm14154_vm14 = vcmp.ge.s32.totalorder %v11343_v32, 1 }
 0x5a1   :  { %10022 = vmatmul.mubr.msk.f32.gmra.mrb[26].mxu1 %vm365_vm1, %v12898_v12  ;;  %v6096_v12 = vsel %vm14137_vm10, %v13088_v50, 0.0  ;;  %vm14141_vm10 = vcmp.le.s32.totalorder %v11614_v8, 6 }
 0x5a2   :  { %10024 = vmatprep.mubr.msk.f32.mxu1 %vm365_vm1, %v12920_v36  ;;  %v13301_v36 = vld [vmem:[#allocation2 + $0x49] sm:$0xff] }
 0x5a5   :  { %10025 = vmatmul.mubr.msk.f32.gmra.mrb[28].mxu1 %vm365_vm1, %v12917_v54  ;;  %v6098_v54 = vsel %vm14139_vm11, %v13100_v28, 0.0  ;;  %vm14143_vm11 = vcmp.le.s32.totalorder %v11231_v19, 6 }
 0x5a6   :  { %10027 = vmatprep.mubr.msk.f32.mxu1 %vm365_vm1, %v12937_v52  ;;  %v6100_v52 = vsel %vm14141_vm10, %v13107_v9, 0.0  ;;  %v6102_v2 = vsel %vm14143_vm11, %v13119_v20, 0.0  ;;  %v14146_v9 = vld [vmem:[#allocation50_spill] sm:$0xff]  ;;  %vm14147_vm10 = vcmp.le.s32.totalorder %v11253_v29, 6  ;;  %vm14151_vm11 = vcmp.le.s32.totalorder %v11281_v44, 6 }
 0x5a7   :  { %v6104_v41 = vsel %vm14147_vm10, %v14146_v9, 0.0  ;;  %v6106_v60 = vsel %vm14151_vm11, %v14150_v30, 0.0  ;;  %vm14153_vm10 = vcmp.ge.s32.totalorder %v11522_v62, 1  ;;  %vm14155_vm11 = vcmp.ge.s32.totalorder %v11335_v22, 1 }
 0x5a8   :  { %v6336_v56 = vsel %vm14153_vm10, %v12974_v0, 0.0  ;;  %v6338_v46 = vsel %vm14155_vm11, %v12987_v53, 0.0  ;;  %v6339_v0 = vsel %vm336_vm13, %v12996_v4, 0.0  ;;  %v6341_v53 = vsel %vm338_vm12, %v13008_v39, 0.0 }
 0x5a9   :  { %10028 = vmatmul.mubr.msk.f32.gmra.mrb[30].mxu1 %vm365_vm1, %v12933_v40  ;;  %v6099_v40 = vsel %vm14140_vm9, %v13301_v36, 0.0  ;;  %vm14145_vm9 = vcmp.le.s32.totalorder %v11245_v26, 6  ;;  %v14157_v4 = vmov 0.0   ;;  %v6345_v39 = vsel %vm342_vm2, %v13027_v25, 0.0 }
 0x5aa   :  { %10034 = vmatprep.mubr.msk.f32.mxu1 %vm365_vm1, %v6092_v3  ;;  %v6103_v24 = vsel %vm14145_vm9, %v14144_v11, 0.0  ;;  %vm14152_vm9 = vcmp.le.s32.totalorder %v13986_v42, 6  ;;  %v8661_v3 = vld [vmem:[%s13737_s3 + $0x1a8] sm:$0xff]  ;;  %v6337_v42 = vsel %vm14154_vm14, %v12983_v14, 0.0  ;;  %v6349_v25 = vsel %vm346_vm6, %v13051_v38, 0.0  ;;  %v14161_v38 = vld [vmem:[#allocation54_spill] sm:$0xff] }
 0x5ab   :  { %v10412_v7 = vpack.c.bf16 %v8661_v3, %v8660_v5  ;;  %vm14171_vm2 = vcmp.le.s32.totalorder %v11335_v22, 6  ;;  %vm14175_vm6 = vcmp.le.s32.totalorder %v11424_v57, 6  ;;  %vm14178_vm12 = vcmp.le.s32.totalorder %v11231_v19, 6 }
 0x5ac   :  { %v6830_v22 = vsel %vm14175_vm6, %v13301_v36, 0.0  ;;  %v6834_v57 = vsel %vm14178_vm12, %v14144_v11, 0.0  ;;  %vm14179_vm13 = vcmp.le.s32.totalorder %v11245_v26, 6  ;;  %vm14181_vm10 = vcmp.le.s32.totalorder %v11279_v43, 6  ;;  %v8677_v26 = vld [vmem:[%s13738_s4 + $0x2] ss:$0 sm:$0xff] }
 0x5ad   :  { %10035 = vmatmul.mubr.msk.f32.vlgmr.msra.gmra.mrb[16].mxu1 %vm365_vm1, %v6093_v35  ;;  %v6347_v35 = vsel %vm344_vm4, %v13039_v37, 0.0  ;;  %v14158_v37 = vld [vmem:[#allocation34_spill] sm:$0xff]  ;;  %vm14173_vm4 = vcmp.le.s32.totalorder %v11366_v58, 6  ;;  %vm14182_vm14 = vcmp.le.s32.totalorder %v11281_v44, 6  ;;  %vm14183_vm11 = vcmask 523264  }
 0x5ae   :  { %10407 = vmatpush3.bf16.msra.mxu1 %v10404_v33  ;;  %10037 = vmatprep.mubr.msk.f32.mxu1 %vm365_vm1, %v6094_v15  ;;  %v13335_v33 = vld [vmem:[#allocation2 + $0x89] sm:$0xff]  ;;  %v14160_v15 = vld [vmem:[#allocation53_spill] sm:$0xff]  ;;  %v6828_v62 = vsel %vm14173_vm4, %v13091_v59, 0.0 }
 0x5af   :  { %10409 = vmatprep.subr.bf16.mxu1 %v10408_v45  ;;  %v6107_v34 = vsel %vm14152_vm9, %v13335_v33, 0.0  ;;  %vm14156_vm9 = vcmp.ge.s32.totalorder %v11366_v58, 1  ;;  %v6838_v19 = vsel %vm14182_vm14, %v13335_v33, 0.0 }
 0x5b0   :  { %v6340_v14 = vsel %vm14156_vm9, %v12999_v47, 0.0  ;;  %v6344_v47 = vsel %vm341_vm15, %v13018_v6, 0.0  ;;  %v6348_v6 = vsel %vm345_vm5, %v13042_v51, 0.0  ;;  %v14159_v51 = vld [vmem:[#allocation26_spill] sm:$0xff]  ;;  %vm14174_vm5 = vcmp.le.s32.totalorder %v11412_v23, 6  ;;  %vm14184_vm9 = vmmov %vm14183_vm11 }
 0x5b1   :  { %10038 = vmatmul.mubr.msk.f32.gmra.mrb[18].mxu1 %vm365_vm1, %v6095_v13  ;;  %v14162_v13 = vld [vmem:[#allocation33_spill] sm:$0xff]  ;;  %v6835_v23 = vsel %vm14179_vm13, %v14146_v9, 0.0  ;;  %vm14180_vm15 = vcmp.le.s32.totalorder %v11253_v29, 6 }
 0x5b2   :  { %10040 = vmatprep.mubr.msk.f32.mxu1 %vm365_vm1, %v6096_v12  ;;  %v6570_v12 = vld [vmem:[#allocation2 + $0x48] sm:$0xff] }
 0x5b5   :  { %10041 = vmatmul.mubr.msk.f32.gmra.mrb[20].mxu1 %vm365_vm1, %v6097_v61  ;;  %v14164_v61 = vld [vmem:[#allocation38_spill] sm:$0xff] }
 0x5b6   :  { %10043 = vmatprep.mubr.msk.f32.mxu1 %vm365_vm1, %v6098_v54  ;;  %v14165_v54 = vld [vmem:[#allocation41_spill] sm:$0xff] }
 0x5b9   :  { %10044 = vmatmul.mubr.msk.f32.gmra.mrb[22].mxu1 %vm365_vm1, %v6099_v40  ;;  %v14166_v40 = vld [vmem:[#allocation45_spill] sm:$0xff] }
 0x5ba   :  { %10046 = vmatprep.mubr.msk.f32.mxu1 %vm365_vm1, %v6100_v52  ;;  %v14167_v52 = vld [vmem:[#allocation47_spill] sm:$0xff] }
 0x5bd   :  { %10047 = vmatmul.mubr.msk.f32.gmra.mrb[24].mxu1 %vm365_vm1, %v6101_v1  ;;  %v14168_v1 = vld [vmem:[#allocation49_spill] sm:$0xff] }
 0x5be   :  { %10049 = vmatprep.mubr.msk.f32.mxu1 %vm365_vm1, %v6102_v2  ;;  %v14169_v2 = vld [vmem:[#allocation29_spill] sm:$0xff] }
 0x5c1   :  { %10050 = vmatmul.mubr.msk.f32.gmra.mrb[26].mxu1 %vm365_vm1, %v6103_v24  ;;  %v6578_v24 = vld [vmem:[#allocation2 + $0x88] sm:$0xff] }
 0x5c2   :  { %10052 = vmatprep.mubr.msk.f32.mxu1 %vm365_vm1, %v6104_v41  ;;  %v6824_v41 = vsel %vm349_vm8, %v13067_v27, 0.0  ;;  %vm14177_vm8 = vcmp.le.s32.totalorder %v11229_v18, 6  ;;  %v6837_v18 = vsel %vm14181_vm10, %v14150_v30, 0.0 }
 0x5c5   :  { %10053 = vmatmul.mubr.msk.f32.gmra.mrb[28].mxu1 %vm365_vm1, %v6105_v16 }
 0x5c6   :  { %10055 = vmatprep.mubr.msk.f32.mxu1 %vm365_vm1, %v6106_v60  ;;  %v6826_v60 = vsel %vm14171_vm2, %v13079_v10, 0.0 }
 0x5c9   :  { %10056 = vmatmul.mubr.msk.f32.gmra.mrb[30].mxu1 %vm365_vm1, %v6107_v34 }
 0x5ca   :  { %10062 = vmatprep.mubr.msk.f32.mxu1 %vm365_vm1, %v6336_v56 }
 0x5cd   :  { %10063 = vmatmul.mubr.msk.f32.vlgmr.msra.gmra.mrb[16].mxu1 %vm365_vm1, %v6337_v42 }
 0x5ce   :  { %10411 = vmatpush3.bf16.msra.mxu1 %v10408_v45  ;;  %10065 = vmatprep.mubr.msk.f32.mxu1 %vm365_vm1, %v6338_v46  ;;  %v6342_v45 = vsel %vm339_vm0, %v13183_v55, 0.0  ;;  %v6346_v55 = vsel %vm343_vm3, %v13030_v17, 0.0  ;;  %v6350_v17 = vsel %vm347_vm7, %v13217_v31, 0.0  ;;  %v14163_v31 = vld [vmem:[#allocation36_spill] sm:$0xff]  ;;  %vm14170_vm0 = vcmp.le.s32.totalorder %v11343_v32, 6 }
 0x5cf   :  { %10413 = vmatprep.subr.bf16.mxu1 %v10412_v7  ;;  %v6825_v16 = vsel %vm14170_vm0, %v13076_v63, 0.0  ;;  %vm14172_vm3 = vcmp.le.s32.totalorder %v11378_v21, 6  ;;  %v6829_v32 = vsel %vm14174_vm5, %v13100_v28, 0.0  ;;  %vm14176_vm7 = vcmp.le.s32.totalorder %v11614_v8, 6  ;;  %vm14185_vm0 = vmmov %vm14184_vm9 }
 0x5d0   :  { %v6827_v34 = vsel %vm14172_vm3, %v13088_v50, 0.0  ;;  %v6832_v58 = vsel %vm14176_vm7, %v13110_v49, 0.0  ;;  %v6833_v21 = vsel %vm14177_vm8, %v13119_v20, 0.0  ;;  %v6836_v8 = vsel %vm14180_vm15, %v14148_v48, 0.0  ;;  %vm14186_vm2 = vmmov %vm14185_vm0 }
 0x5d1   :  { %10066 = vmatmul.mubr.msk.f32.gmra.mrb[18].mxu1 %vm365_vm1, %v6339_v0  ;;  %vm14187_vm3 = vmmov %vm14185_vm0 }
 0x5d2   :  { %10068 = vmatprep.mubr.msk.f32.mxu1 %vm365_vm1, %v6340_v14  ;;  %vm14188_vm4 = vmmov %vm14185_vm0 }
 0x5d3   :  { %vm14189_vm5 = vmmov %vm14185_vm0 }
 0x5d4   :  { %vm14190_vm6 = vmmov %vm14185_vm0 }
 0x5d5   :  { %10069 = vmatmul.mubr.msk.f32.gmra.mrb[20].mxu1 %vm365_vm1, %v6341_v53  ;;  %vm14191_vm7 = vmmov %vm14185_vm0 }
 0x5d6   :  { %10071 = vmatprep.mubr.msk.f32.mxu1 %vm365_vm1, %v6342_v45  ;;  %vm14192_vm8 = vmmov %vm14185_vm0 }
 0x5d7   :  { %vm14193_vm12 = vmmov %vm14185_vm0 }
 0x5d8   :  { %vm14194_vm13 = vmmov %vm14185_vm0 }
 0x5d9   :  { %10072 = vmatmul.mubr.f32.gmra.mrb[22].mxu1 %v14157_v4  ;;  %vm14195_vm15 = vmmov %vm14185_vm0 }
 0x5da   :  { %10074 = vmatprep.mubr.msk.f32.mxu1 %vm365_vm1, %v6344_v47  ;;  %vm14196_vm10 = vmmov %vm14185_vm0 }
 0x5db   :  { %vm14197_vm14 = vmmov %vm14185_vm0 }
 0x5dd   :  { %10075 = vmatmul.mubr.msk.f32.gmra.mrb[24].mxu1 %vm365_vm1, %v6345_v39 }
 0x5de   :  { %10077 = vmatprep.mubr.msk.f32.mxu1 %vm365_vm1, %v6346_v55 }
 0x5e1   :  { %10078 = vmatmul.mubr.msk.f32.gmra.mrb[26].mxu1 %vm365_vm1, %v6347_v35 }
 0x5e2   :  { %10080 = vmatprep.mubr.msk.f32.mxu1 %vm365_vm1, %v6348_v6 }
 0x5e5   :  { %10081 = vmatmul.mubr.msk.f32.gmra.mrb[28].mxu1 %vm365_vm1, %v6349_v25  ;;  %v7939_v25 = vld [vmem:[%s13739_s5] sm:$0xff] }
 0x5e6   :  { %10083 = vmatprep.mubr.msk.f32.mxu1 %vm365_vm1, %v6350_v17  ;;  %v7940_v17 = vld [vmem:[%s13739_s5 + $0x8] sm:$0xff] }
 0x5e9   :  { %10084 = vmatmul.mubr.f32.gmra.mrb[30].mxu1 %v14157_v4 }
 0x5ea   :  { %10090 = vmatprep.mubr.msk.f32.mxu1 %vm365_vm1, %v14158_v37  ;;  %v7941_v37 = vld [vmem:[%s13739_s5 + $0x10] sm:$0xff] }
 0x5ed   :  { %10091 = vmatmul.mubr.msk.f32.vlgmr.msra.gmra.mrb[16].mxu1 %vm365_vm1, %v14159_v51  ;;  %v10962_v51 = vmov 0.0|0.0  }
 0x5ee   :  { %10415 = vmatpush3.bf16.msra.mxu1 %v10412_v7  ;;  %10093 = vmatprep.mubr.msk.f32.mxu1 %vm365_vm1, %v14160_v15  ;;  %v10433_v15 = vpack.c.bf16 %v7940_v17, %v7939_v25 }
 0x5ef   :  { %10432 = vmatprep.subr.bf16.mxu0 %v10962_v51 }
 0x5f1   :  { %10094 = vmatmul.mubr.msk.f32.gmra.mrb[18].mxu1 %vm365_vm1, %v14161_v38  ;;  %v7942_v38 = vld [vmem:[%s13739_s5 + $0x18] sm:$0xff] }
 0x5f2   :  { %10096 = vmatprep.mubr.msk.f32.mxu1 %vm365_vm1, %v14162_v13  ;;  %v10436_v13 = vpack.c.bf16 %v7942_v38, %v7941_v37 }
 0x5f5   :  { %10097 = vmatmul.mubr.msk.f32.gmra.mrb[20].mxu1 %vm365_vm1, %v14163_v31  ;;  %v7943_v31 = vld [vmem:[%s13739_s5 + $0x20] sm:$0xff] }
 0x5f6   :  { %10099 = vmatprep.mubr.msk.f32.mxu1 %vm365_vm1, %v6570_v12  ;;  %v7944_v12 = vld [vmem:[%s13739_s5 + $0x28] sm:$0xff] }
 0x5f9   :  { %10100 = vmatmul.mubr.f32.gmra.mrb[22].mxu1 %v14157_v4 }
 0x5fa   :  { %10102 = vmatprep.mubr.msk.f32.mxu1 %vm365_vm1, %v14164_v61  ;;  %v7945_v61 = vld [vmem:[%s13739_s5 + $0x30] sm:$0xff] }
 0x5fd   :  { %10103 = vmatmul.mubr.msk.f32.gmra.mrb[24].mxu1 %vm365_vm1, %v14165_v54  ;;  %v10439_v54 = vpack.c.bf16 %v7944_v12, %v7943_v31 }
 0x5fe   :  { %10105 = vmatprep.mubr.msk.f32.mxu1 %vm365_vm1, %v14166_v40  ;;  %v7946_v40 = vld [vmem:[%s13739_s5 + $0x38] sm:$0xff]  ;;  %s10965_s5 = smov [#allocation3]  }
 0x5ff   :  { %s8197_s14 = sshll.u32 %s10965_s5, 4  ;;  %s8198_s14 = int_to_ptr.vmem [resolvable:$true] %s8197_s14 }
 0x600   :  { %p10940_p1 = scmp.lt.s32.totalorder %s8198_s14, %s8198_s14 }
 0x601   :  { %10106 = vmatmul.mubr.msk.f32.gmra.mrb[26].mxu1 %vm365_vm1, %v14167_v52  ;;  %v10442_v52 = vpack.c.bf16 %v7946_v40, %v7945_v61 }
 0x602   :  { %10108 = vmatprep.mubr.msk.f32.mxu1 %vm365_vm1, %v14168_v1  ;;  %v8678_v1 = vld [vmem:[%s13736_s2] ss:$0 sm:$0xff] }
 0x605   :  { %10109 = vmatmul.mubr.msk.f32.gmra.mrb[28].mxu1 %vm365_vm1, %v14169_v2 }
 0x606   :  { %10111 = vmatprep.mubr.msk.f32.mxu1 %vm365_vm1, %v6578_v24 }
 0x609   :  { %10112 = vmatmul.mubr.f32.gmra.mrb[30].mxu1 %v14157_v4 }
 0x60a   :  { %10118 = vmatprep.mubr.msk.f32.mxu1 %vm365_vm1, %v6824_v41 }
 0x60d   :  { %10119 = vmatmul.mubr.msk.f32.vlgmr.msra.gmra.mrb[16].mxu1 %vm365_vm1, %v6825_v16 }
 0x60e   :  { %10121 = vmatprep.mubr.msk.f32.mxu1 %vm365_vm1, %v6826_v60 }
 0x611   :  { %10122 = vmatmul.mubr.msk.f32.gmra.mrb[18].mxu1 %vm365_vm1, %v6827_v34 }
 0x612   :  { %10124 = vmatprep.mubr.msk.f32.mxu1 %vm365_vm1, %v6828_v62 }
 0x615   :  { %10125 = vmatmul.mubr.msk.f32.gmra.mrb[20].mxu1 %vm365_vm1, %v6829_v32 }
 0x616   :  { %10127 = vmatprep.mubr.msk.f32.mxu1 %vm365_vm1, %v6830_v22 }
 0x619   :  { %10128 = vmatmul.mubr.f32.gmra.mrb[22].mxu1 %v14157_v4 }
 0x61a   :  { %10130 = vmatprep.mubr.msk.f32.mxu1 %vm365_vm1, %v6832_v58 }
 0x61d   :  { %10131 = vmatmul.mubr.msk.f32.gmra.mrb[24].mxu1 %vm365_vm1, %v6833_v21 }
 0x61e   :  { %10133 = vmatprep.mubr.msk.f32.mxu1 %vm365_vm1, %v6834_v57 }
 0x621   :  { %10134 = vmatmul.mubr.msk.f32.gmra.mrb[26].mxu1 %vm365_vm1, %v6835_v23 }
 0x622   :  { %10136 = vmatprep.mubr.msk.f32.mxu1 %vm365_vm1, %v6836_v8 }
 0x625   :  { %10137 = vmatmul.mubr.msk.f32.gmra.mrb[28].mxu1 %vm365_vm1, %v6837_v18 }
 0x626   :  { %10139 = vmatprep.mubr.msk.f32.mxu1 %vm365_vm1, %v6838_v19 }
 0x629   :  { %10140 = vmatmul.mubr.f32.gmra.mrb[30].mxu1 %v14157_v4 }
 0x6e0   :  { %v10120_v29 = vpop.f32.mrb[16].mxu1 }
 0x6e1   :  { %v6957_v20 = vpop.f32.mrb[17].mxu1  ;;  %v7061_v28 = vadd.f32 %v10120_v29, %v8677_v26 }
 0x6e2   :  { %v7060_v49 = vadd.f32 %v8677_v26, %v6957_v20 }
 0x6e4   :  { %v10123_v43 = vpop.f32.mrb[18].mxu1  ;;  %10230 = vmatprep.mubr.msk.f32.mxu0 %vm365_vm1, %v7060_v49 }
 0x6e5   :  { %v6967_v63 = vpop.f32.mrb[19].mxu1  ;;  %10231 = vmatmul.mubr.msk.f32.vlgmr.msra.gmra.mrb[48].mxu0 %vm365_vm1, %v7061_v28  ;;  %v7063_v27 = vadd.f32 %v10123_v43, %v8677_v26 }
 0x6e6   :  { %v7062_v44 = vadd.f32 %v8677_v26, %v6967_v63  ;;  %10434 = vmatpush3.bf16.msra.mxu0 %v10433_v15 }
 0x6e7   :  { %10435 = vmatprep.subr.bf16.mxu0 %v10962_v51 }
 0x6e8   :  { %v10126_v10 = vpop.f32.mrb[20].mxu1  ;;  %10233 = vmatprep.mubr.msk.f32.mxu0 %vm365_vm1, %v7062_v44 }
 0x6e9   :  { %v6977_v50 = vpop.f32.mrb[21].mxu1  ;;  %10234 = vmatmul.mubr.msk.f32.gmra.mrb[50].mxu0 %vm365_vm1, %v7063_v27  ;;  %v7065_v36 = vadd.f32 %v10126_v10, %v8677_v26 }
 0x6ea   :  { %v7064_v59 = vadd.f32 %v8677_v26, %v6977_v50  ;;  %10437 = vmatpush3.bf16.msra.mxu0 %v10436_v13 }
 0x6eb   :  { %10438 = vmatprep.subr.bf16.mxu0 %v10962_v51 }
 0x6ec   :  { %v10129_v11 = vpop.f32.mrb[22].mxu1  ;;  %10236 = vmatprep.mubr.msk.f32.mxu0 %vm365_vm1, %v7064_v59 }
 0x6ed   :  { %v6987_v9 = vpop.f32.mrb[23].mxu1  ;;  %10237 = vmatmul.mubr.msk.f32.gmra.mrb[52].mxu0 %vm365_vm1, %v7065_v36  ;;  %v7067_v30 = vadd.f32 %v10129_v11, %v8677_v26 }
 0x6ee   :  { %v7066_v48 = vadd.f32 %v8677_v26, %v6987_v9  ;;  %10440 = vmatpush3.bf16.msra.mxu0 %v10439_v54 }
 0x6ef   :  { %10441 = vmatprep.subr.bf16.mxu0 %v10962_v51 }
 0x6f0   :  { %v10132_v33 = vpop.f32.mrb[24].mxu1  ;;  %10239 = vmatprep.mubr.msk.f32.mxu0 %vm365_vm1, %v7066_v48 }
 0x6f1   :  { %v6997_v5 = vpop.f32.mrb[25].mxu1  ;;  %10240 = vmatmul.mubr.msk.f32.gmra.mrb[54].mxu0 %vm365_vm1, %v7067_v30  ;;  %v7069_v56 = vadd.f32 %v10132_v33, %v8677_v26 }
 0x6f2   :  { %v7068_v3 = vadd.f32 %v8677_v26, %v6997_v5  ;;  %10443 = vmatpush3.bf16.msra.mxu0 %v10442_v52 }
 0x6f3   :  { %10444 = vmatprep.subr.bf16.mxu0 %v10962_v51 }
 0x6f4   :  { %v10135_v7 = vpop.f32.mrb[26].mxu1  ;;  %10242 = vmatprep.mubr.msk.f32.mxu0 %vm365_vm1, %v7068_v3 }
 0x6f5   :  { %v7007_v42 = vpop.f32.mrb[27].mxu1  ;;  %10243 = vmatmul.mubr.msk.f32.gmra.mrb[56].mxu0 %vm365_vm1, %v7069_v56  ;;  %v7071_v0 = vadd.f32 %v10135_v7, %v8677_v26 }
 0x6f6   :  { %v7070_v46 = vadd.f32 %v8677_v26, %v7007_v42 }
 0x6f8   :  { %v10138_v14 = vpop.f32.mrb[28].mxu1  ;;  %10245 = vmatprep.mubr.msk.f32.mxu0 %vm365_vm1, %v7070_v46 }
 0x6f9   :  { %v7017_v53 = vpop.f32.mrb[29].mxu1  ;;  %10246 = vmatmul.mubr.msk.f32.gmra.mrb[58].mxu0 %vm365_vm1, %v7071_v0  ;;  %v7073_v47 = vadd.f32 %v10138_v14, %v8677_v26 }
 0x6fa   :  { %v7072_v45 = vadd.f32 %v8677_v26, %v7017_v53 }
 0x6fc   :  { %v10141_v39 = vpop.f32.mrb[30].mxu1  ;;  %10248 = vmatprep.mubr.msk.f32.mxu0 %vm365_vm1, %v7072_v45 }
 0x6fd   :  { %v7027_v55 = vpop.f32.mrb[31].mxu1  ;;  %10249 = vmatmul.mubr.msk.f32.gmra.mrb[60].mxu0 %vm365_vm1, %v7073_v47  ;;  %v7075_v6 = vadd.f32 %v10141_v39, %v8677_v26 }
 0x6fe   :  { %v7074_v35 = vadd.f32 %v8677_v26, %v7027_v55 }
 0x700   :  { %10251 = vmatprep.mubr.msk.f32.mxu0 %vm365_vm1, %v7074_v35 }
 0x701   :  { %10252 = vmatmul.mubr.msk.f32.gmra.mrb[62].mxu0 %vm365_vm1, %v7075_v6  ;;  %vm10963_vm1 = vmmov 0  }
 0x702   :  { %10270 = vmatprep.mubr.msk.f32.mxu0 %vm10963_vm1, %v14157_v4 }
 0x7b8   :  { %v10232_v2 = vpop.f32.mrb[48].mxu0 }
 0x7b9   :  { %v13545_v24 = vadd.f32 %v10232_v2, %v8678_v1  ;;  %v7800_v41 = vpop.f32.mrb[49].mxu0 }
 0x7ba   :  { %v13547_v16 = vadd.f32 %v8678_v1, %v7800_v41 }
 0x7bb   :  { %v7896_v60 = vsel %vm14183_vm11, %v13545_v24, 0.0  ;;  %vm14198_vm11 = vmmov %vm14185_vm0 }
 0x7bc   :  { %v7895_v34 = vsel %vm14184_vm9, %v13547_v16, 0.0  ;;  %v10235_v62 = vpop.f32.mrb[50].mxu0  ;;  %vm7949_vm9 = vcmask 1041409  }
 0x7bd   :  { %v7810_v32 = vpop.f32.mrb[51].mxu0  ;;  %v13553_v22 = vadd.f32 %v10235_v62, %v8678_v1  ;;  %v7897_v21 = vadd.f32 %v7896_v60, %v7895_v34 }
 0x7be   :  { %v13555_v58 = vadd.f32 %v8678_v1, %v7810_v32 }
 0x7bf   :  { %v7900_v19 = vsel %vm14186_vm2, %v13553_v22, 0.0  ;;  %vm14201_vm2 = vmmov %vm14185_vm0 }
 0x7c0   :  { %v7898_v57 = vsel %vm14185_vm0, %v13555_v58, 0.0  ;;  %v10238_v23 = vpop.f32.mrb[52].mxu0 }
 0x7c1   :  { %v7899_v8 = vadd.f32 %v7898_v57, %v7897_v21  ;;  %v7820_v18 = vpop.f32.mrb[53].mxu0  ;;  %v13561_v26 = vadd.f32 %v10238_v23, %v8678_v1 }
 0x7c2   :  { %v13563_v29 = vadd.f32 %v8678_v1, %v7820_v18 }
 0x7c3   :  { %v7901_v20 = vadd.f32 %v7900_v19, %v7899_v8  ;;  %v7904_v44 = vsel %vm14188_vm4, %v13561_v26, 0.0  ;;  %vm14203_vm4 = vmmov %vm14185_vm0 }
 0x7c4   :  { %v7902_v49 = vsel %vm14187_vm3, %v13563_v29, 0.0  ;;  %v10241_v28 = vpop.f32.mrb[54].mxu0  ;;  %vm14202_vm3 = vmmov %vm14185_vm0 }
 0x7c5   :  { %v7903_v43 = vadd.f32 %v7902_v49, %v7901_v20  ;;  %v7830_v63 = vpop.f32.mrb[55].mxu0  ;;  %v13571_v50 = vadd.f32 %v10241_v28, %v8678_v1  ;;  %v8025_v20 = vld [vmem:[%s13740_s6 + $0x8] sm:$0xff] }
 0x7c6   :  { %v13569_v27 = vadd.f32 %v8678_v1, %v7830_v63 }
 0x7c7   :  { %v7905_v10 = vadd.f32 %v7904_v44, %v7903_v43  ;;  %v7908_v33 = vsel %vm14190_vm6, %v13571_v50, 0.0  ;;  %v8026_v44 = vld [vmem:[%s13740_s6 + $0x10] sm:$0xff]  ;;  %vm14205_vm6 = vmmov %vm14185_vm0 }
 0x7c8   :  { %v7906_v59 = vsel %vm14189_vm5, %v13569_v27, 0.0  ;;  %v10244_v36 = vpop.f32.mrb[56].mxu0  ;;  %vm14204_vm5 = vmmov %vm14185_vm0 }
 0x7c9   :  { %v7907_v11 = vadd.f32 %v7906_v59, %v7905_v10  ;;  %v13575_v9 = vadd.f32 %v10244_v36, %v8678_v1  ;;  %v7840_v48 = vpop.f32.mrb[57].mxu0  ;;  %v8027_v10 = vld [vmem:[%s13740_s6 + $0x18] sm:$0xff] }
 0x7ca   :  { %v13577_v30 = vadd.f32 %v8678_v1, %v7840_v48  ;;  %v10448_v36 = vpack.c.bf16 %v8027_v10, %v8026_v44  ;;  %v8029_v48 = vld [vmem:[%s13740_s6 + $0x28] sm:$0xff] }
 0x7cb   :  { %v7917_v5 = vsel %vm14191_vm7, %v13575_v9, 0.0  ;;  %v7909_v7 = vadd.f32 %v7908_v33, %v7907_v11  ;;  %v8028_v11 = vld [vmem:[%s13740_s6 + $0x20] sm:$0xff]  ;;  %v10928_v10 = vld [vmem:[%s13734_s0 + $0x48] sm:$0xff]  ;;  %vm14206_vm7 = vmmov %vm14185_vm0 }
 0x7cc   :  { %v7916_v3 = vsel %vm14192_vm8, %v13577_v30, 0.0  ;;  %v10247_v56 = vpop.f32.mrb[58].mxu0  ;;  %v10451_v33 = vpack.c.bf16 %v8029_v48, %v8028_v11  ;;  %v10930_v48 = vld [vmem:[%s13734_s0 + $0x58] sm:$0xff]  ;;  %vm14207_vm8 = vmmov %vm14185_vm0 }
 0x7cd   :  { %v7850_v42 = vpop.f32.mrb[59].mxu0  ;;  %v13585_v46 = vadd.f32 %v10247_v56, %v8678_v1  ;;  %v7918_v14 = vadd.f32 %v7917_v5, %v7916_v3  ;;  %v7910_v47 = vrot.slane %v7909_v7, 4  ;;  %v8031_v5 = vld [vmem:[%s13740_s6 + $0x38] sm:$0xff] }
 0x7ce   :  { %v13587_v0 = vadd.f32 %v8678_v1, %v7850_v42 }
 0x7cf   :  { %v7921_v35 = vsel %vm14194_vm13, %v13585_v46, 0.0  ;;  %v7911_v38 = vadd.f32 %v7910_v47, %v7909_v7  ;;  %vm14209_vm13 = vmmov %vm14185_vm0 }
 0x7d0   :  { %v7919_v53 = vsel %vm14193_vm12, %v13587_v0, 0.0  ;;  %v10250_v45 = vpop.f32.mrb[60].mxu0  ;;  %vm14208_vm12 = vmmov %vm14185_vm0 }
 0x7d1   :  { %v7920_v39 = vadd.f32 %v7919_v53, %v7918_v14  ;;  %v7860_v55 = vpop.f32.mrb[61].mxu0  ;;  %v13593_v6 = vadd.f32 %v10250_v45, %v8678_v1  ;;  %v7912_v2 = vrot.slane %v7911_v38, 2 }
 0x7d2   :  { %v13595_v25 = vadd.f32 %v8678_v1, %v7860_v55 }
 0x7d3   :  { %v7922_v17 = vadd.f32 %v7921_v35, %v7920_v39  ;;  %v7925_v12 = vsel %vm14196_vm10, %v13593_v6, 0.0  ;;  %v7913_v62 = vadd.f32 %v7912_v2, %v7911_v38  ;;  %v10964_v39 = vmov 1966171168   ;;  %vm14211_vm10 = vmmov %vm14185_vm0 }
 0x7d4   :  { %v7923_v37 = vsel %vm14195_vm15, %v13595_v25, 0.0  ;;  %v10253_v15 = vpop.f32.mrb[62].mxu0  ;;  %v8113_v55 = vunpack.c.l.s4 %v10964_v39  ;;  %vm14210_vm15 = vmmov %vm14185_vm0 }
 0x7d5   :  { %v7924_v13 = vadd.f32 %v7923_v37, %v7922_v17  ;;  %v7870_v31 = vpop.f32.mrb[63].mxu0  ;;  %v13601_v61 = vadd.f32 %v10253_v15, %v8678_v1  ;;  %v7914_v57 = vrot.slane %v7913_v62, 1  ;;  %v14200_v17 = vld [vmem:[#allocation22_spill] sm:$0xff] }
 0x7d6   :  { %v13603_v54 = vadd.f32 %v8678_v1, %v7870_v31  ;;  %v8024_v1 = vld [vmem:[%s13740_s6] sm:$0xff]  ;;  %v8114_v35 = vunpack.c.0.s8 %v8113_v55 }
 0x7d7   :  { %v7926_v40 = vadd.f32 %v7925_v12, %v7924_v13  ;;  %v7929_v60 = vsel %vm14198_vm11, %v13601_v61, 0.0  ;;  %v7915_v18 = vadd.f32 %v7914_v57, %v7913_v62  ;;  %v10445_v63 = vpack.c.bf16 %v8025_v20, %v8024_v1  ;;  %v10925_v20 = vld [vmem:[%s13734_s0 + $0x30] sm:$0xff]  ;;  %vm14213_vm11 = vmmov %vm14185_vm0 }
 0x7d8   :  { %v7927_v52 = vsel %vm14197_vm14, %v13603_v54, 0.0  ;;  %v8117_v37 = vsub.s32 %v8114_v35, %v14200_v17  ;;  %v8136_v13 = vsub.s32 0, %v14200_v17  ;;  %vm14212_vm14 = vmmov %vm14185_vm0 }
 0x7d9   :  { %v7928_v41 = vadd.f32 %v7927_v52, %v7926_v40  ;;  %v7937_v28 = vmul.f32 0.015625, %v7915_v18 }
 0x7db   :  { %v7930_v34 = vadd.f32 %v7929_v60, %v7928_v41 }
 0x7dd   :  { %v7931_v32 = vrot.slane %v7930_v34, 4 }
 0x7df   :  { %v7932_v21 = vadd.f32 %v7931_v32, %v7930_v34 }
 0x7e1   :  { %v7933_v23 = vrot.slane %v7932_v21, 2 }
 0x7e3   :  { %v7934_v8 = vadd.f32 %v7933_v23, %v7932_v21 }
 0x7e5   :  { %v7935_v19 = vrot.slane %v7934_v8, 1 }
 0x7e7   :  { %v7936_v49 = vadd.f32 %v7935_v19, %v7934_v8  ;;  %v10924_v19 = vld [vmem:[%s13734_s0 + $0x28] sm:$0xff] }
 0x7e9   :  { %v7938_v43 = vmul.f32 0.015625, %v7936_v49 }
 0x7eb   :  { %v7950_v59 = vsel %vm7949_vm9, %v7938_v43, %v7937_v28  ;;  %v10926_v28 = vld [vmem:[%s13734_s0 + $0x38] sm:$0xff]  ;;  %vm14214_vm9 = vmmov %vm14185_vm0 }
 0x7ec   :  { %10271 = vmatmul.mubr.msk.f32.vlgmr.msra.gmra.mrb[64].mxu0 %vm14185_vm0, %v7950_v59 }
 0x7ed   :  { %10446 = vmatpush3.bf16.msra.mxu0 %v10445_v63  ;;  %10289 = vmatprep.mubr.msk.f32.mxu0 %vm10963_vm1, %v14157_v4  ;;  %v8030_v4 = vld [vmem:[%s13740_s6 + $0x30] sm:$0xff]  ;;  %vm14199_vm1 = vmmov %vm14185_vm0  ;;  %v10927_v63 = vld [vmem:[%s13734_s0 + $0x40] sm:$0xff] }
 0x7ee   :  { %10447 = vmatprep.subr.bf16.mxu0 %v10962_v51  ;;  %v10454_v3 = vpack.c.bf16 %v8031_v5, %v8030_v4  ;;  %v10931_v4 = vld [vmem:[%s13734_s0 + $0x60] sm:$0xff] }
 0x7f1   :  { %10449 = vmatpush3.bf16.msra.mxu0 %v10448_v36  ;;  %v10929_v36 = vld [vmem:[%s13734_s0 + $0x50] sm:$0xff] }
 0x7f2   :  { %10450 = vmatprep.subr.bf16.mxu0 %v10962_v51 }
 0x7f5   :  { %10452 = vmatpush3.bf16.msra.mxu0 %v10451_v33 }
 0x7f6   :  { %10453 = vmatprep.subr.bf16.mxu0 %v10962_v51 }
 0x7f9   :  { %10455 = vmatpush3.bf16.msra.mxu0 %v10454_v3  ;;  %v10932_v3 = vld [vmem:[%s13734_s0 + $0x68] sm:$0xff] }
 0x8bf   :  { %v8019_v56 = vpop.f32.mrb[64].mxu0 }
 0x8c0   :  { %v8023_v7 = vmax.f32 %v8019_v56, 0.0  ;;  %v10272_v42 = vpop.f32.mrb[65].mxu0 }
 0x8c2   :  { %10290 = vmatmul.mubr.msk.f32.vlgmr.msra.gmra.mrb[66].mxu0 %vm14199_vm1, %v8023_v7  ;;  %v10933_v7 = vld [vmem:[%s13734_s0 + $0x70] sm:$0xff]  ;;  %vm14215_vm1 = vmmov %vm14185_vm0 }
 0x995   :  { %v8101_v14 = vpop.f32.mrb[66].mxu0 }
 0x996   :  { %v8745_v53 = vmul.f32 -1.442695, %v8101_v14  ;;  %v10291_v45 = vpop.f32.mrb[67].mxu0  ;;  %v10934_v14 = vld [vmem:[%s13734_s0 + $0x78] sm:$0xff] }
 0x998   :  { %10915 = vpow2.f32 %v8745_v53 }
 0x9a2   :  { %v10916_v51 = vpop.eup %10915 }
 0x9a3   :  { %v8108_v47 = vadd.f32 1.0, %v10916_v51 }
 0x9a5   :  { %10917 = vrcp.f32 %v8108_v47 }
 0x9af   :  { %v10918_v15 = vpop.eup %10917 }
 0x9b0   :  { %v8118_v38 = vrot.slane %v10918_v15, %v8117_v37 }
 0x9b2   :  { %v8119_v31 = vcombine.high %v8118_v38, %v8118_v38  ;;  %v8126_v12 = vrot.slane %v8118_v38, %v8117_v37 }
 0x9b4   :  { %v8133_v40 = vrot.slane %v8119_v31, %v8117_v37  ;;  %v8137_v52 = vrot.slane %v8126_v12, %v8136_v13 }
 0x9b6   :  { %v8141_v2 = vrot.slane %v8133_v40, %v8136_v13  ;;  %v8144_v41 = vmul.f32 %v13547_v16, %v8137_v52  ;;  %v8145_v60 = vmul.f32 %v13545_v24, %v8137_v52  ;;  %v8146_v34 = vmul.f32 %v13555_v58, %v8137_v52 }
 0x9b7   :  { %v8147_v62 = vmul.f32 %v13553_v22, %v8137_v52  ;;  %v8148_v32 = vmul.f32 %v13563_v29, %v8137_v52  ;;  %v8149_v21 = vmul.f32 %v13561_v26, %v8137_v52  ;;  %v8150_v57 = vmul.f32 %v13569_v27, %v8137_v52  ;;  %v10919_v27 = vld [vmem:[%s13734_s0] sm:$0xff] }
 0x9b8   :  { %v8151_v23 = vmul.f32 %v13571_v50, %v8137_v52  ;;  %v8152_v8 = vmul.f32 %v13577_v30, %v8141_v2  ;;  %v8153_v18 = vmul.f32 %v13575_v9, %v8141_v2  ;;  %v8154_v16 = vmul.f32 %v13587_v0, %v8141_v2  ;;  %v10920_v9 = vld [vmem:[%s13734_s0 + $0x8] sm:$0xff] }
 0x9b9   :  { %v8155_v24 = vmul.f32 %v13585_v46, %v8141_v2  ;;  %v8156_v58 = vmul.f32 %v13595_v25, %v8141_v2  ;;  %v8157_v22 = vmul.f32 %v13593_v6, %v8141_v2  ;;  %v8158_v29 = vmul.f32 %v13603_v54, %v8141_v2  ;;  %v10921_v46 = vld [vmem:[%s13734_s0 + $0x10] sm:$0xff]  ;;  %v10922_v6 = vld [vmem:[%s13734_s0 + $0x18] sm:$0xff] }
 0x9ba   :  { %v8159_v26 = vmul.f32 %v13601_v61, %v8141_v2  ;;  %v8160_v50 = vadd.f32 %v10919_v27, %v8144_v41  ;;  %v8161_v30 = vadd.f32 %v10920_v9, %v8145_v60  ;;  %v8162_v0 = vadd.f32 %v10921_v46, %v8146_v34  ;;  %v10923_v61 = vld [vmem:[%s13734_s0 + $0x20] sm:$0xff]  ;;  %s10935_s0 = scalar_lea.vmem %s8198_s14, 2048 }
 0x9bb   :  { %v8163_v25 = vadd.f32 %v10922_v6, %v8147_v62  ;;  %v8164_v54 = vadd.f32 %v10923_v61, %v8148_v32  ;;  %v8165_v1 = vadd.f32 %v10924_v19, %v8149_v21  ;;  %v8166_v49 = vadd.f32 %v10925_v20, %v8150_v57  ;;  %p10936_p0 = scmp.ne.s32.totalorder %s8198_s14, %s10935_s0  ;;  %p10941_p2 = scmp.lt.s32.totalorder %s10935_s0, %s10935_s0 }
 0x9bc   :  { %v8167_v43 = vadd.f32 %v10926_v28, %v8151_v23  ;;  %v8168_v44 = vadd.f32 %v10927_v63, %v8152_v8  ;;  %v8169_v59 = vadd.f32 %v10928_v10, %v8153_v18  ;;  %v8170_v11 = vadd.f32 %v10929_v36, %v8154_v16  ;;  %8176 = vst.msk [vmem:[#allocation3] sm:$0xff] %vm14201_vm2, %v8160_v50 }
 0x9bd   :  { %8177 = vst.msk [vmem:[#allocation3 + $0x8] sm:$0xff] %vm14202_vm3, %v8161_v30  ;;  %v8171_v33 = vadd.f32 %v10930_v48, %v8155_v24  ;;  %v8172_v5 = vadd.f32 %v10931_v4, %v8156_v58  ;;  %v8173_v56 = vadd.f32 %v10932_v3, %v8157_v22  ;;  %v8174_v42 = vadd.f32 %v10933_v7, %v8158_v29  ;;  %p10942_p3 = por %p10941_p2, %p10940_p1 }
 0x9be   :  { %8178 = vst.msk [vmem:[#allocation3 + $0x10] sm:$0xff] %vm14203_vm4, %v8162_v0  ;;  %v8175_v53 = vadd.f32 %v10934_v14, %v8159_v26 }
 0x9bf   :  { %8179 = vst.msk [vmem:[#allocation3 + $0x18] sm:$0xff] %vm14204_vm5, %v8163_v25  ;;  %p10943_p4 = pnand %p10942_p3, %p10936_p0 }
 0x9c0   :  { %8180 = vst.msk [vmem:[#allocation3 + $0x20] sm:$0xff] %vm14205_vm6, %v8164_v54 }
 0x9c1   :  { %8181 = vst.msk [vmem:[#allocation3 + $0x28] sm:$0xff] %vm14206_vm7, %v8165_v1 }
 0x9c2   :  { %8182 = vst.msk [vmem:[#allocation3 + $0x30] sm:$0xff] %vm14207_vm8, %v8166_v49 }
 0x9c3   :  { %8183 = vst.msk [vmem:[#allocation3 + $0x38] sm:$0xff] %vm14208_vm12, %v8167_v43 }
 0x9c4   :  { %8184 = vst.msk [vmem:[#allocation3 + $0x40] sm:$0xff] %vm14209_vm13, %v8168_v44 }
 0x9c5   :  { %8185 = vst.msk [vmem:[#allocation3 + $0x48] sm:$0xff] %vm14210_vm15, %v8169_v59 }
 0x9c6   :  { %8186 = vst.msk [vmem:[#allocation3 + $0x50] sm:$0xff] %vm14211_vm10, %v8170_v11 }
 0x9c7   :  { %8187 = vst.msk [vmem:[#allocation3 + $0x58] sm:$0xff] %vm14212_vm14, %v8171_v33 }
 0x9c8   :  { %8188 = vst.msk [vmem:[#allocation3 + $0x60] sm:$0xff] %vm14213_vm11, %v8172_v5 }
 0x9c9   :  { %8189 = vst.msk [vmem:[#allocation3 + $0x68] sm:$0xff] %vm14214_vm9, %v8173_v56 }
 0x9ca   :  { %8190 = vst.msk [vmem:[#allocation3 + $0x70] sm:$0xff] %vm14185_vm0, %v8174_v42 }
 0x9cb   :  { %8191 = vst.msk [vmem:[#allocation3 + $0x78] sm:$0xff] %vm14215_vm1, %v8175_v53 }
 0x9cc   :  { %10946 = shalt.err (!%p10943_p4)
}
 0x9cd   :  { %s10947_s8 = scalar_lea.hbm %s13741_s7, 2048 }
 0x9ce   :  { %p10948_p5 = scmp.ne.s32.totalorder %s13741_s7, %s10947_s8  ;;  %p10951_p6 = scmp.lt.u32.totalorder %s10947_s8, %s13741_s7 }
 0x9d0   :  { %p10953_p7 = pnand %p10951_p6, %p10948_p5 }
 0x9d2   :  { %10956 = shalt.err (!%p10953_p7)
}
 0x9d3   :  { %s10966_s13 = smov 128   ;;  %s10967_s2 = smov 8  }
 0x9d4   :  { %8203 = dma.vmem_to_hbm [thread:$0]  %s8198_s14, 2048, %s13741_s7, [#allocation4], %s10966_s13, %s10966_s13, %s10967_s2  }
 0x9d5   :  { %10957 = dma.done.wait [#allocation4], 2048  }
 0x9d6   :  { %10958 = vsyncadd [#allocation4], 4294965248 }
 0x9d7   :  { %8207 = vsyncpa [#allocation4], 1 }

</bundles_post_ra>
